<compile_context>
chip_gen: v7x
topology: tpu7x:2x2x1
jax: 0.10.0
libtpu: 0.0.40
codegen_flags: <defaults>
</compile_context>

<pallas_src>
import functools

import numpy as np
import jax
import jax.numpy as jnp
from jax import lax
from jax.experimental import pallas as pl
from jax.experimental.pallas import tpu as pltpu

_LANE = 128
_SUB = 8


def _round_up(v, m):
    return ((v + m - 1) // m) * m


def se_bottle_block_kernel(x_ref, cmask_ref, w1_ref, b1_ref, w2_ref, b2_ref,
                           w3_ref, b3_ref, sew1t_ref, sew2_ref, o_ref, *, W):
    HW = x_ref.shape[1]
    bf16 = jnp.bfloat16

    x = x_ref[0]                                   # (HW, Cp) f32, kept f32 for residual

    # ---- conv1 (1x1) + folded BN + ReLU : bf16 MXU matmul, f32 accumulate
    h1 = jnp.dot(x.astype(bf16), w1_ref[...],
                 preferred_element_type=jnp.float32) + b1_ref[...]
    h1 = jnp.maximum(h1, 0.0)                      # (HW, Cmidp) f32

    # ---- conv2 (3x3, stride 1, pad 1) + folded BN + ReLU
    # Zero-pad (W+1) rows on each side of the flattened spatial axis; the 9
    # spatial taps are then static slices (row over/underflow absorbed by the
    # zero pad).  Column wrap for dw = +/-1 is killed by a (HW,1) 0/1 mask.
    zpad = jnp.zeros((W + 1, h1.shape[1]), h1.dtype)
    h1_pad = jnp.concatenate([zpad, h1, zpad], axis=0)      # (HW + 2W + 2, Cmidp)
    m_left = cmask_ref[0]                           # (HW,1): 1.0 where w-1 valid
    m_right = cmask_ref[1]                          # (HW,1): 1.0 where w+1 valid

    taps = []
    for dh in (-1, 0, 1):
        for dw in (-1, 0, 1):
            start = (W + 1) + dh * W + dw
            t = h1_pad[start:start + HW]            # shifted copy, (HW, Cmidp) f32
            if dw == -1:
                t = t * m_left
            elif dw == 1:
                t = t * m_right
            taps.append(t.astype(bf16))
    stacked = jnp.concatenate(taps, axis=-1)        # (HW, 9*Cmidp) bf16

    # single K = 9*Cmidp MXU matmul against the stacked 3x3 weights
    h2 = jnp.dot(stacked, w2_ref[...],
                 preferred_element_type=jnp.float32) + b2_ref[...]
    h2 = jnp.maximum(h2, 0.0)                       # (HW, Cmidp) f32

    # ---- conv3 (1x1) + folded BN (no activation)
    h3 = jnp.dot(h2.astype(bf16), w3_ref[...],
                 preferred_element_type=jnp.float32) + b3_ref[...]   # (HW, C4p) f32

    # ---- SE: global avg-pool -> fc reduce -> ReLU -> fc expand -> sigmoid.
    # M=1 "matmuls" kept off the MXU: VPU multiply + XLU reductions.
    pooled = jnp.mean(h3, axis=0, keepdims=True)                      # (1, C4p)
    hid = jnp.sum(pooled * sew1t_ref[...], axis=-1, keepdims=True)    # (crp, 1)
    hid = jnp.maximum(hid, 0.0)
    gate = jax.nn.sigmoid(jnp.sum(hid * sew2_ref[...], axis=0, keepdims=True))  # (1, C4p)

    # ---- SE scale + residual add + ReLU; lane-dense (C4p % 128 == 0) store
    o_ref[0] = jnp.maximum(h3 * gate + x, 0.0).astype(o_ref.dtype)


def se_bottle_block(x_nchw, params, H, W):
    N, Cin, _, _ = x_nchw.shape
    Cmid = params['w1'].shape[1]
    C4 = params['w3'].shape[1]
    cr = params['se_w1'].shape[1]
    HW = H * W
    assert Cin == C4, "stride=1 / downsample=None requires in_channels == out*expansion"

    Cinp = _round_up(Cin, _LANE)
    Cmidp = _round_up(Cmid, _LANE)
    C4p = _round_up(C4, _LANE)
    crp = _round_up(cr, _SUB)

    f32, bf16 = jnp.float32, jnp.bfloat16

    # Zero-padded (to lane width), bf16 matmul weights; biases stay f32.
    w1 = jnp.zeros((Cinp, Cmidp), f32).at[:Cin, :Cmid].set(params['w1']).astype(bf16)
    b1 = jnp.zeros((1, Cmidp), f32).at[:, :Cmid].set(params['b1'])
    w2s = (jnp.zeros((9, Cmidp, Cmidp), f32)
           .at[:, :Cmid, :Cmid].set(params['w2'])
           .reshape(9 * Cmidp, Cmidp).astype(bf16))
    b2 = jnp.zeros((1, Cmidp), f32).at[:, :Cmid].set(params['b2'])
    w3 = jnp.zeros((Cmidp, C4p), f32).at[:Cmid, :C4].set(params['w3']).astype(bf16)
    b3 = jnp.zeros((1, C4p), f32).at[:, :C4].set(params['b3'])
    se_w1_t = jnp.zeros((crp, C4p), f32).at[:cr, :C4].set(params['se_w1'].T)
    se_w2 = jnp.zeros((crp, C4p), f32).at[:cr, :C4].set(params['se_w2'])

    # NCHW -> (N, HW, Cin), channel-padded to Cinp.
    x_flat = jnp.transpose(x_nchw, (0, 2, 3, 1)).reshape(N, HW, Cin)
    x_p = jnp.zeros((N, HW, Cinp), f32).at[:, :, :Cin].set(x_flat)

    # Host-precomputed 0/1 column masks for the dw = -1 / +1 taps.
    col = np.arange(HW, dtype=np.int32) % W
    cmask = jnp.asarray(
        np.stack([(col >= 1), (col <= W - 2)]).astype(np.float32).reshape(2, HW, 1))

    args = (x_p, cmask, w1, b1, w2s, b2, w3, b3, se_w1_t, se_w2)

    def const_spec(a):
        nd = a.ndim
        return pl.BlockSpec(a.shape, lambda b, _nd=nd: (0,) * _nd)

    in_specs = [pl.BlockSpec((1, HW, Cinp), lambda b: (b, 0, 0))]
    in_specs += [const_spec(a) for a in args[1:]]

    kernel = functools.partial(se_bottle_block_kernel, W=W)

    out = pl.pallas_call(
        kernel,
        out_shape=jax.ShapeDtypeStruct((N, HW, C4p), jnp.float32),
        grid_spec=pltpu.PrefetchScalarGridSpec(
            num_scalar_prefetch=0,
            grid=(N,),
            in_specs=in_specs,
            out_specs=pl.BlockSpec((1, HW, C4p), lambda b: (b, 0, 0)),
        ),
        compiler_params=pltpu.CompilerParams(dimension_semantics=("parallel",)),
    )(*args)

    out = out[:, :, :C4].reshape(N, H, W, C4)
    return jnp.transpose(out, (0, 3, 1, 2))                 # back to NCHW


def init_params(key, in_channels, out_channels, reduction=16, expansion=4, eps=1e-5):
    c4 = out_channels * expansion
    cr = max(c4 // reduction, 1)
    keys = jax.random.split(key, 8)

    def bn_fold(k, c):
        k1, k2, k3, k4 = jax.random.split(k, 4)
        gamma = 1.0 + 0.1 * jax.random.normal(k1, (c,))
        beta = 0.1 * jax.random.normal(k2, (c,))
        mean = 0.1 * jax.random.normal(k3, (c,))
        var = 1.0 + 0.1 * jax.random.uniform(k4, (c,))
        scale = gamma / jnp.sqrt(var + eps)
        bias = beta - mean * scale
        return scale, bias

    w1 = jax.random.normal(keys[0], (in_channels, out_channels)) / np.sqrt(in_channels)
    s1, b1 = bn_fold(keys[1], out_channels)
    w1f, b1f = w1 * s1[None, :], b1

    w2 = jax.random.normal(keys[2], (3, 3, out_channels, out_channels)) / np.sqrt(9 * out_channels)
    s2, b2 = bn_fold(keys[3], out_channels)
    w2f, b2f = w2 * s2[None, None, None, :], b2          # HWIO, BN folded

    w3 = jax.random.normal(keys[4], (out_channels, c4)) / np.sqrt(out_channels)
    s3, b3 = bn_fold(keys[5], c4)
    w3f, b3f = w3 * s3[None, :], b3

    # SE fc layers (Hu et al.: bias-free linears)
    se_w1 = jax.random.normal(keys[6], (c4, cr)) / np.sqrt(c4)
    se_w2 = jax.random.normal(keys[7], (cr, c4)) / np.sqrt(cr)

    f32 = jnp.float32
    return dict(
        w1=w1f.astype(f32), b1=b1f.reshape(1, -1).astype(f32),
        w2=w2f.reshape(9, out_channels, out_channels).astype(f32),
        b2=b2f.reshape(1, -1).astype(f32),
        w3=w3f.astype(f32), b3=b3f.reshape(1, -1).astype(f32),
        se_w1=se_w1.astype(f32), se_w2=se_w2.astype(f32),
        w2_hwio=w2f.astype(f32),  # only used by the pure-JAX reference
    )


def reference(x_nchw, params):
    """Pure-JAX reference of the PyTorch forward (eval-mode BN folded)."""
    hp = lax.Precision.HIGHEST
    x = jnp.transpose(x_nchw, (0, 2, 3, 1))                      # NHWC
    h1 = jax.nn.relu(jnp.einsum('nhwc,cd->nhwd', x, params['w1'], precision=hp)
                     + params['b1'][0])
    h2 = lax.conv_general_dilated(h1, params['w2_hwio'], (1, 1), 'SAME',
                                  dimension_numbers=('NHWC', 'HWIO', 'NHWC'),
                                  precision=hp) + params['b2'][0]
    h2 = jax.nn.relu(h2)
    h3 = jnp.einsum('nhwc,cd->nhwd', h2, params['w3'], precision=hp) + params['b3'][0]
    pooled = jnp.mean(h3, axis=(1, 2))                           # (N, C4)
    gate = jax.nn.sigmoid(jax.nn.relu(pooled @ params['se_w1']) @ params['se_w2'])
    out = jax.nn.relu(h3 * gate[:, None, None, :] + x)
    return jnp.transpose(out, (0, 3, 1, 2))                      # NCHW


if __name__ == "__main__":
    # Small shapes consistent with the module: stride=1, downsample=None
    # => in_channels = out_channels * expansion.
    N, out_channels, H, W = 2, 4, 16, 16
    expansion = 4
    in_channels = out_channels * expansion                       # 16

    key = jax.random.PRNGKey(0)
    kx, kp = jax.random.split(key)
    x = jax.random.normal(kx, (N, in_channels, H, W), jnp.float32)   # NCHW like PyTorch
    params = init_params(kp, in_channels, out_channels)

    out = se_bottle_block(x, params, H, W)
    jax.block_until_ready(out)

    ref = reference(x, params)
    # 2e-2 tolerance accounts for bf16 MXU operands (f32 accumulation) vs the
    # f32 HIGHEST-precision reference.
    np.testing.assert_allclose(np.asarray(out), np.asarray(ref), rtol=2e-2, atol=2e-2)
    print("KERNEL_OK")
</pallas_src>

<mosaic_0001>
module attributes {stable_mosaic.version = 11 : i64} {
  func.func @se_bottle_block_kernel(%arg0: i32, %arg1: memref<1x256x128xf32, #tpu.memory_space<vmem>>, %arg2: memref<2x256x1xf32, #tpu.memory_space<vmem>>, %arg3: memref<128x128xbf16, #tpu.memory_space<vmem>>, %arg4: memref<1x128xf32, #tpu.memory_space<vmem>>, %arg5: memref<1152x128xbf16, #tpu.memory_space<vmem>>, %arg6: memref<1x128xf32, #tpu.memory_space<vmem>>, %arg7: memref<128x128xbf16, #tpu.memory_space<vmem>>, %arg8: memref<1x128xf32, #tpu.memory_space<vmem>>, %arg9: memref<8x128xf32, #tpu.memory_space<vmem>>, %arg10: memref<8x128xf32, #tpu.memory_space<vmem>>, %arg11: memref<1x256x128xf32, #tpu.memory_space<vmem>>) attributes {dimension_semantics = [#tpu.dimension_semantics<parallel>], iteration_bounds = array<i64: 2>, scalar_prefetch = 0 : i64, scratch_operands = 0 : i64, tpu.core_type = #tpu.core_type<tc>, window_params = [{transform_indices = @transform_0, window_bounds = array<i64: 1, 256, 128>}, {pipeline_mode = #tpu.pipeline_mode<synchronous>, transform_indices = @transform_1, window_bounds = array<i64: 2, 256, 1>}, {pipeline_mode = #tpu.pipeline_mode<synchronous>, transform_indices = @transform_2, window_bounds = array<i64: 128, 128>}, {pipeline_mode = #tpu.pipeline_mode<synchronous>, transform_indices = @transform_3, window_bounds = array<i64: 1, 128>}, {pipeline_mode = #tpu.pipeline_mode<synchronous>, transform_indices = @transform_4, window_bounds = array<i64: 1152, 128>}, {pipeline_mode = #tpu.pipeline_mode<synchronous>, transform_indices = @transform_5, window_bounds = array<i64: 1, 128>}, {pipeline_mode = #tpu.pipeline_mode<synchronous>, transform_indices = @transform_6, window_bounds = array<i64: 128, 128>}, {pipeline_mode = #tpu.pipeline_mode<synchronous>, transform_indices = @transform_7, window_bounds = array<i64: 1, 128>}, {pipeline_mode = #tpu.pipeline_mode<synchronous>, transform_indices = @transform_8, window_bounds = array<i64: 8, 128>}, {pipeline_mode = #tpu.pipeline_mode<synchronous>, transform_indices = @transform_9, window_bounds = array<i64: 8, 128>}, {transform_indices = @transform_10, window_bounds = array<i64: 1, 256, 128>}]} {
    %c0 = arith.constant 0 : index
    %c0_0 = arith.constant 0 : index
    %c0_1 = arith.constant 0 : index
    %0 = vector.load %arg1[%c0, %c0_0, %c0_1] : memref<1x256x128xf32, #tpu.memory_space<vmem>>, vector<1x256x128xf32>
    %1 = vector.shape_cast %0 : vector<1x256x128xf32> to vector<256x128xf32>
    %2 = arith.truncf %1 : vector<256x128xf32> to vector<256x128xbf16>
    %c0_2 = arith.constant 0 : index
    %c0_3 = arith.constant 0 : index
    %3 = vector.load %arg3[%c0_2, %c0_3] : memref<128x128xbf16, #tpu.memory_space<vmem>>, vector<128x128xbf16>
    %cst = arith.constant dense<0.000000e+00> : vector<256x128xf32>
    %4 = tpu.matmul %2, %3, %cst {dimension_numbers = #tpu.dot_dimension_numbers<[1], [0], [0], [1], [0, 0, 1, 1], [], []>} : vector<256x128xbf16>, vector<128x128xbf16>, vector<256x128xf32> -> vector<256x128xf32>
    %c0_4 = arith.constant 0 : index
    %c0_5 = arith.constant 0 : index
    %5 = vector.load %arg4[%c0_4, %c0_5] : memref<1x128xf32, #tpu.memory_space<vmem>>, vector<1x128xf32>
    %6 = vector.broadcast %5 : vector<1x128xf32> to vector<256x128xf32>
    %7 = arith.addf %4, %6 : vector<256x128xf32>
    %cst_6 = arith.constant 0.000000e+00 : f32
    %8 = vector.broadcast %cst_6 : f32 to vector<256x128xf32>
    %9 = arith.maximumf %7, %8 : vector<256x128xf32>
    %cst_7 = arith.constant 0.000000e+00 : f32
    %10 = vector.broadcast %cst_7 : f32 to vector<17x128xf32>
    %11 = tpu.concatenate %10, %9, %10 in 0 : vector<17x128xf32>, vector<256x128xf32>, vector<17x128xf32> -> vector<290x128xf32>
    %c0_8 = arith.constant 0 : index
    %c0_9 = arith.constant 0 : index
    %c0_10 = arith.constant 0 : index
    %12 = vector.load %arg2[%c0_8, %c0_9, %c0_10] : memref<2x256x1xf32, #tpu.memory_space<vmem>>, vector<1x256x1xf32>
    %13 = vector.shape_cast %12 : vector<1x256x1xf32> to vector<256x1xf32>
    %c1 = arith.constant 1 : index
    %c0_11 = arith.constant 0 : index
    %c0_12 = arith.constant 0 : index
    %14 = vector.load %arg2[%c1, %c0_11, %c0_12] : memref<2x256x1xf32, #tpu.memory_space<vmem>>, vector<1x256x1xf32>
    %15 = vector.shape_cast %14 : vector<1x256x1xf32> to vector<256x1xf32>
    %16 = vector.extract_strided_slice %11 {offsets = [0, 0], sizes = [256, 128], strides = [1, 1]} : vector<290x128xf32> to vector<256x128xf32>
    %17 = vector.broadcast %13 : vector<256x1xf32> to vector<256x128xf32>
    %18 = arith.mulf %16, %17 : vector<256x128xf32>
    %19 = arith.truncf %18 : vector<256x128xf32> to vector<256x128xbf16>
    %20 = vector.extract_strided_slice %11 {offsets = [1, 0], sizes = [256, 128], strides = [1, 1]} : vector<290x128xf32> to vector<256x128xf32>
    %21 = arith.truncf %20 : vector<256x128xf32> to vector<256x128xbf16>
    %22 = vector.extract_strided_slice %11 {offsets = [2, 0], sizes = [256, 128], strides = [1, 1]} : vector<290x128xf32> to vector<256x128xf32>
    %23 = vector.broadcast %15 : vector<256x1xf32> to vector<256x128xf32>
    %24 = arith.mulf %22, %23 : vector<256x128xf32>
    %25 = arith.truncf %24 : vector<256x128xf32> to vector<256x128xbf16>
    %26 = vector.extract_strided_slice %11 {offsets = [16, 0], sizes = [256, 128], strides = [1, 1]} : vector<290x128xf32> to vector<256x128xf32>
    %27 = vector.broadcast %13 : vector<256x1xf32> to vector<256x128xf32>
    %28 = arith.mulf %26, %27 : vector<256x128xf32>
    %29 = arith.truncf %28 : vector<256x128xf32> to vector<256x128xbf16>
    %30 = vector.extract_strided_slice %11 {offsets = [17, 0], sizes = [256, 128], strides = [1, 1]} : vector<290x128xf32> to vector<256x128xf32>
    %31 = arith.truncf %30 : vector<256x128xf32> to vector<256x128xbf16>
    %32 = vector.extract_strided_slice %11 {offsets = [18, 0], sizes = [256, 128], strides = [1, 1]} : vector<290x128xf32> to vector<256x128xf32>
    %33 = vector.broadcast %15 : vector<256x1xf32> to vector<256x128xf32>
    %34 = arith.mulf %32, %33 : vector<256x128xf32>
    %35 = arith.truncf %34 : vector<256x128xf32> to vector<256x128xbf16>
    %36 = vector.extract_strided_slice %11 {offsets = [32, 0], sizes = [256, 128], strides = [1, 1]} : vector<290x128xf32> to vector<256x128xf32>
    %37 = vector.broadcast %13 : vector<256x1xf32> to vector<256x128xf32>
    %38 = arith.mulf %36, %37 : vector<256x128xf32>
    %39 = arith.truncf %38 : vector<256x128xf32> to vector<256x128xbf16>
    %40 = vector.extract_strided_slice %11 {offsets = [33, 0], sizes = [256, 128], strides = [1, 1]} : vector<290x128xf32> to vector<256x128xf32>
    %41 = arith.truncf %40 : vector<256x128xf32> to vector<256x128xbf16>
    %42 = vector.extract_strided_slice %11 {offsets = [34, 0], sizes = [256, 128], strides = [1, 1]} : vector<290x128xf32> to vector<256x128xf32>
    %43 = vector.broadcast %15 : vector<256x1xf32> to vector<256x128xf32>
    %44 = arith.mulf %42, %43 : vector<256x128xf32>
    %45 = arith.truncf %44 : vector<256x128xf32> to vector<256x128xbf16>
    %46 = tpu.concatenate %19, %21, %25, %29, %31, %35, %39, %41, %45 in 1 : vector<256x128xbf16>, vector<256x128xbf16>, vector<256x128xbf16>, vector<256x128xbf16>, vector<256x128xbf16>, vector<256x128xbf16>, vector<256x128xbf16>, vector<256x128xbf16>, vector<256x128xbf16> -> vector<256x1152xbf16>
    %c0_13 = arith.constant 0 : index
    %c0_14 = arith.constant 0 : index
    %47 = vector.load %arg5[%c0_13, %c0_14] : memref<1152x128xbf16, #tpu.memory_space<vmem>>, vector<1152x128xbf16>
    %cst_15 = arith.constant dense<0.000000e+00> : vector<256x128xf32>
    %48 = tpu.matmul %46, %47, %cst_15 {dimension_numbers = #tpu.dot_dimension_numbers<[1], [0], [0], [1], [0, 0, 1, 1], [], []>} : vector<256x1152xbf16>, vector<1152x128xbf16>, vector<256x128xf32> -> vector<256x128xf32>
    %c0_16 = arith.constant 0 : index
    %c0_17 = arith.constant 0 : index
    %49 = vector.load %arg6[%c0_16, %c0_17] : memref<1x128xf32, #tpu.memory_space<vmem>>, vector<1x128xf32>
    %50 = vector.broadcast %49 : vector<1x128xf32> to vector<256x128xf32>
    %51 = arith.addf %48, %50 : vector<256x128xf32>
    %cst_18 = arith.constant 0.000000e+00 : f32
    %52 = vector.broadcast %cst_18 : f32 to vector<256x128xf32>
    %53 = arith.maximumf %51, %52 : vector<256x128xf32>
    %54 = arith.truncf %53 : vector<256x128xf32> to vector<256x128xbf16>
    %c0_19 = arith.constant 0 : index
    %c0_20 = arith.constant 0 : index
    %55 = vector.load %arg7[%c0_19, %c0_20] : memref<128x128xbf16, #tpu.memory_space<vmem>>, vector<128x128xbf16>
    %cst_21 = arith.constant dense<0.000000e+00> : vector<256x128xf32>
    %56 = tpu.matmul %54, %55, %cst_21 {dimension_numbers = #tpu.dot_dimension_numbers<[1], [0], [0], [1], [0, 0, 1, 1], [], []>} : vector<256x128xbf16>, vector<128x128xbf16>, vector<256x128xf32> -> vector<256x128xf32>
    %c0_22 = arith.constant 0 : index
    %c0_23 = arith.constant 0 : index
    %57 = vector.load %arg8[%c0_22, %c0_23] : memref<1x128xf32, #tpu.memory_space<vmem>>, vector<1x128xf32>
    %58 = vector.broadcast %57 : vector<1x128xf32> to vector<256x128xf32>
    %59 = arith.addf %56, %58 : vector<256x128xf32>
    %cst_24 = arith.constant dense<0.000000e+00> : vector<128xf32>
    %60 = vector.multi_reduction <add>, %59, %cst_24 [0] : vector<256x128xf32> to vector<128xf32>
    %61 = vector.shape_cast %60 : vector<128xf32> to vector<1x128xf32>
    %cst_25 = arith.constant 2.560000e+02 : f32
    %62 = vector.broadcast %cst_25 : f32 to vector<1x128xf32>
    %63 = arith.divf %61, %62 : vector<1x128xf32>
    %c0_26 = arith.constant 0 : index
    %c0_27 = arith.constant 0 : index
    %64 = vector.load %arg9[%c0_26, %c0_27] : memref<8x128xf32, #tpu.memory_space<vmem>>, vector<8x128xf32>
    %65 = vector.broadcast %63 : vector<1x128xf32> to vector<8x128xf32>
    %66 = arith.mulf %65, %64 : vector<8x128xf32>
    %cst_28 = arith.constant dense<0.000000e+00> : vector<8xf32>
    %67 = vector.multi_reduction <add>, %66, %cst_28 [1] : vector<8x128xf32> to vector<8xf32>
    %68 = vector.shape_cast %67 : vector<8xf32> to vector<8x1xf32>
    %cst_29 = arith.constant 0.000000e+00 : f32
    %69 = vector.broadcast %cst_29 : f32 to vector<8x1xf32>
    %70 = arith.maximumf %68, %69 : vector<8x1xf32>
    %c0_30 = arith.constant 0 : index
    %c0_31 = arith.constant 0 : index
    %71 = vector.load %arg10[%c0_30, %c0_31] : memref<8x128xf32, #tpu.memory_space<vmem>>, vector<8x128xf32>
    %72 = vector.broadcast %70 : vector<8x1xf32> to vector<8x128xf32>
    %73 = arith.mulf %72, %71 : vector<8x128xf32>
    %cst_32 = arith.constant dense<0.000000e+00> : vector<128xf32>
    %74 = vector.multi_reduction <add>, %73, %cst_32 [0] : vector<8x128xf32> to vector<128xf32>
    %75 = vector.shape_cast %74 : vector<128xf32> to vector<1x128xf32>
    %76 = arith.negf %75 : vector<1x128xf32>
    %77 = math.exp %76 : vector<1x128xf32>
    %cst_33 = arith.constant 1.000000e+00 : f32
    %78 = vector.broadcast %cst_33 : f32 to vector<1x128xf32>
    %79 = arith.addf %78, %77 : vector<1x128xf32>
    %80 = arith.divf %78, %79 : vector<1x128xf32>
    %81 = vector.broadcast %80 : vector<1x128xf32> to vector<256x128xf32>
    %82 = arith.mulf %59, %81 : vector<256x128xf32>
    %83 = arith.addf %82, %1 : vector<256x128xf32>
    %cst_34 = arith.constant 0.000000e+00 : f32
    %84 = vector.broadcast %cst_34 : f32 to vector<256x128xf32>
    %85 = arith.maximumf %83, %84 : vector<256x128xf32>
    %c0_35 = arith.constant 0 : index
    %c0_36 = arith.constant 0 : index
    %c0_37 = arith.constant 0 : index
    %86 = vector.load %arg11[%c0_35, %c0_36, %c0_37] : memref<1x256x128xf32, #tpu.memory_space<vmem>>, vector<1x256x128xf32>
    %87 = vector.shape_cast %86 : vector<1x256x128xf32> to vector<256x128xf32>
    %88 = vector.shape_cast %85 : vector<256x128xf32> to vector<1x256x128xf32>
    tpu.vector_store %arg11[%c0_35, %c0_36, %c0_37], %88 {strides = array<i32>} : memref<1x256x128xf32, #tpu.memory_space<vmem>>, vector<1x256x128xf32>,
    return
  }
  func.func @transform_0(%arg0: i32) -> (i32, i32, i32) {
    %c0_i32 = arith.constant 0 : i32
    %c0_i32_0 = arith.constant 0 : i32
    %c0_i32_1 = arith.constant 0 : i32
    return %arg0, %c0_i32, %c0_i32_0 : i32, i32, i32
  }
  func.func @transform_1(%arg0: i32) -> (i32, i32, i32) {
    %c0_i32 = arith.constant 0 : i32
    %c0_i32_0 = arith.constant 0 : i32
    %c0_i32_1 = arith.constant 0 : i32
    %c0_i32_2 = arith.constant 0 : i32
    return %c0_i32, %c0_i32_0, %c0_i32_1 : i32, i32, i32
  }
  func.func @transform_2(%arg0: i32) -> (i32, i32) {
    %c0_i32 = arith.constant 0 : i32
    %c0_i32_0 = arith.constant 0 : i32
    %c0_i32_1 = arith.constant 0 : i32
    return %c0_i32, %c0_i32_0 : i32, i32
  }
  func.func @transform_3(%arg0: i32) -> (i32, i32) {
    %c0_i32 = arith.constant 0 : i32
    %c0_i32_0 = arith.constant 0 : i32
    %c0_i32_1 = arith.constant 0 : i32
    return %c0_i32, %c0_i32_0 : i32, i32
  }
  func.func @transform_4(%arg0: i32) -> (i32, i32) {
    %c0_i32 = arith.constant 0 : i32
    %c0_i32_0 = arith.constant 0 : i32
    %c0_i32_1 = arith.constant 0 : i32
    return %c0_i32, %c0_i32_0 : i32, i32
  }
  func.func @transform_5(%arg0: i32) -> (i32, i32) {
    %c0_i32 = arith.constant 0 : i32
    %c0_i32_0 = arith.constant 0 : i32
    %c0_i32_1 = arith.constant 0 : i32
    return %c0_i32, %c0_i32_0 : i32, i32
  }
  func.func @transform_6(%arg0: i32) -> (i32, i32) {
    %c0_i32 = arith.constant 0 : i32
    %c0_i32_0 = arith.constant 0 : i32
    %c0_i32_1 = arith.constant 0 : i32
    return %c0_i32, %c0_i32_0 : i32, i32
  }
  func.func @transform_7(%arg0: i32) -> (i32, i32) {
    %c0_i32 = arith.constant 0 : i32
    %c0_i32_0 = arith.constant 0 : i32
    %c0_i32_1 = arith.constant 0 : i32
    return %c0_i32, %c0_i32_0 : i32, i32
  }
  func.func @transform_8(%arg0: i32) -> (i32, i32) {
    %c0_i32 = arith.constant 0 : i32
    %c0_i32_0 = arith.constant 0 : i32
    %c0_i32_1 = arith.constant 0 : i32
    return %c0_i32, %c0_i32_0 : i32, i32
  }
  func.func @transform_9(%arg0: i32) -> (i32, i32) {
    %c0_i32 = arith.constant 0 : i32
    %c0_i32_0 = arith.constant 0 : i32
    %c0_i32_1 = arith.constant 0 : i32
    return %c0_i32, %c0_i32_0 : i32, i32
  }
  func.func @transform_10(%arg0: i32) -> (i32, i32, i32) {
    %c0_i32 = arith.constant 0 : i32
    %c0_i32_0 = arith.constant 0 : i32
    %c0_i32_1 = arith.constant 0 : i32
    return %arg0, %c0_i32, %c0_i32_0 : i32, i32, i32
  }
}

</mosaic_0001>

<bundles_post_ra>
// kernel: tpu_custom_call.1
= control target key start
LH: loop header
LB: loop body
LE: loop exit
PB: predicated region body
PF: predicated region fallthrough
CT: control target
= control target key end

     0   :  { %15 = vsyncpa [#allocation3], 0  ;;  %s7403_s0 = inlined_call_operand.vmem [shape: f32[2,256,128], index: 0, kind: input, shape index: {}]   ;;  %s7404_s1 = inlined_call_operand.vmem [shape: f32[2,256,1], index: 1, kind: input, shape index: {}]   ;;  %s7405_s2 = inlined_call_operand.hbm [shape: bf16[128,128], index: 2, kind: input, shape index: {}]   ;;  %s7406_s3 = inlined_call_operand.vmem [shape: f32[1,128], index: 3, kind: input, shape index: {}]   ;;  %s7407_s4 = inlined_call_operand.hbm [shape: bf16[1152,128], index: 4, kind: input, shape index: {}]   ;;  %s7408_s5 = inlined_call_operand.vmem [shape: f32[1,128], index: 5, kind: input, shape index: {}]   ;;  %s7409_s6 = inlined_call_operand.hbm [shape: bf16[128,128], index: 6, kind: input, shape index: {}]   ;;  %s7410_s7 = inlined_call_operand.vmem [shape: f32[1,128], index: 7, kind: input, shape index: {}]   ;;  %s7411_s8 = inlined_call_operand.vmem [shape: f32[8,128], index: 8, kind: input, shape index: {}]   ;;  %s7412_s9 = inlined_call_operand.vmem [shape: f32[8,128], index: 9, kind: input, shape index: {}]   ;;  %s7413_s10 = inlined_call_operand.hbm [shape: f32[2,256,128], index: 10, kind: output, shape index: {}]  }
   0x1   :  { %16 = vsyncpa [#allocation6], 0 }
   0x2   :  { %17 = vsyncpa [#allocation4], 0 }
   0x3   :  { %19 = vsyncpa [#allocation4 + $0x1], 0  ;;  %s5192_s13 = smov 0   ;;  %s5194_s14 = smov 0  }
   0x4   :  { %s5196_s15 = smov 0   ;;  %s5198_s16 = smov 0  }
   0x5 LB: > { %7599 = sst [smem:[#allocation12_spill]] %s5113_s13  ;;  %s5213_s17 = sadd.s32 4294967295, %s5125_s16   ;;  %s5125_s16 = sphi %s5198_s16, %s7909_s16   ;;  %s5121_s15 = sphi %s5196_s15, %s7911_s15   ;;  %s5117_s14 = sphi %s5194_s14, %s7913_s14   ;;  %s5113_s13 = sphi %s5192_s13, %s7912_s13  }
   0x6   : > { %7600 = sst [smem:[#allocation13_spill]] %s5121_s15  ;;  %s3945_s18 = sadd.s32 4294967294, %s5125_s16  }
   0x7   : > { %7601 = sst [smem:[#allocation14_spill]] %s5125_s16  ;;  %s5217_s19 = sadd.s32 1, %s5125_s16  }
   0x8   : > { %7602 = sst [smem:[#allocation15_spill]] %s5217_s19  ;;  %s247_s20 = sadd.s32 1, %s5121_s15 }
   0x9   : > { %s244_s21 = ssub.s32 %s5125_s16, %s5217_s19  ;;  %p257_p0 = scmp.ne.s32.totalorder %s5121_s15, %s5117_s14 }
   0xa   : > { %p245_p1 = scmp.eq.s32.totalorder %s244_s21, 0  ;;  %p258_p2 = scmp.eq.s32.totalorder %s5213_s17, 1 }
   0xb   : > { %p263_p3 = scmp.ne.s32.totalorder %s5117_s14, %s5113_s13  ;;  %p264_p4 = scmp.eq.s32.totalorder %s3945_s18, 1 }
   0xc   : > { %s5228_s22 = scalar_select %p245_p1, %s5121_s15, %s247_s20  }
   0xd   : > { %p5230_p5 = por %p258_p2, %p257_p0  ;;  %p5234_p6 = por %p264_p4, %p263_p3 }
   0xe   : > { %7603 = sst [smem:[#allocation16_spill]] %s5228_s22  ;;  %p3946_p7 = scmp.ge.s32.totalorder %s5125_s16, 1 }
   0xf   : > { %s7604_s23 = scalar_select %p5230_p5, 1, 0 }
  0x10   : > { %s7605_s24 = scalar_select %p5234_p6, 1, 0 }
  0x11   : > { %p271_p8 = scmp.lt.s32.totalorder %s5125_s16, 3  ;;  %p7415_p9 = scmp.eq.s32.totalorder %s5213_s17, 0 }
  0x12   : > { %7606 = sst [smem:[#allocation17_spill]] %s7605_s24  ;;  %s5127_s26 = smov [#allocation5]  }
  0x13   : > { %p5241_p10 = pnand %p3946_p7, %p271_p8  ;;  %s302_s27 = sshll.u32 %s5127_s26, 4  ;;  %s5247_s27 = int_to_ptr.vmem [resolvable:$true] %s302_s27 }
  0x14   : > { %s5128_s29 = smov [#allocation2]   ;;  %s5129_s11 = smov [#allocation7]  }
  0x15   : > { %s7607_s25 = scalar_select %p5241_p10, 1, 0 }
  0x16   : > { %p4783_p11 = pneg %p5241_p10  ;;  %s286_s30 = sshll.u32 %s5128_s29, 4  ;;  %s5255_s30 = int_to_ptr.vmem [resolvable:$true] %s286_s30 }
  0x17   : > { %s5257_s12 = sshll.u32 %s5129_s11, 4  ;;  %s4971_s21 = scalar_lea.hbm %s7407_s4, 9216  ;;  %s319_s12 = int_to_ptr.vmem [resolvable:$true] %s5257_s12 }
  0x18   : > { %p5251_p12 = pnand %p7415_p9, %p4783_p11  ;;  %p4972_p13 = scmp.ne.s32.totalorder %s7407_s4, %s4971_s21 }
  0x19   : > { %p4978_p3 = scmp.lt.u32.totalorder %s4971_s21, %s7407_s4 }
  0x1a   : > { %p5267_p0 = pneg %p5251_p12 }
  0x1c   : > { %p4974_p1 = pnand %p5267_p0, %p4972_p13 }
  0x1e   : > { %p4975_p2 = pneg %p4974_p1 }
  0x20   : > { %p4980_p4 = pnand %p4978_p3, %p4975_p2 }
  0x22   : > { %4983 = shalt.err (!%p4980_p4)
}
  0x23   : > { %s4984_s22 = scalar_lea.vmem %s5247_s27, 9216  ;;  %p4992_p9 = scmp.lt.s32.totalorder %s5247_s27, %s5247_s27 }
  0x24   : > { %p4985_p7 = scmp.ne.s32.totalorder %s5247_s27, %s4984_s22  ;;  %p4993_p6 = scmp.lt.s32.totalorder %s4984_s22, %s4984_s22 }
  0x26   : > { %p4987_p8 = pnand %p4985_p7, %p5267_p0  ;;  %p4994_p13 = por %p4993_p6, %p4992_p9 }
  0x28   : > { %p4988_p11 = pneg %p4987_p8 }
  0x2a   : > { %p4995_p1 = pnand %p4994_p13, %p4988_p11 }
  0x2c   : > { %4998 = shalt.err (!%p4995_p1)
}
  0x2d   : > { %s5130_s18 = smov 64   ;;  %s5131_s20 = smov 4  }
  0x2e   : > { %4789 = dma.hbm_to_vmem [thread:$0]  (!%p5251_p12), %s7407_s4, 9216, %s5247_s27, [#allocation6], %s5130_s18, %s5130_s18, %s5131_s20  }
  0x2f   : > { %s4999_s22 = scalar_lea.hbm %s7405_s2, 1024 }
  0x30   : > { %p5000_p6 = scmp.ne.s32.totalorder %s7405_s2, %s4999_s22  ;;  %p5006_p3 = scmp.lt.u32.totalorder %s4999_s22, %s7405_s2 }
  0x32   : > { %p5002_p9 = pnand %p5000_p6, %p5267_p0 }
  0x34   : > { %p5003_p2 = pneg %p5002_p9 }
  0x36   : > { %p5008_p4 = pnand %p5006_p3, %p5003_p2 }
  0x38   : > { %5011 = shalt.err (!%p5008_p4)
}
  0x39   : > { %s5012_s27 = scalar_lea.vmem %s5255_s30, 1024  ;;  %p5020_p13 = scmp.lt.s32.totalorder %s5255_s30, %s5255_s30 }
  0x3a   : > { %p5013_p7 = scmp.ne.s32.totalorder %s5255_s30, %s5012_s27  ;;  %p5021_p1 = scmp.lt.s32.totalorder %s5012_s27, %s5012_s27 }
  0x3c   : > { %p5015_p8 = pnand %p5013_p7, %p5267_p0  ;;  %p5022_p6 = por %p5021_p1, %p5020_p13 }
  0x3e   : > { %p5016_p11 = pneg %p5015_p8 }
  0x40   : > { %p5023_p9 = pnand %p5022_p6, %p5016_p11 }
  0x42   : > { %5026 = shalt.err (!%p5023_p9)
}
  0x43   : > { %4786 = dma.hbm_to_vmem [thread:$0]  (!%p5251_p12), %s7405_s2, 1024, %s5255_s30, [#allocation3], %s5130_s18, %s5130_s18, %s5131_s20  }
  0x44   : > { %s5027_s21 = scalar_lea.hbm %s7409_s6, 1024 }
  0x45   : > { %p5028_p2 = scmp.ne.s32.totalorder %s7409_s6, %s5027_s21  ;;  %p5034_p7 = scmp.lt.u32.totalorder %s5027_s21, %s7409_s6 }
  0x47   : > { %p5030_p3 = pnand %p5028_p2, %p5267_p0 }
  0x49   : > { %p5031_p4 = pneg %p5030_p3 }
  0x4b   : > { %p5036_p8 = pnand %p5034_p7, %p5031_p4 }
  0x4d   : > { %5039 = shalt.err (!%p5036_p8)
}
  0x4e   : > { %s5040_s27 = scalar_lea.vmem %s319_s12, 1024  ;;  %p5048_p6 = scmp.lt.s32.totalorder %s319_s12, %s319_s12 }
  0x4f   : > { %p5041_p11 = scmp.ne.s32.totalorder %s319_s12, %s5040_s27  ;;  %p5049_p9 = scmp.lt.s32.totalorder %s5040_s27, %s5040_s27 }
  0x51   : > { %p5043_p13 = pnand %p5041_p11, %p5267_p0  ;;  %p5050_p5 = por %p5049_p9, %p5048_p6 }
  0x53   : > { %p5044_p1 = pneg %p5043_p13 }
  0x55   : > { %p5051_p10 = pnand %p5050_p5, %p5044_p1 }
  0x57   : > { %5054 = shalt.err (!%p5051_p10)
}
  0x58   : > { %4792 = dma.hbm_to_vmem [thread:$0]  (!%p5251_p12), %s7409_s6, 1024, %s319_s12, [#allocation6], %s5130_s18, %s5130_s18, %s5131_s20  }
  0x59   : > { %p7610_p2 = scmp.ne.s32.totalorder %s7607_s25, 0 }
  0x5b   : > { %351 = sbr.rel (%p7610_p2) target bundleno = 1392 (0x570), region = 60 }
  0x62   : > { %p7611_p0 = scmp.eq.s32.totalorder %s5213_s17, 0 }
  0x64   : > { %5100 = dma.done.wait (%p7611_p0), [#allocation3], 1024   ;;  %p7612_p3 = pmov %p7611_p0 }
  0x65   : > { %p7613_p5 = pmov %p7611_p0 }
  0x66   : > { %5102 = vsyncadd (%p7612_p3), [#allocation3], 4294966272 }
  0x67   : > { %5104 = dma.done.wait (%p7613_p5), [#allocation6], 10240   ;;  %p7614_p10 = pmov %p7611_p0 }
  0x68   : > { %v5132_v0 = vmov 0   ;;  %p397_p12 = scmp.lt.s32.totalorder %s5213_s17, 1  ;;  %v4847_v1 = vld [vmem:[#allocation2] sm:$0xff]   ;;  %v848_v2 = vld [vmem:[%s7404_s1 + $0x10] sm:$0xff]  ;;  %v4848_v4 = vld [vmem:[#allocation2 + $0x8] sm:$0xff]   ;;  %vm1264_vm0 = vcmask 1041408  }
  0x69   : > { %5106 = vsyncadd (%p7614_p10), [#allocation6], 4294957056  ;;  %4846 = vset.pattern.permute.xlu1 %v5132_v0  ;;  %4845 = vset.pattern.permute.xlu0 %v5132_v0  ;;  %v846_v3 = vld [vmem:[%s7404_s1] sm:$0xff]  ;;  %v849_v5 = vld [vmem:[%s7404_s1 + $0x18] sm:$0xff]  ;;  %vm747_vm1 = vcmask 1040384   ;;  %vm1776_vm2 = vcmask 1046528  }
  0x6a   : > { %4609 = vmatprep.subr.bf16.mxu0 %v4847_v1  ;;  %4753 = vmatprep.subr.bf16.mxu1 %v4847_v1  ;;  %s398_s18 = scalar_select %p397_p12, %s5213_s17, 1  ;;  %v847_v6 = vld [vmem:[%s7404_s1 + $0x8] sm:$0xff]  ;;  %v4849_v7 = vld [vmem:[#allocation2 + $0x10] sm:$0xff]   ;;  %v850_v9 = vld [vmem:[%s7404_s1 + $0x20] sm:$0xff]  ;;  %vm1610_vm3 = vsmask.f32 7424 }
  0x6b   : > { %4610 = vmatpush3.bf16.msra.mxu0 %v4847_v1  ;;  %4761 = vmatpush3.bf16.msra.mxu1 %v4847_v1  ;;  %v851_v8 = vld [vmem:[%s7404_s1 + $0x28] sm:$0xff]  ;;  %v4850_v10 = vld [vmem:[#allocation2 + $0x18] sm:$0xff]   ;;  %v852_v12 = vld [vmem:[%s7404_s1 + $0x30] sm:$0xff]  ;;  %s394_s27 = sand.u32 1, %s5117_s14   ;;  %s4088_s15 = sshll.u32 %s5213_s17, 12 }
  0x6c   : > { %923 = vperm.xlu1 %4846, %v848_v2   ;;  %913 = vperm.xlu0 %4845, %v846_v3   ;;  %s4087_s21 = sshll.u32 %s398_s18, 8  ;;  %v853_v11 = vld [vmem:[%s7404_s1 + $0x38] sm:$0xff]  ;;  %v4851_v13 = vld [vmem:[#allocation2 + $0x20] sm:$0xff]   ;;  %v855_v20 = vld [vmem:[%s7404_s1 + $0x48] sm:$0xff]  ;;  %s7230_s30 = sshll.u32 %s394_s27, 8 }
  0x6d   : > { %4611 = vmatprep.subr.bf16.mxu0 %v4848_v4  ;;  %4754 = vmatprep.subr.bf16.mxu1 %v4848_v4  ;;  %s5374_s13 = scalar_lea.vmem %s7403_s0, %s4087_s21  ;;  %v854_v21 = vld [vmem:[%s7404_s1 + $0x40] sm:$0xff]  ;;  %v4852_v22 = vld [vmem:[#allocation2 + $0x28] sm:$0xff]   ;;  %v857_v23 = vld [vmem:[%s7404_s1 + $0x58] sm:$0xff]  ;;  %s7340_s12 = scalar_lea.hbm %s7413_s10, %s4088_s15 }
  0x6e   : > { %v403_v14 = vld [vmem:[%s5374_s13] sm:$0xff]  ;;  %v404_v15 = vld [vmem:[%s5374_s13 + $0x8] sm:$0xff]  ;;  %v856_v24 = vld [vmem:[%s7404_s1 + $0x50] sm:$0xff]  ;;  %s7362_s18 = scalar_lea.sflag [#allocation4], %s394_s27  ;;  %p7904_p7 = scmp.ne.s32.totalorder %s7604_s23, 0 }
  0x6f   : > { %4612 = vmatpush3.bf16.msra.mxu0 %v4848_v4  ;;  %4762 = vmatpush3.bf16.msra.mxu1 %v4848_v4  ;;  %v435_v16 = vpack.c.bf16 %v404_v15, %v403_v14  ;;  %v419_v17 = vld [vmem:[%s5374_s13 + $0x80] sm:$0xff]  ;;  %v420_v18 = vld [vmem:[%s5374_s13 + $0x88] sm:$0xff]  ;;  %v4853_v25 = vld [vmem:[#allocation2 + $0x30] sm:$0xff]   ;;  %s5134_s16 = smov [#allocation8]  }
  0x70   : > { %928 = vperm.xlu1 %4846, %v849_v5   ;;  %918 = vperm.xlu0 %4845, %v847_v6   ;;  %v443_v19 = vpack.c.bf16 %v420_v18, %v419_v17  ;;  %v859_v26 = vld [vmem:[%s7404_s1 + $0x68] sm:$0xff]  ;;  %v858_v27 = vld [vmem:[%s7404_s1 + $0x60] sm:$0xff]  ;;  %v4854_v28 = vld [vmem:[#allocation2 + $0x38] sm:$0xff]   ;;  %s5059_s19 = sshll.u32 %s5134_s16, 4  ;;  %s5060_s19 = int_to_ptr.vmem [resolvable:$false] %s5059_s19 }
  0x71   : > { %4613 = vmatprep.subr.bf16.mxu0 %v4849_v7  ;;  %4755 = vmatprep.subr.bf16.mxu1 %v4849_v7  ;;  %v405_v29 = vld [vmem:[%s5374_s13 + $0x10] sm:$0xff]  ;;  %v406_v30 = vld [vmem:[%s5374_s13 + $0x18] sm:$0xff]  ;;  %v407_v33 = vld [vmem:[%s5374_s13 + $0x20] sm:$0xff]  ;;  %s5061_s24 = scalar_lea.vmem %s5060_s19, 8192 }
  0x72   : > { %4625 = vmatprep.mubr.bf16.mxu0 %v435_v16  ;;  %4641 = vmatprep.mubr.bf16.mxu1 %v443_v19  ;;  %v421_v31 = vld [vmem:[%s5374_s13 + $0x90] sm:$0xff]  ;;  %v422_v32 = vld [vmem:[%s5374_s13 + $0x98] sm:$0xff]  ;;  %v408_v34 = vld [vmem:[%s5374_s13 + $0x28] sm:$0xff]  ;;  %v436_v39 = vpack.c.bf16 %v406_v30, %v405_v29 }
  0x73   : > { %4614 = vmatpush3.bf16.msra.mxu0 %v4849_v7  ;;  %4763 = vmatpush3.bf16.msra.mxu1 %v4849_v7  ;;  %v423_v35 = vld [vmem:[%s5374_s13 + $0xa0] sm:$0xff]  ;;  %v424_v36 = vld [vmem:[%s5374_s13 + $0xa8] sm:$0xff]  ;;  %v444_v40 = vpack.c.bf16 %v422_v32, %v421_v31  ;;  %v437_v41 = vpack.c.bf16 %v408_v34, %v407_v33  ;;  %v3970_v43 = vld [vmem:[%s7404_s1 + $0x118] sm:$0xff] }
  0x74   : > { %938 = vperm.xlu1 %4846, %v851_v8   ;;  %933 = vperm.xlu0 %4845, %v850_v9   ;;  %v3968_v37 = vld [vmem:[%s7404_s1 + $0x108] sm:$0xff]  ;;  %v3967_v38 = vld [vmem:[%s7404_s1 + $0x100] sm:$0xff]  ;;  %v445_v42 = vpack.c.bf16 %v424_v36, %v423_v35  ;;  %v3969_v44 = vld [vmem:[%s7404_s1 + $0x110] sm:$0xff] }
  0x75   : > { %4615 = vmatprep.subr.bf16.mxu0 %v4850_v10  ;;  %4756 = vmatprep.subr.bf16.mxu1 %v4850_v10  ;;  %v409_v45 = vld [vmem:[%s5374_s13 + $0x30] sm:$0xff]  ;;  %v410_v46 = vld [vmem:[%s5374_s13 + $0x38] sm:$0xff]  ;;  %v411_v49 = vld [vmem:[%s5374_s13 + $0x40] sm:$0xff] }
  0x76   : > { %v425_v47 = vld [vmem:[%s5374_s13 + $0xb0] sm:$0xff]  ;;  %v426_v48 = vld [vmem:[%s5374_s13 + $0xb8] sm:$0xff]  ;;  %v412_v50 = vld [vmem:[%s5374_s13 + $0x48] sm:$0xff]  ;;  %v438_v55 = vpack.c.bf16 %v410_v46, %v409_v45 }
  0x77   : > { %4616 = vmatpush3.bf16.msra.mxu0 %v4850_v10  ;;  %4764 = vmatpush3.bf16.msra.mxu1 %v4850_v10  ;;  %v427_v51 = vld [vmem:[%s5374_s13 + $0xc0] sm:$0xff]  ;;  %v428_v52 = vld [vmem:[%s5374_s13 + $0xc8] sm:$0xff]  ;;  %v861_v53 = vld [vmem:[%s7404_s1 + $0x78] sm:$0xff]  ;;  %v446_v56 = vpack.c.bf16 %v426_v48, %v425_v47  ;;  %v439_v59 = vpack.c.bf16 %v412_v50, %v411_v49 }
  0x78   : > { %948 = vperm.xlu1 %4846, %v853_v11   ;;  %943 = vperm.xlu0 %4845, %v852_v12   ;;  %v860_v54 = vld [vmem:[%s7404_s1 + $0x70] sm:$0xff]  ;;  %v3972_v57 = vld [vmem:[%s7404_s1 + $0x128] sm:$0xff]  ;;  %v3971_v58 = vld [vmem:[%s7404_s1 + $0x120] sm:$0xff]  ;;  %v447_v60 = vpack.c.bf16 %v428_v52, %v427_v51 }
  0x79   : > { %4617 = vmatprep.subr.bf16.mxu0 %v4851_v13  ;;  %4757 = vmatprep.subr.bf16.mxu1 %v4851_v13  ;;  %v413_v61 = vld [vmem:[%s5374_s13 + $0x50] sm:$0xff]  ;;  %v414_v62 = vld [vmem:[%s5374_s13 + $0x58] sm:$0xff]  ;;  %v415_v2 = vld [vmem:[%s5374_s13 + $0x60] sm:$0xff] }
  0x7a   : > { %v429_v63 = vld [vmem:[%s5374_s13 + $0xd0] sm:$0xff]  ;;  %v430_v1 = vld [vmem:[%s5374_s13 + $0xd8] sm:$0xff]  ;;  %v416_v3 = vld [vmem:[%s5374_s13 + $0x68] sm:$0xff]  ;;  %v440_v8 = vpack.c.bf16 %v414_v62, %v413_v61 }
  0x7b   : > { %4618 = vmatpush3.bf16.msra.mxu0 %v4851_v13  ;;  %4765 = vmatpush3.bf16.msra.mxu1 %v4851_v13  ;;  %v431_v4 = vld [vmem:[%s5374_s13 + $0xe0] sm:$0xff]  ;;  %v432_v5 = vld [vmem:[%s5374_s13 + $0xe8] sm:$0xff]  ;;  %v448_v9 = vpack.c.bf16 %v430_v1, %v429_v63  ;;  %v3974_v10 = vld [vmem:[%s7404_s1 + $0x138] sm:$0xff]  ;;  %v441_v12 = vpack.c.bf16 %v416_v3, %v415_v2 }
  0x7c   : > { %958 = vperm.xlu1 %4846, %v855_v20   ;;  %953 = vperm.xlu0 %4845, %v854_v21   ;;  %v863_v6 = vld [vmem:[%s7404_s1 + $0x88] sm:$0xff]  ;;  %v862_v7 = vld [vmem:[%s7404_s1 + $0x80] sm:$0xff]  ;;  %v3973_v11 = vld [vmem:[%s7404_s1 + $0x130] sm:$0xff]  ;;  %v449_v13 = vpack.c.bf16 %v432_v5, %v431_v4 }
  0x7d   : > { %4619 = vmatprep.subr.bf16.mxu0 %v4852_v22  ;;  %4758 = vmatprep.subr.bf16.mxu1 %v4852_v22  ;;  %v417_v14 = vld [vmem:[%s5374_s13 + $0x70] sm:$0xff]  ;;  %v418_v15 = vld [vmem:[%s5374_s13 + $0x78] sm:$0xff]  ;;  %v3980_v30 = vld [vmem:[%s7404_s1 + $0x168] sm:$0xff] }
  0x7e   : > { %v433_v16 = vld [vmem:[%s5374_s13 + $0xf0] sm:$0xff]  ;;  %v434_v17 = vld [vmem:[%s5374_s13 + $0xf8] sm:$0xff]  ;;  %v442_v20 = vpack.c.bf16 %v418_v15, %v417_v14  ;;  %v3979_v31 = vld [vmem:[%s7404_s1 + $0x160] sm:$0xff] }
  0x7f   : > { %4620 = vmatpush3.bf16.msra.mxu0 %v4852_v22  ;;  %4766 = vmatpush3.bf16.msra.mxu1 %v4852_v22  ;;  %v865_v18 = vld [vmem:[%s7404_s1 + $0x98] sm:$0xff]  ;;  %v864_v19 = vld [vmem:[%s7404_s1 + $0x90] sm:$0xff]  ;;  %v450_v21 = vpack.c.bf16 %v434_v17, %v433_v16  ;;  %v3976_v22 = vld [vmem:[%s7404_s1 + $0x148] sm:$0xff] }
  0x80   : > { %968 = vperm.xlu1 %4846, %v857_v23   ;;  %963 = vperm.xlu0 %4845, %v856_v24   ;;  %v3975_v23 = vld [vmem:[%s7404_s1 + $0x140] sm:$0xff]  ;;  %v867_v24 = vld [vmem:[%s7404_s1 + $0xa8] sm:$0xff]  ;;  %v868_v29 = vld [vmem:[%s7404_s1 + $0xb0] sm:$0xff] }
  0x81   : > { %4621 = vmatprep.subr.bf16.mxu0 %v4853_v25  ;;  %4759 = vmatprep.subr.bf16.mxu1 %v4853_v25  ;;  %v871_v32 = vld [vmem:[%s7404_s1 + $0xc8] sm:$0xff]  ;;  %v870_v33 = vld [vmem:[%s7404_s1 + $0xc0] sm:$0xff]  ;;  %v3982_v34 = vld [vmem:[%s7404_s1 + $0x178] sm:$0xff] }
  0x82   : > { %v3981_v35 = vld [vmem:[%s7404_s1 + $0x170] sm:$0xff]  ;;  %v873_v36 = vld [vmem:[%s7404_s1 + $0xd8] sm:$0xff]  ;;  %v4856_v46 = vld [vmem:[#allocation5 + $0xc0] sm:$0xff]  }
  0x83   : > { %4622 = vmatpush3.bf16.msra.mxu0 %v4853_v25  ;;  %4767 = vmatpush3.bf16.msra.mxu1 %v4853_v25  ;;  %v866_v25 = vld [vmem:[%s7404_s1 + $0xa0] sm:$0xff]  ;;  %v876_v45 = vld [vmem:[%s7404_s1 + $0xf0] sm:$0xff]  ;;  %v3988_v50 = vld [vmem:[%s7404_s1 + $0x1a8] sm:$0xff] }
  0x84   : > { %978 = vperm.xlu1 %4846, %v859_v26   ;;  %973 = vperm.xlu0 %4845, %v858_v27   ;;  %v3978_v26 = vld [vmem:[%s7404_s1 + $0x158] sm:$0xff]  ;;  %v3977_v27 = vld [vmem:[%s7404_s1 + $0x150] sm:$0xff]  ;;  %v4855_v47 = vld [vmem:[#allocation5 + $0x40] sm:$0xff]  }
  0x85   : > { %4623 = vmatprep.subr.bf16.mxu0 %v4854_v28  ;;  %4760 = vmatprep.subr.bf16.mxu1 %v4854_v28  ;;  %v4858_v48 = vld [vmem:[#allocation5 + $0x80] sm:$0xff]   ;;  %v4860_v52 = vld [vmem:[#allocation5 + $0xc8] sm:$0xff]   ;;  %v4865_v61 = vld [vmem:[#allocation5 + $0x10] sm:$0xff]  }
  0x86   : > { %v4857_v49 = vld [vmem:[#allocation5] sm:$0xff]   ;;  %v3992_v62 = vld [vmem:[%s7404_s1 + $0x1c8] sm:$0xff]  ;;  %v4868_v1 = vld [vmem:[#allocation5 + $0xd8] sm:$0xff]  }
  0x87   : > { %4624 = vmatpush3.bf16.msra.mxu0 %v4854_v28  ;;  %4768 = vmatpush3.bf16.msra.mxu1 %v4854_v28  ;;  %v869_v28 = vld [vmem:[%s7404_s1 + $0xb8] sm:$0xff]  ;;  %v3987_v51 = vld [vmem:[%s7404_s1 + $0x1a0] sm:$0xff]  ;;  %v4876_v14 = vld [vmem:[#allocation5 + $0xe8] sm:$0xff]  }
  0x88   : > { %1142 = vperm.xlu1 %4846, %v3968_v37   ;;  %1138 = vperm.xlu0 %4845, %v3967_v38   ;;  %v872_v37 = vld [vmem:[%s7404_s1 + $0xd0] sm:$0xff]  ;;  %v3984_v38 = vld [vmem:[%s7404_s1 + $0x188] sm:$0xff]  ;;  %v3991_v63 = vld [vmem:[%s7404_s1 + $0x1c0] sm:$0xff] }
  0x89   : > { %4225 = vmatprep.subr.bf16.mxu0 %v4856_v46  ;;  %4113 = vmatprep.subr.bf16.mxu1 %v4855_v47  ;;  %v4867_v2 = vld [vmem:[#allocation5 + $0x58] sm:$0xff]   ;;  %v3997_v15 = vld [vmem:[%s7404_s1 + $0x1f0] sm:$0xff]  ;;  %v4875_v16 = vld [vmem:[#allocation5 + $0x68] sm:$0xff]  }
  0x8a   : > { %4626 = vmatmul.mubr.bf16.vlgmr.msra.gmra.mrb[0].mxu0 %v436_v39  ;;  %4642 = vmatmul.mubr.bf16.vlgmr.msra.gmra.mrb[0].mxu1 %v444_v40  ;;  %v3983_v39 = vld [vmem:[%s7404_s1 + $0x180] sm:$0xff]  ;;  %v875_v40 = vld [vmem:[%s7404_s1 + $0xe8] sm:$0xff]  ;;  %v4870_v3 = vld [vmem:[#allocation5 + $0x98] sm:$0xff]  }
  0x8b   : > { %4629 = vmatprep.mubr.bf16.mxu0 %v437_v41  ;;  %4645 = vmatprep.mubr.bf16.mxu1 %v445_v42  ;;  %v874_v41 = vld [vmem:[%s7404_s1 + $0xe0] sm:$0xff]  ;;  %v3986_v42 = vld [vmem:[%s7404_s1 + $0x198] sm:$0xff]  ;;  %v4878_v17 = vld [vmem:[#allocation5 + $0xa8] sm:$0xff]  }
  0x8c   : > { %1150 = vperm.xlu1 %4846, %v3970_v43   ;;  %1146 = vperm.xlu0 %4845, %v3969_v44   ;;  %v3985_v43 = vld [vmem:[%s7404_s1 + $0x190] sm:$0xff]  ;;  %v877_v44 = vld [vmem:[%s7404_s1 + $0xf8] sm:$0xff] }
  0x8d   : > { %4226 = vmatpush3.bf16.msra.mxu0 %v4858_v48  ;;  %4114 = vmatpush3.bf16.msra.mxu1 %v4857_v49  ;;  %v4869_v4 = vld [vmem:[#allocation5 + $0x18] sm:$0xff]  }
  0x8e   : > { %4227 = vmatprep.subr.bf16.mxu0 %v4860_v52  ;;  %v3994_v5 = vld [vmem:[%s7404_s1 + $0x1d8] sm:$0xff] }
  0x90   : > { %988 = vperm.xlu1 %4846, %v861_v53   ;;  %983 = vperm.xlu0 %4845, %v860_v54   ;;  %v4859_v53 = vld [vmem:[#allocation5 + $0x48] sm:$0xff]  }
  0x91   : > { %v4862_v54 = vld [vmem:[#allocation5 + $0x88] sm:$0xff]   ;;  %4115 = vmatprep.subr.bf16.mxu1 %v4859_v53 }
  0x92   : > { %4630 = vmatmul.mubr.bf16.gmra.mrb[4].mxu0 %v438_v55  ;;  %4646 = vmatmul.mubr.bf16.gmra.mrb[4].mxu1 %v446_v56  ;;  %v4861_v55 = vld [vmem:[#allocation5 + $0x8] sm:$0xff]   ;;  %v3990_v56 = vld [vmem:[%s7404_s1 + $0x1b8] sm:$0xff] }
  0x93   : > { %4633 = vmatprep.mubr.bf16.mxu0 %v439_v59  ;;  %4649 = vmatprep.mubr.bf16.mxu1 %v447_v60  ;;  %v4863_v59 = vld [vmem:[#allocation5 + $0x50] sm:$0xff]  }
  0x94   : > { %1158 = vperm.xlu1 %4846, %v3972_v57   ;;  %1154 = vperm.xlu0 %4845, %v3971_v58   ;;  %v3989_v57 = vld [vmem:[%s7404_s1 + $0x1b0] sm:$0xff] }
  0x95   : > { %4228 = vmatpush3.bf16.msra.mxu0 %v4862_v54  ;;  %v4864_v58 = vld [vmem:[#allocation5 + $0xd0] sm:$0xff]   ;;  %4116 = vmatpush3.bf16.msra.mxu1 %v4861_v55 }
  0x96   : > { %v4866_v60 = vld [vmem:[#allocation5 + $0x90] sm:$0xff]   ;;  %4229 = vmatprep.subr.bf16.mxu0 %v4864_v58  ;;  %4117 = vmatprep.subr.bf16.mxu1 %v4863_v59 }
  0x98   : > { %998 = vperm.xlu1 %4846, %v863_v6   ;;  %993 = vperm.xlu0 %4845, %v862_v7   ;;  %v3993_v6 = vld [vmem:[%s7404_s1 + $0x1d0] sm:$0xff]  ;;  %v4872_v7 = vld [vmem:[#allocation5 + $0xe0] sm:$0xff]  }
  0x99   : > { %4230 = vmatpush3.bf16.msra.mxu0 %v4866_v60  ;;  %4118 = vmatpush3.bf16.msra.mxu1 %v4865_v61 }
  0x9a   : > { %4634 = vmatmul.mubr.bf16.gmra.mrb[8].mxu0 %v440_v8  ;;  %4650 = vmatmul.mubr.bf16.gmra.mrb[8].mxu1 %v448_v9  ;;  %v4871_v8 = vld [vmem:[#allocation5 + $0x60] sm:$0xff]   ;;  %v3996_v9 = vld [vmem:[%s7404_s1 + $0x1e8] sm:$0xff] }
  0x9b   : > { %4637 = vmatprep.mubr.bf16.mxu0 %v441_v12  ;;  %4653 = vmatprep.mubr.bf16.mxu1 %v449_v13  ;;  %v4873_v12 = vld [vmem:[#allocation5 + $0x20] sm:$0xff]   ;;  %v3998_v13 = vld [vmem:[%s7404_s1 + $0x1f8] sm:$0xff] }
  0x9c   : > { %1166 = vperm.xlu1 %4846, %v3974_v10   ;;  %1162 = vperm.xlu0 %4845, %v3973_v11   ;;  %v3995_v10 = vld [vmem:[%s7404_s1 + $0x1e0] sm:$0xff] }
  0x9d   : > { %4231 = vmatprep.subr.bf16.mxu0 %v4868_v1  ;;  %4119 = vmatprep.subr.bf16.mxu1 %v4867_v2  ;;  %v4874_v11 = vld [vmem:[#allocation5 + $0xa0] sm:$0xff]  }
  0x9e   : > { %4232 = vmatpush3.bf16.msra.mxu0 %v4870_v3  ;;  %4120 = vmatpush3.bf16.msra.mxu1 %v4869_v4 }
  0x9f   : > { %4121 = vmatprep.subr.bf16.mxu1 %v4871_v8  ;;  %4233 = vmatprep.subr.bf16.mxu0 %v4872_v7 }
  0xa0   : > { %1008 = vperm.xlu1 %4846, %v865_v18   ;;  %1003 = vperm.xlu0 %4845, %v864_v19   ;;  %v4877_v18 = vld [vmem:[#allocation5 + $0x28] sm:$0xff]   ;;  %v4880_v19 = vld [vmem:[#allocation5 + $0xf0] sm:$0xff]  }
  0xa2   : > { %4638 = vmatmul.mubr.bf16.gmra.mrb[12].mxu0 %v442_v20  ;;  %4654 = vmatmul.mubr.bf16.gmra.mrb[12].mxu1 %v450_v21 }
  0xa3   : > { %4234 = vmatpush3.bf16.msra.mxu0 %v4874_v11  ;;  %4122 = vmatpush3.bf16.msra.mxu1 %v4873_v12 }
  0xa4   : > { %1174 = vperm.xlu1 %4846, %v3976_v22   ;;  %1170 = vperm.xlu0 %4845, %v3975_v23   ;;  %v4879_v22 = vld [vmem:[#allocation5 + $0x70] sm:$0xff]  }
  0xa5   : > { %4235 = vmatprep.subr.bf16.mxu0 %v4876_v14  ;;  %4123 = vmatprep.subr.bf16.mxu1 %v4875_v16  ;;  %v4882_v23 = vld [vmem:[#allocation5 + $0xb0] sm:$0xff]  }
  0xa7   : > { %4236 = vmatpush3.bf16.msra.mxu0 %v4878_v17  ;;  %4124 = vmatpush3.bf16.msra.mxu1 %v4877_v18 }
  0xa8   : > { %1018 = vperm.xlu1 %4846, %v867_v24   ;;  %1013 = vperm.xlu0 %4845, %v866_v25   ;;  %v4881_v24 = vld [vmem:[#allocation5 + $0x30] sm:$0xff]   ;;  %v4884_v25 = vld [vmem:[#allocation5 + $0xf8] sm:$0xff]  }
  0xa9   : > { %4237 = vmatprep.subr.bf16.mxu0 %v4880_v19  ;;  %4125 = vmatprep.subr.bf16.mxu1 %v4879_v22 }
  0xab   : > { %4238 = vmatpush3.bf16.msra.mxu0 %v4882_v23  ;;  %4126 = vmatpush3.bf16.msra.mxu1 %v4881_v24 }
  0xac   : > { %1182 = vperm.xlu1 %4846, %v3978_v26   ;;  %1178 = vperm.xlu0 %4845, %v3977_v27   ;;  %v4883_v26 = vld [vmem:[#allocation5 + $0x78] sm:$0xff]  }
  0xad   : > { %v4886_v27 = vld [vmem:[#allocation5 + $0xb8] sm:$0xff]   ;;  %4239 = vmatprep.subr.bf16.mxu0 %v4884_v25  ;;  %4127 = vmatprep.subr.bf16.mxu1 %v4883_v26 }
  0xaf   : > { %4240 = vmatpush3.bf16.msra.mxu0 %v4886_v27 }
  0xb0   : > { %1028 = vperm.xlu1 %4846, %v869_v28   ;;  %1023 = vperm.xlu0 %4845, %v868_v29  }
  0xb4   : > { %1190 = vperm.xlu1 %4846, %v3980_v30   ;;  %1186 = vperm.xlu0 %4845, %v3979_v31   ;;  %v4885_v30 = vld [vmem:[#allocation5 + $0x38] sm:$0xff]  }
  0xb5   : > { %4128 = vmatpush3.bf16.msra.mxu1 %v4885_v30 }
  0xb8   : > { %1038 = vperm.xlu1 %4846, %v871_v32   ;;  %1033 = vperm.xlu0 %4845, %v870_v33  }
  0xbc   : > { %1198 = vperm.xlu1 %4846, %v3982_v34   ;;  %1194 = vperm.xlu0 %4845, %v3981_v35   ;;  %v4887_v35 = vld [vmem:[#allocation5 + $0x140] sm:$0xff]  }
  0xbd   : > { %4337 = vmatprep.subr.bf16.mxu1 %v4887_v35 }
  0xc0   : > { %1048 = vperm.xlu1 %4846, %v873_v36   ;;  %1043 = vperm.xlu0 %4845, %v872_v37  }
  0xc4   : > { %1206 = vperm.xlu1 %4846, %v3984_v38   ;;  %1202 = vperm.xlu0 %4845, %v3983_v39  }
  0xc8   : > { %1058 = vperm.xlu1 %4846, %v875_v40   ;;  %1053 = vperm.xlu0 %4845, %v874_v41  }
  0xcc   : > { %1214 = vperm.xlu1 %4846, %v3986_v42   ;;  %1210 = vperm.xlu0 %4845, %v3985_v43  }
  0xd0   : > { %1068 = vperm.xlu1 %4846, %v877_v44   ;;  %1063 = vperm.xlu0 %4845, %v876_v45  }
  0xd4   : > { %1222 = vperm.xlu1 %4846, %v3988_v50   ;;  %1218 = vperm.xlu0 %4845, %v3987_v51  }
  0xd8   : > { %1230 = vperm.xlu1 %4846, %v3990_v56   ;;  %1226 = vperm.xlu0 %4845, %v3989_v57   ;;  %v4895_v56 = vld [vmem:[#allocation5 + $0x1c0] sm:$0xff]  }
  0xd9   : > { %4449 = vmatprep.subr.bf16.mxu0 %v4895_v56 }
  0xdc   : > { %1238 = vperm.xlu1 %4846, %v3992_v62   ;;  %1234 = vperm.xlu0 %4845, %v3991_v63  }
  0xe0   : > { %1246 = vperm.xlu1 %4846, %v3994_v5   ;;  %1242 = vperm.xlu0 %4845, %v3993_v6  }
  0xe4   : > { %1254 = vperm.xlu1 %4846, %v3996_v9   ;;  %1250 = vperm.xlu0 %4845, %v3995_v10   ;;  %v5663_v9 = vld [vmem:[%s7406_s3] ss:$0 sm:$0xff] }
  0xe8   : > { %1262 = vperm.xlu1 %4846, %v3998_v13   ;;  %1258 = vperm.xlu0 %4845, %v3997_v15   ;;  %v5676_v15 = vrot.slane %v5132_v0, 1 }
  0xea   : > { %7645 = vst [vmem:[#allocation48_spill] sm:$0xff] %v5676_v15 }
  0xeb   : > { %v5582_v20 = vpop.permute.xlu1 %923  ;;  %v5584_v21 = vpop.permute.xlu0 %913 }
  0xec   : > { %7615 = vst [vmem:[#allocation18_spill] sm:$0xff] %v5582_v20  ;;  %7616 = vst [vmem:[#allocation19_spill] sm:$0xff] %v5584_v21  ;;  %v5666_v10 = vmul.f32 0.0, %v5584_v21 }
  0xef   : > { %v5586_v28 = vpop.permute.xlu1 %928  ;;  %v5588_v29 = vpop.permute.xlu0 %918 }
  0xf0   : > { %7617 = vst [vmem:[#allocation20_spill] sm:$0xff] %v5586_v28  ;;  %7618 = vst [vmem:[#allocation21_spill] sm:$0xff] %v5588_v29  ;;  %v5669_v11 = vmul.f32 0.0, %v5588_v29 }
  0xf3   : > { %v5590_v31 = vpop.permute.xlu1 %938  ;;  %v5592_v32 = vpop.permute.xlu0 %933 }
  0xf4   : > { %7619 = vst [vmem:[#allocation22_spill] sm:$0xff] %v5590_v31  ;;  %7620 = vst [vmem:[#allocation23_spill] sm:$0xff] %v5592_v32 }
  0xf7   : > { %v5594_v33 = vpop.permute.xlu1 %948  ;;  %v5596_v34 = vpop.permute.xlu0 %943 }
  0xf8   : > { %7621 = vst [vmem:[#allocation24_spill] sm:$0xff] %v5594_v33  ;;  %7622 = vst [vmem:[#allocation25_spill] sm:$0xff] %v5596_v34 }
  0xfb   : > { %v5598_v36 = vpop.permute.xlu1 %958  ;;  %v5600_v37 = vpop.permute.xlu0 %953 }
  0xfc   : > { %7623 = vst [vmem:[#allocation26_spill] sm:$0xff] %v5598_v36  ;;  %7624 = vst [vmem:[#allocation27_spill] sm:$0xff] %v5600_v37 }
  0xff   : > { %v5602_v38 = vpop.permute.xlu1 %968  ;;  %v5604_v39 = vpop.permute.xlu0 %963 }
 0x100   : > { %7625 = vst [vmem:[#allocation28_spill] sm:$0xff] %v5602_v38  ;;  %7626 = vst [vmem:[#allocation29_spill] sm:$0xff] %v5604_v39 }
 0x103   : > { %v5606_v40 = vpop.permute.xlu1 %978  ;;  %v5608_v41 = vpop.permute.xlu0 %973 }
 0x104   : > { %7627 = vst [vmem:[#allocation30_spill] sm:$0xff] %v5606_v40  ;;  %7628 = vst [vmem:[#allocation31_spill] sm:$0xff] %v5608_v41 }
 0x107   : > { %v1143_v42 = vpop.permute.xlu1 %1142  ;;  %v1139_v43 = vpop.permute.xlu0 %1138 }
 0x108   : > { %v1266_v2 = vrot.slane %v1143_v42, 6  ;;  %v5648_v3 = vrot.slane %v1139_v43, 6 }
 0x10a   : > { %7639 = vst [vmem:[#allocation42_spill] sm:$0xff] %v5648_v3  ;;  %v5656_v6 = vsel %vm1264_vm0, %v5648_v3, %v1266_v2  ;;  %v1361_v7 = vmul.f32 0.0, %v5648_v3 }
 0x10b   : > { %v5610_v44 = vpop.permute.xlu1 %1150  ;;  %v1147_v45 = vpop.permute.xlu0 %1146  ;;  %7642 = vst [vmem:[#allocation45_spill] sm:$0xff] %v5656_v6  ;;  %v1362_v8 = vmul.f32 0.0, %v5656_v6 }
 0x10c   : > { %v1268_v12 = vrot.slane %v1147_v45, 6  ;;  %v1270_v19 = vrot.slane %v5610_v44, 6 }
 0x10d   : > { %v1394_v18 = vpack.c.bf16 %v1362_v8, %v1361_v7 }
 0x10e   : > { %v5687_v35 = vsel %vm1264_vm0, %v1266_v2, %v1268_v12 }
 0x10f   : > { %v5612_v46 = vpop.permute.xlu1 %988  ;;  %v5614_v47 = vpop.permute.xlu0 %983  ;;  %7646 = vst [vmem:[#allocation49_spill] sm:$0xff] %v5687_v35  ;;  %v5696_v0 = vrot.slane %v1394_v18, 1 }
 0x110   : > { %7629 = vst [vmem:[#allocation32_spill] sm:$0xff] %v5612_v46  ;;  %7630 = vst [vmem:[#allocation33_spill] sm:$0xff] %v5614_v47 }
 0x113   : > { %v5616_v48 = vpop.permute.xlu1 %1158  ;;  %v5618_v49 = vpop.permute.xlu0 %1154 }
 0x114   : > { %v1272_v26 = vrot.slane %v5618_v49, 6  ;;  %v1274_v42 = vrot.slane %v5616_v48, 6 }
 0x116   : > { %v5699_v48 = vsel %vm1264_vm0, %v1270_v19, %v1272_v26 }
 0x117   : > { %v5620_v50 = vpop.permute.xlu1 %998  ;;  %v5622_v51 = vpop.permute.xlu0 %993  ;;  %7648 = vst [vmem:[#allocation51_spill] sm:$0xff] %v5699_v48 }
 0x118   : > { %7631 = vst [vmem:[#allocation34_spill] sm:$0xff] %v5620_v50  ;;  %7632 = vst [vmem:[#allocation35_spill] sm:$0xff] %v5622_v51 }
 0x11b   : > { %v5624_v52 = vpop.permute.xlu1 %1166  ;;  %v5626_v53 = vpop.permute.xlu0 %1162 }
 0x11f   : > { %v5628_v54 = vpop.permute.xlu1 %1008  ;;  %v5630_v55 = vpop.permute.xlu0 %1003 }
 0x120   : > { %7633 = vst [vmem:[#allocation36_spill] sm:$0xff] %v5628_v54  ;;  %7634 = vst [vmem:[#allocation37_spill] sm:$0xff] %v5630_v55 }
 0x123   : > { %v5632_v57 = vpop.permute.xlu1 %1174  ;;  %v5634_v58 = vpop.permute.xlu0 %1170 }
 0x127   : > { %v5636_v59 = vpop.permute.xlu1 %1018  ;;  %v5638_v60 = vpop.permute.xlu0 %1013 }
 0x128   : > { %7635 = vst [vmem:[#allocation38_spill] sm:$0xff] %v5636_v59  ;;  %7636 = vst [vmem:[#allocation39_spill] sm:$0xff] %v5638_v60 }
 0x12b   : > { %v5640_v61 = vpop.permute.xlu1 %1182  ;;  %v5642_v62 = vpop.permute.xlu0 %1178 }
 0x12f   : > { %v5644_v63 = vpop.permute.xlu1 %1028  ;;  %v5646_v1 = vpop.permute.xlu0 %1023 }
 0x130   : > { %7637 = vst [vmem:[#allocation40_spill] sm:$0xff] %v5644_v63  ;;  %7638 = vst [vmem:[#allocation41_spill] sm:$0xff] %v5646_v1 }
 0x133   : > { %v5650_v4 = vpop.permute.xlu1 %1190  ;;  %v5652_v5 = vpop.permute.xlu0 %1186 }
 0x134   : > { %7640 = vst [vmem:[#allocation43_spill] sm:$0xff] %v5650_v4  ;;  %7641 = vst [vmem:[#allocation44_spill] sm:$0xff] %v5652_v5 }
 0x137   : > { %v5671_v13 = vpop.permute.xlu1 %1038  ;;  %v5673_v14 = vpop.permute.xlu0 %1033 }
 0x138   : > { %7643 = vst [vmem:[#allocation46_spill] sm:$0xff] %v5671_v13  ;;  %7644 = vst [vmem:[#allocation47_spill] sm:$0xff] %v5673_v14 }
 0x13b   : > { %v5705_v3 = vpop.permute.xlu1 %1198 }
 0x13c   : > { %7650 = vst [vmem:[#allocation53_spill] sm:$0xff] %v5705_v3 }
 0x13f   : > { %v5752_v50 = vpop.permute.xlu1 %1048 }
 0x140   : > { %7663 = vst [vmem:[#allocation65_spill] sm:$0xff] %v5752_v50 }
 0x15d   : > { %v4627_v16 = vpop.f32.mrb[0].mxu0  ;;  %v4643_v17 = vpop.f32.mrb[0].mxu1 }
 0x15e   : > { %v565_v22 = vadd.f32 %v4627_v16, %v5663_v9  ;;  %v629_v23 = vadd.f32 %v4643_v17, %v5663_v9  ;;  %v556_v24 = vpop.f32.mrb[1].mxu0  ;;  %v620_v25 = vpop.f32.mrb[1].mxu1 }
 0x15f   : > { %v557_v27 = vadd.f32 %v5663_v9, %v556_v24  ;;  %v621_v30 = vadd.f32 %v5663_v9, %v620_v25  ;;  %v4628_v44 = vpop.f32.mrb[2].mxu0  ;;  %v4644_v45 = vpop.f32.mrb[2].mxu1  ;;  %v5693_v24 = vsel %vm1264_vm0, %v1268_v12, %v1270_v19  ;;  %v1276_v25 = vrot.slane %v5626_v53, 6 }
 0x160   : > { %v701_v43 = vmax.f32 %v629_v23, 0.0  ;;  %v685_v56 = vmax.f32 %v565_v22, 0.0  ;;  %v568_v49 = vadd.f32 %v4628_v44, %v5663_v9  ;;  %v632_v8 = vadd.f32 %v4644_v45, %v5663_v9  ;;  %v559_v16 = vpop.f32.mrb[3].mxu0  ;;  %v623_v17 = vpop.f32.mrb[3].mxu1  ;;  %7647 = vst [vmem:[#allocation50_spill] sm:$0xff] %v5693_v24 }
 0x161   : > { %v683_v7 = vmax.f32 %v557_v27, 0.0  ;;  %v699_v2 = vmax.f32 %v621_v30, 0.0  ;;  %v5702_v44 = vsel %vm1264_vm0, %v1272_v26, %v1274_v42  ;;  %v1278_v45 = vrot.slane %v5624_v52, 6  ;;  %v5707_v12 = vpop.permute.xlu0 %1194 }
 0x162   : > { %v783_v23 = vrot.slane %v701_v43, 7  ;;  %v686_v22 = vmax.f32 %v568_v49, 0.0  ;;  %v702_v27 = vmax.f32 %v632_v8, 0.0  ;;  %7649 = vst [vmem:[#allocation52_spill] sm:$0xff] %v5702_v44  ;;  %7651 = vst [vmem:[#allocation54_spill] sm:$0xff] %v5707_v12  ;;  %v560_v53 = vadd.f32 %v5663_v9, %v559_v16 }
 0x163   : > { %v624_v18 = vadd.f32 %v5663_v9, %v623_v17  ;;  %v751_v30 = vrot.slane %v685_v56, 7  ;;  %v748_v6 = vrot.slane %v683_v7, 7  ;;  %v5712_v8 = vsel %vm1264_vm0, %v1274_v42, %v1276_v25 }
 0x164   : > { %v753_v19 = vrot.slane %v686_v22, 7  ;;  %v785_v14 = vrot.slane %v702_v27, 7  ;;  %7652 = vst [vmem:[#allocation55_spill] sm:$0xff] %v5712_v8  ;;  %v5714_v26 = vrot.slane %v699_v2, 7  ;;  %v684_v52 = vmax.f32 %v560_v53, 0.0 }
 0x165   : > { %v4631_v43 = vpop.f32.mrb[4].mxu0  ;;  %v4647_v49 = vpop.f32.mrb[4].mxu1  ;;  %v700_v13 = vmax.f32 %v624_v18, 0.0  ;;  %v5727_v18 = vsel %vm1264_vm0, %v1276_v25, %v1278_v45  ;;  %v5730_v60 = vsel %vm747_vm1, 0.0, %v748_v6 }
 0x166   : > { %v572_v63 = vpop.f32.mrb[5].mxu0  ;;  %v636_v1 = vpop.f32.mrb[5].mxu1  ;;  %v5718_v16 = vsel %vm747_vm1, %v751_v30, %v753_v19  ;;  %v5721_v56 = vsel %vm747_vm1, %v783_v23, %v785_v14  ;;  %v581_v7 = vadd.f32 %v4631_v43, %v5663_v9  ;;  %v749_v17 = vrot.slane %v684_v52, 7  ;;  %7655 = vst [vmem:[#allocation58_spill] sm:$0xff] %v5727_v18  ;;  %7656 = vst [vmem:[#allocation59_spill] sm:$0xff] %v5730_v60 }
 0x167   : > { %7653 = vst [vmem:[#allocation56_spill] sm:$0xff] %v5718_v16  ;;  %7654 = vst [vmem:[#allocation57_spill] sm:$0xff] %v5721_v56  ;;  %v781_v22 = vrot.slane %v700_v13, 7  ;;  %v645_v42 = vadd.f32 %v4647_v49, %v5663_v9  ;;  %v573_v2 = vadd.f32 %v5663_v9, %v572_v63  ;;  %v4632_v27 = vpop.f32.mrb[6].mxu0  ;;  %v4648_v53 = vpop.f32.mrb[6].mxu1  ;;  %v637_v54 = vadd.f32 %v5663_v9, %v636_v1 }
 0x168   : > { %v689_v59 = vmax.f32 %v581_v7, 0.0  ;;  %v575_v56 = vpop.f32.mrb[7].mxu0  ;;  %v639_v55 = vpop.f32.mrb[7].mxu1  ;;  %v5734_v43 = vsel %vm747_vm1, %v748_v6, %v749_v17  ;;  %v5737_v13 = vsel %vm747_vm1, %v749_v17, %v751_v30  ;;  %v7661_v52 = vrot.slane %v5634_v58, 6 }
 0x169   : > { %7657 = vst [vmem:[#allocation60_spill] sm:$0xff] %v5734_v43  ;;  %7658 = vst [vmem:[#allocation61_spill] sm:$0xff] %v5737_v13  ;;  %v5741_v63 = vsel %vm747_vm1, %v5714_v26, %v781_v22  ;;  %v5744_v25 = vsel %vm747_vm1, %v781_v22, %v783_v23  ;;  %v705_v7 = vmax.f32 %v645_v42, 0.0  ;;  %v687_v6 = vmax.f32 %v573_v2, 0.0  ;;  %v5754_v30 = vpop.permute.xlu0 %1043 }
 0x16a   : > { %7659 = vst [vmem:[#allocation62_spill] sm:$0xff] %v5741_v63  ;;  %7660 = vst [vmem:[#allocation63_spill] sm:$0xff] %v5744_v25  ;;  %v5750_v1 = vsel %vm1264_vm0, %v1278_v45, %v7661_v52  ;;  %v5758_v17 = vmul.f32 %v5687_v35, %v5730_v60  ;;  %v5762_v23 = vmul.f32 %v5693_v24, %v5734_v43  ;;  %v703_v22 = vmax.f32 %v637_v54, 0.0 }
 0x16b   : > { %7662 = vst [vmem:[#allocation64_spill] sm:$0xff] %v5750_v1  ;;  %7664 = vst [vmem:[#allocation66_spill] sm:$0xff] %v5754_v30  ;;  %v584_v49 = vadd.f32 %v4632_v27, %v5663_v9  ;;  %v759_v25 = vrot.slane %v689_v59, 7  ;;  %v791_v45 = vrot.slane %v705_v7, 7  ;;  %v755_v52 = vrot.slane %v687_v6, 7 }
 0x16c   : > { %v648_v42 = vadd.f32 %v4648_v53, %v5663_v9  ;;  %v787_v51 = vrot.slane %v703_v22, 7  ;;  %v576_v63 = vadd.f32 %v5663_v9, %v575_v56  ;;  %v640_v35 = vadd.f32 %v5663_v9, %v639_v55 }
 0x16d   : > { %v4635_v2 = vpop.f32.mrb[8].mxu0  ;;  %v4651_v50 = vpop.f32.mrb[8].mxu1  ;;  %v690_v30 = vmax.f32 %v584_v49, 0.0  ;;  %v5769_v24 = vsel %vm747_vm1, %v753_v19, %v755_v52  ;;  %v1411_v59 = vmul.f32 %v5584_v21, %v5730_v60  ;;  %v1412_v27 = vmul.f32 %v5588_v29, %v5734_v43 }
 0x16e   : > { %v588_v46 = vpop.f32.mrb[9].mxu0  ;;  %v652_v47 = vpop.f32.mrb[9].mxu1  ;;  %7665 = vst [vmem:[#allocation67_spill] sm:$0xff] %v5769_v24  ;;  %v706_v54 = vmax.f32 %v648_v42, 0.0  ;;  %v5776_v49 = vsel %vm747_vm1, %v785_v14, %v787_v51  ;;  %v688_v55 = vmax.f32 %v576_v63, 0.0  ;;  %v704_v6 = vmax.f32 %v640_v35, 0.0 }
 0x16f   : > { %v4636_v53 = vpop.f32.mrb[10].mxu0  ;;  %v4652_v7 = vpop.f32.mrb[10].mxu1  ;;  %7666 = vst [vmem:[#allocation68_spill] sm:$0xff] %v5776_v49  ;;  %v761_v56 = vrot.slane %v690_v30, 7  ;;  %v1443_v40 = vpack.c.bf16 %v1412_v27, %v1411_v59  ;;  %v597_v42 = vadd.f32 %v4635_v2, %v5663_v9  ;;  %v661_v21 = vadd.f32 %v4651_v50, %v5663_v9 }
 0x170   : > { %v591_v22 = vpop.f32.mrb[11].mxu0  ;;  %v655_v41 = vpop.f32.mrb[11].mxu1  ;;  %v793_v19 = vrot.slane %v706_v54, 7  ;;  %v757_v12 = vrot.slane %v688_v55, 7  ;;  %v789_v3 = vrot.slane %v704_v6, 7  ;;  %v589_v14 = vadd.f32 %v5663_v9, %v588_v46 }
 0x171   : > { %v5781_v29 = vsel %vm747_vm1, %v759_v25, %v761_v56  ;;  %2760 = vmatprep.mubr.bf16.mxu0 %v1443_v40  ;;  %v693_v35 = vmax.f32 %v597_v42, 0.0  ;;  %v709_v63 = vmax.f32 %v661_v21, 0.0  ;;  %v653_v54 = vadd.f32 %v5663_v9, %v652_v47  ;;  %v5788_v59 = vpop.permute.xlu1 %1206  ;;  %v5790_v2 = vpop.permute.xlu0 %1202 }
 0x172   : > { %7667 = vst [vmem:[#allocation69_spill] sm:$0xff] %v5781_v29  ;;  %v5785_v30 = vsel %vm747_vm1, %v791_v45, %v793_v19  ;;  %7669 = vst [vmem:[#allocation71_spill] sm:$0xff] %v5788_v59  ;;  %v5793_v50 = vsel %vm747_vm1, %v755_v52, %v757_v12  ;;  %v5796_v27 = vsel %vm747_vm1, %v757_v12, %v759_v25  ;;  %v691_v6 = vmax.f32 %v589_v14, 0.0 }
 0x173   : > { %7668 = vst [vmem:[#allocation70_spill] sm:$0xff] %v5785_v30  ;;  %7670 = vst [vmem:[#allocation72_spill] sm:$0xff] %v5790_v2  ;;  %v5799_v46 = vsel %vm747_vm1, %v787_v51, %v789_v3  ;;  %v5802_v55 = vsel %vm747_vm1, %v789_v3, %v791_v45  ;;  %v767_v40 = vrot.slane %v693_v35, 7  ;;  %v799_v21 = vrot.slane %v709_v63, 7 }
 0x174   : > { %7671 = vst [vmem:[#allocation73_spill] sm:$0xff] %v5793_v50  ;;  %7672 = vst [vmem:[#allocation74_spill] sm:$0xff] %v5796_v27  ;;  %v707_v47 = vmax.f32 %v653_v54, 0.0  ;;  %v600_v49 = vadd.f32 %v4636_v53, %v5663_v9  ;;  %v664_v52 = vadd.f32 %v4652_v7, %v5663_v9  ;;  %v1120_v12 = vpack.c.bf16 %v5734_v43, %v5730_v60 }
 0x175   : > { %7673 = vst [vmem:[#allocation75_spill] sm:$0xff] %v5799_v46  ;;  %7674 = vst [vmem:[#allocation76_spill] sm:$0xff] %v5802_v55  ;;  %v4639_v42 = vpop.f32.mrb[12].mxu0  ;;  %v4655_v30 = vpop.f32.mrb[12].mxu1  ;;  %v1395_v51 = vpack.c.bf16 %v5762_v23, %v5758_v17  ;;  %v763_v3 = vrot.slane %v691_v6, 7  ;;  %v592_v35 = vadd.f32 %v5663_v9, %v591_v22  ;;  %v656_v14 = vadd.f32 %v5663_v9, %v655_v41  ;;  %v4896_v55 = vld [vmem:[#allocation5 + $0x180] sm:$0xff]  }
 0x176   : > { %v604_v25 = vpop.f32.mrb[13].mxu0  ;;  %v668_v46 = vpop.f32.mrb[13].mxu1  ;;  %v795_v45 = vrot.slane %v707_v47, 7  ;;  %v694_v53 = vmax.f32 %v600_v49, 0.0  ;;  %v710_v59 = vmax.f32 %v664_v52, 0.0  ;;  %v1619_v7 = vshll.u32 %v1120_v12, 16 }
 0x177   : > { %v4640_v63 = vpop.f32.mrb[14].mxu0  ;;  %v4656_v54 = vpop.f32.mrb[14].mxu1  ;;  %v5812_v2 = vrot.slane %v1395_v51, 1  ;;  %v5819_v17 = vsel %vm747_vm1, %v761_v56, %v763_v3  ;;  %v692_v22 = vmax.f32 %v592_v35, 0.0  ;;  %v708_v41 = vmax.f32 %v656_v14, 0.0  ;;  %v4899_v51 = vld [vmem:[#allocation5 + $0x1c8] sm:$0xff]  }
 0x178   : > { %v5814_v38 = vpop.f32.mrb[15].mxu0  ;;  %v5816_v39 = vpop.f32.mrb[15].mxu1  ;;  %7675 = vst [vmem:[#allocation77_spill] sm:$0xff] %v5819_v17  ;;  %v5822_v23 = vsel %vm747_vm1, %v793_v19, %v795_v45  ;;  %v5824_v6 = vrot.slane %v694_v53, 7  ;;  %v5826_v47 = vrot.slane %v710_v59, 7  ;;  %v1621_v49 = vrot.slane %v1619_v7, 1 }
 0x179   : > { %7676 = vst [vmem:[#allocation78_spill] sm:$0xff] %v5822_v23  ;;  %v1779_v52 = vsel %vm1776_vm2, %v5696_v0, %v5812_v2  ;;  %v765_v37 = vrot.slane %v692_v22, 7  ;;  %v797_v5 = vrot.slane %v708_v41, 7  ;;  %v1413_v56 = vmul.f32 %v5582_v20, %v5737_v13  ;;  %v4888_v35 = vld [vmem:[#allocation5 + $0x100] sm:$0xff]   ;;  %v5835_v14 = vpop.permute.xlu1 %1058  ;;  %v5837_v59 = vpop.permute.xlu0 %1053  ;;  %v4889_v41 = vld [vmem:[#allocation5 + $0x148] sm:$0xff]  }
 0x17a   : > { %2761 = vmatmul.mubr.bf16.vlgmr.msra.gmra.mrb[16].mxu0 %v1779_v52  ;;  %v1414_v19 = vmul.f32 %v5586_v28, %v5718_v16  ;;  %7677 = vst [vmem:[#allocation79_spill] sm:$0xff] %v5835_v14  ;;  %7678 = vst [vmem:[#allocation80_spill] sm:$0xff] %v5837_v59  ;;  %v5841_v53 = vsel %vm747_vm1, %v767_v40, %v5824_v6  ;;  %v5845_v0 = vsel %vm747_vm1, %v799_v21, %v5826_v47 }
 0x17b   : > { %7679 = vst [vmem:[#allocation81_spill] sm:$0xff] %v5841_v53  ;;  %7680 = vst [vmem:[#allocation82_spill] sm:$0xff] %v5845_v0  ;;  %v1622_v7 = vsel %vm1610_vm3, %v5676_v15, %v1621_v49  ;;  %v5851_v22 = vpack.c.bf16 %v5718_v16, %v5737_v13  ;;  %4450 = vmatpush3.bf16.msra.mxu0 %v4896_v55  ;;  %v5854_v52 = vsel %vm747_vm1, %v763_v3, %v765_v37  ;;  %v4900_v15 = vld [vmem:[#allocation5 + $0x188] sm:$0xff]  }
 0x17c   : > { %2599 = vmatprep.mubr.bf16.mxu1 %v1622_v7  ;;  %7681 = vst [vmem:[#allocation83_spill] sm:$0xff] %v5854_v52  ;;  %v5857_v23 = vsel %vm747_vm1, %v765_v37, %v767_v40  ;;  %v5860_v14 = vsel %vm747_vm1, %v795_v45, %v797_v5  ;;  %v5863_v59 = vsel %vm747_vm1, %v797_v5, %v799_v21  ;;  %v1623_v55 = vshrl.u32 %v1120_v12, 16  ;;  %v4903_v37 = vld [vmem:[#allocation5 + $0x1d0] sm:$0xff]  }
 0x17d   : > { %7682 = vst [vmem:[#allocation84_spill] sm:$0xff] %v5857_v23  ;;  %7683 = vst [vmem:[#allocation85_spill] sm:$0xff] %v5860_v14  ;;  %v7684_v0 = vpack.c.bf16 %v5669_v11, %v5666_v10  ;;  %v1444_v4 = vpack.c.bf16 %v1414_v19, %v1413_v56  ;;  %v1627_v7 = vshll.u32 %v5851_v22, 16  ;;  %v613_v3 = vadd.f32 %v4639_v42, %v5663_v9  ;;  %v4890_v14 = vld [vmem:[#allocation5 + $0x108] sm:$0xff]   ;;  %v4891_v42 = vld [vmem:[#allocation5 + $0x150] sm:$0xff]  }
 0x17e   : > { %4451 = vmatprep.subr.bf16.mxu0 %v4899_v51  ;;  %v677_v40 = vadd.f32 %v4655_v30, %v5663_v9  ;;  %v605_v45 = vadd.f32 %v5663_v9, %v604_v25  ;;  %v669_v5 = vadd.f32 %v5663_v9, %v668_v46  ;;  %v616_v21 = vadd.f32 %v4640_v63, %v5663_v9  ;;  %v4904_v25 = vld [vmem:[#allocation5 + $0x190] sm:$0xff]   ;;  %v5879_v46 = vpop.permute.xlu0 %1210 }
 0x17f   : > { %2600 = vmatmul.mubr.bf16.vlgmr.msra.gmra.mrb[16].mxu1 %v7684_v0  ;;  %2768 = vmatprep.mubr.bf16.mxu0 %v1444_v4  ;;  %v1625_v10 = vor.u32 %v1623_v55, %v1621_v49  ;;  %v5874_v11 = vrot.slane %v1627_v7, 1  ;;  %v697_v12 = vmax.f32 %v613_v3, 0.0  ;;  %v680_v56 = vadd.f32 %v4656_v54, %v5663_v9  ;;  %v5877_v0 = vpop.permute.xlu1 %1214 }
 0x180   : > { %4338 = vmatpush3.bf16.msra.mxu1 %v4888_v35  ;;  %v713_v51 = vmax.f32 %v677_v40, 0.0  ;;  %v695_v19 = vmax.f32 %v605_v45, 0.0  ;;  %v711_v35 = vmax.f32 %v669_v5, 0.0  ;;  %v698_v30 = vmax.f32 %v616_v21, 0.0  ;;  %4452 = vmatpush3.bf16.msra.mxu0 %v4900_v15  ;;  %v4892_v40 = vld [vmem:[#allocation5 + $0x110] sm:$0xff]  }
 0x181   : > { %4339 = vmatprep.subr.bf16.mxu1 %v4889_v41  ;;  %v5883_v4 = vsel %vm1610_vm3, %v1625_v10, %v5874_v11  ;;  %v775_v63 = vrot.slane %v697_v12, 7  ;;  %v714_v49 = vmax.f32 %v680_v56, 0.0  ;;  %v1365_v54 = vmul.f32 %v5699_v48, %v5737_v13  ;;  %4453 = vmatprep.subr.bf16.mxu0 %v4903_v37  ;;  %v4907_v41 = vld [vmem:[#allocation5 + $0x1d8] sm:$0xff]  }
 0x182   : > { %7685 = vst [vmem:[#allocation86_spill] sm:$0xff] %v5883_v4  ;;  %2607 = vmatprep.mubr.bf16.mxu1 %v5883_v4  ;;  %v807_v55 = vrot.slane %v713_v51, 7  ;;  %v771_v15 = vrot.slane %v695_v19, 7  ;;  %v803_v7 = vrot.slane %v711_v35, 7  ;;  %v777_v3 = vrot.slane %v698_v30, 7  ;;  %v4893_v37 = vld [vmem:[#allocation5 + $0x158] sm:$0xff]  }
 0x183   : > { %v809_v45 = vrot.slane %v714_v49, 7  ;;  %v1366_v5 = vmul.f32 %v5702_v44, %v5718_v16  ;;  %v608_v21 = vadd.f32 %v5663_v9, %v5814_v38  ;;  %v672_v10 = vadd.f32 %v5663_v9, %v5816_v39  ;;  %v4908_v38 = vld [vmem:[#allocation5 + $0x198] sm:$0xff]   ;;  %v5923_v49 = vpop.permute.xlu0 %1063 }
 0x184   : > { %4340 = vmatpush3.bf16.msra.mxu1 %v4890_v14  ;;  %v5896_v12 = vsel %vm747_vm1, %v5824_v6, %v771_v15  ;;  %v5900_v14 = vsel %vm747_vm1, %v5826_v47, %v803_v7  ;;  %v5903_v56 = vsel %vm747_vm1, %v775_v63, %v777_v3  ;;  %v5907_v51 = vsel %vm747_vm1, %v777_v3, %v5714_v26  ;;  %v4910_v47 = vld [vmem:[#allocation5 + $0x1e0] sm:$0xff]  }
 0x185   : > { %4341 = vmatprep.subr.bf16.mxu1 %v4891_v42  ;;  %7686 = vst [vmem:[#allocation87_spill] sm:$0xff] %v5896_v12  ;;  %7687 = vst [vmem:[#allocation88_spill] sm:$0xff] %v5903_v56  ;;  %4454 = vmatpush3.bf16.msra.mxu0 %v4904_v25  ;;  %v5910_v39 = vsel %vm747_vm1, %v807_v55, %v809_v45  ;;  %v5913_v9 = vsel %vm747_vm1, %v809_v45, 0.0  ;;  %v1396_v6 = vpack.c.bf16 %v1366_v5, %v1365_v54  ;;  %v5921_v25 = vpop.permute.xlu1 %1068 }
 0x186   : > { %7688 = vst [vmem:[#allocation89_spill] sm:$0xff] %v5907_v51  ;;  %v696_v42 = vmax.f32 %v608_v21, 0.0  ;;  %4455 = vmatprep.subr.bf16.mxu0 %v4907_v41  ;;  %v712_v19 = vmax.f32 %v672_v10, 0.0  ;;  %v1073_v35 = vmul.f32 %v5582_v20, %v5730_v60  ;;  %v1074_v26 = vmul.f32 %v5586_v28, %v5734_v43  ;;  %7689 = vst [vmem:[#allocation90_spill] sm:$0xff] %v5921_v25  ;;  %v4894_v28 = vld [vmem:[#allocation5 + $0x118] sm:$0xff]  }
 0x187   : > { %v1415_v30 = vmul.f32 %v5592_v32, %v5769_v24  ;;  %7690 = vst [vmem:[#allocation91_spill] sm:$0xff] %v5923_v49  ;;  %v5925_v3 = vrot.slane %v1396_v6, 1  ;;  %v1416_v41 = vmul.f32 %v5590_v31, %v5793_v50  ;;  %v1122_v45 = vpack.c.bf16 %v5793_v50, %v5769_v24 }
 0x188   : > { %4342 = vmatpush3.bf16.msra.mxu1 %v4892_v40  ;;  %v773_v54 = vrot.slane %v696_v42, 7  ;;  %v7691_v5 = vrot.slane %v5632_v57, 6  ;;  %v7692_v21 = vrot.slane %v5634_v58, 6  ;;  %v805_v10 = vrot.slane %v712_v19, 7  ;;  %v4912_v42 = vld [vmem:[#allocation5 + $0x1a0] sm:$0xff]  }
 0x189   : > { %4343 = vmatprep.subr.bf16.mxu1 %v4893_v37  ;;  %v1104_v20 = vpack.c.bf16 %v1074_v26, %v1073_v35  ;;  %v1631_v6 = vshrl.u32 %v5851_v22, 16  ;;  %4456 = vmatpush3.bf16.msra.mxu0 %v4908_v38  ;;  %v1781_v4 = vsel %vm1776_vm2, %v5812_v2, %v5925_v3  ;;  %v1445_v58 = vpack.c.bf16 %v1416_v41, %v1415_v30  ;;  %v4914_v30 = vld [vmem:[#allocation5 + $0x1a8] sm:$0xff]   ;;  %v5971_v41 = vpop.permute.xlu0 %1218 }
 0x18a   : > { %v5936_v40 = vsel %vm1264_vm0, %v7692_v21, %v7691_v5  ;;  %v5943_v37 = vsel %vm747_vm1, %v771_v15, %v773_v54  ;;  %v5946_v48 = vsel %vm747_vm1, %v773_v54, %v775_v63  ;;  %v4897_v5 = vld [vmem:[#allocation5 + $0x160] sm:$0xff]   ;;  %4457 = vmatprep.subr.bf16.mxu0 %v4910_v47  ;;  %2769 = vmatmul.mubr.bf16.gmra.mrb[20].mxu0 %v1781_v4  ;;  %v1635_v38 = vshll.u32 %v1122_v45, 16  ;;  %v4913_v15 = vld [vmem:[#allocation5 + $0x1e8] sm:$0xff]   ;;  %v5969_v54 = vpop.permute.xlu1 %1222 }
 0x18b   : > { %7693 = vst [vmem:[#allocation92_spill] sm:$0xff] %v5936_v40  ;;  %7694 = vst [vmem:[#allocation93_spill] sm:$0xff] %v5943_v37  ;;  %v5949_v19 = vsel %vm747_vm1, %v803_v7, %v805_v10  ;;  %v5952_v22 = vsel %vm747_vm1, %v805_v10, %v807_v55  ;;  %2608 = vmatmul.mubr.bf16.gmra.mrb[20].mxu1 %v1104_v20  ;;  %v1367_v2 = vmul.f32 %v5712_v8, %v5769_v24 }
 0x18c   : > { %7695 = vst [vmem:[#allocation94_spill] sm:$0xff] %v5946_v48  ;;  %2776 = vmatprep.mubr.bf16.mxu0 %v1445_v58  ;;  %v1633_v63 = vor.u32 %v1631_v6, %v5874_v11  ;;  %v1368_v35 = vmul.f32 %v5727_v18, %v5793_v50  ;;  %v1075_v4 = vmul.f32 %v5592_v32, %v5737_v13  ;;  %v1637_v55 = vrot.slane %v1635_v38, 1  ;;  %v4898_v11 = vld [vmem:[#allocation5 + $0x120] sm:$0xff]  }
 0x18d   : > { %v1076_v7 = vmul.f32 %v5590_v31, %v5718_v16  ;;  %v1417_v20 = vmul.f32 %v5596_v34, %v5796_v27  ;;  %v5967_v47 = vpack.c.bf16 %v5781_v29, %v5796_v27  ;;  %v1639_v26 = vshrl.u32 %v1122_v45, 16  ;;  %4344 = vmatpush3.bf16.msra.mxu1 %v4894_v28  ;;  %4458 = vmatpush3.bf16.msra.mxu0 %v4912_v42  ;;  %v4901_v45 = vld [vmem:[#allocation5 + $0x168] sm:$0xff]   ;;  %v4915_v28 = vld [vmem:[#allocation5 + $0x1f0] sm:$0xff]  }
 0x18e   : > { %v1397_v21 = vpack.c.bf16 %v1368_v35, %v1367_v2  ;;  %v1418_v10 = vmul.f32 %v5594_v33, %v5781_v29  ;;  %v1369_v6 = vmul.f32 %v5750_v1, %v5796_v27  ;;  %v1370_v58 = vmul.f32 %v5936_v40, %v5781_v29  ;;  %4345 = vmatprep.subr.bf16.mxu1 %v4897_v5  ;;  %v4905_v40 = vld [vmem:[#allocation5 + $0x170] sm:$0xff]  }
 0x18f   : > { %v5980_v42 = vsel %vm1610_vm3, %v1633_v63, %v1637_v55  ;;  %v1641_v38 = vor.u32 %v1639_v26, %v1637_v55  ;;  %v1643_v31 = vshll.u32 %v5967_v47, 16  ;;  %4459 = vmatprep.subr.bf16.mxu0 %v4913_v15  ;;  %v1284_v32 = vrot.slane %v5642_v62, 6  ;;  %v4902_v63 = vld [vmem:[#allocation5 + $0x128] sm:$0xff]   ;;  %v4916_v55 = vld [vmem:[#allocation5 + $0x1b0] sm:$0xff]  }
 0x190   : > { %7696 = vst [vmem:[#allocation95_spill] sm:$0xff] %v5980_v42  ;;  %2615 = vmatprep.mubr.bf16.mxu1 %v5980_v42  ;;  %v1782_v35 = vrot.slane %v1397_v21, 1  ;;  %v1105_v1 = vpack.c.bf16 %v1076_v7, %v1075_v4  ;;  %v5988_v5 = vpack.c.bf16 %v5854_v52, %v5819_v17  ;;  %v1446_v26 = vpack.c.bf16 %v1418_v10, %v1417_v20  ;;  %v4917_v4 = vld [vmem:[#allocation5 + $0x1f8] sm:$0xff]   ;;  %v5996_v7 = vpop.permute.xlu1 %1230  ;;  %v4906_v21 = vld [vmem:[#allocation5 + $0x130] sm:$0xff]  }
 0x191   : > { %v1645_v18 = vrot.slane %v1643_v31, 1  ;;  %4346 = vmatpush3.bf16.msra.mxu1 %v4898_v11  ;;  %4460 = vmatpush3.bf16.msra.mxu0 %v4914_v30  ;;  %v1398_v2 = vpack.c.bf16 %v1370_v58, %v1369_v6  ;;  %v5998_v11 = vpop.permute.xlu0 %1226  ;;  %v1647_v30 = vshrl.u32 %v5967_v47, 16  ;;  %v1420_v6 = vmul.f32 %v5598_v36, %v5854_v52  ;;  %v7744_v42 = vld [vmem:[#allocation80_spill] sm:$0xff] }
 0x192   : > { %v1783_v15 = vsel %vm1776_vm2, %v5925_v3, %v1782_v35  ;;  %4347 = vmatprep.subr.bf16.mxu1 %v4901_v45  ;;  %4461 = vmatprep.subr.bf16.mxu0 %v4915_v28  ;;  %v1651_v62 = vshll.u32 %v5988_v5, 16  ;;  %v7698_v3 = vrot.slane %v5640_v61, 6  ;;  %v4909_v45 = vld [vmem:[#allocation5 + $0x178] sm:$0xff]   ;;  %v1077_v47 = vmul.f32 %v5596_v34, %v5769_v24 }
 0x193   : > { %2777 = vmatmul.mubr.bf16.gmra.mrb[24].mxu0 %v1783_v15  ;;  %2616 = vmatmul.mubr.bf16.gmra.mrb[24].mxu1 %v1105_v1  ;;  %v5993_v31 = vsel %vm1610_vm3, %v1641_v38, %v1645_v18  ;;  %v1078_v1 = vmul.f32 %v5594_v33, %v5793_v50  ;;  %v1784_v10 = vrot.slane %v1398_v2, 1  ;;  %v4918_v28 = vld [vmem:[#allocation5 + $0x1b8] sm:$0xff]   ;;  %v7700_v38 = vrot.slane %v5632_v57, 6  ;;  %v7704_v33 = vld [vmem:[#allocation27_spill] sm:$0xff] }
 0x194   : > { %7697 = vst [vmem:[#allocation96_spill] sm:$0xff] %v5993_v31  ;;  %2784 = vmatprep.mubr.bf16.mxu0 %v1446_v26  ;;  %2623 = vmatprep.mubr.bf16.mxu1 %v5993_v31  ;;  %v6004_v20 = vsel %vm1264_vm0, %v1284_v32, %v7698_v3  ;;  %v6022_v2 = vpack.c.bf16 %v5841_v53, %v5857_v23  ;;  %v7703_v3 = vld [vmem:[#allocation44_spill] sm:$0xff]  ;;  %v4911_v34 = vld [vmem:[#allocation5 + $0x138] sm:$0xff]  }
 0x195   : > { %7699 = vst [vmem:[#allocation97_spill] sm:$0xff] %v6004_v20  ;;  %4348 = vmatpush3.bf16.msra.mxu1 %v4902_v63  ;;  %4462 = vmatpush3.bf16.msra.mxu0 %v4916_v55  ;;  %v1372_v58 = vmul.f32 %v6004_v20, %v5854_v52  ;;  %v6016_v15 = vsel %vm1264_vm0, %v7700_v38, %v1284_v32  ;;  %v1653_v63 = vrot.slane %v1651_v62, 1  ;;  %v7702_v55 = vld [vmem:[#allocation43_spill] sm:$0xff]  ;;  %v6030_v62 = vpop.permute.xlu1 %1238  ;;  %v6032_v31 = vpop.permute.xlu0 %1234 }
 0x196   : > { %4349 = vmatprep.subr.bf16.mxu1 %v4905_v40  ;;  %7701 = vst [vmem:[#allocation98_spill] sm:$0xff] %v6016_v15  ;;  %4463 = vmatprep.subr.bf16.mxu0 %v4917_v4  ;;  %v1290_v26 = vrot.slane %v7702_v55, 6  ;;  %v1288_v40 = vrot.slane %v7703_v3, 6  ;;  %v1419_v20 = vmul.f32 %v7704_v33, %v5819_v17  ;;  %v1371_v32 = vmul.f32 %v6016_v15, %v5819_v17  ;;  %v6035_v3 = vld [vmem:[#allocation5 + $0x200] sm:$0xff]  }
 0x197   : > { %v1106_v57 = vpack.c.bf16 %v1078_v1, %v1077_v47  ;;  %v1649_v38 = vor.u32 %v1647_v30, %v1645_v18  ;;  %v1785_v4 = vsel %vm1776_vm2, %v1782_v35, %v1784_v10  ;;  %7705 = vst [vmem:[#allocation43_spill] sm:$0xff] %v6035_v3  ;;  %v1659_v18 = vshll.u32 %v6022_v2, 16 }
 0x198   : > { %v1447_v8 = vpack.c.bf16 %v1420_v6, %v1419_v20  ;;  %v1399_v55 = vpack.c.bf16 %v1372_v58, %v1371_v32  ;;  %v7707_v1 = vrot.slane %v5640_v61, 6  ;;  %v6047_v35 = vsel %vm1264_vm0, %v1288_v40, %v1290_v26  ;;  %v7710_v6 = vld [vmem:[#allocation29_spill] sm:$0xff] }
 0x199   : > { %4350 = vmatpush3.bf16.msra.mxu1 %v4906_v21  ;;  %4464 = vmatpush3.bf16.msra.mxu0 %v4918_v28  ;;  %v6038_v15 = vsel %vm1610_vm3, %v1649_v38, %v1653_v63  ;;  %7709 = vst [vmem:[#allocation100_spill] sm:$0xff] %v6047_v35  ;;  %v1079_v20 = vmul.f32 %v7704_v33, %v5796_v27  ;;  %v1655_v61 = vshrl.u32 %v5988_v5, 16  ;;  %v7711_v28 = vld [vmem:[#allocation28_spill] sm:$0xff]  ;;  %v7712_v38 = vld [vmem:[#allocation53_spill] sm:$0xff]  ;;  %v6066_v5 = vpop.permute.xlu1 %1246 }
 0x19a   : > { %4351 = vmatprep.subr.bf16.mxu1 %v4909_v45  ;;  %7706 = vst [vmem:[#allocation44_spill] sm:$0xff] %v6038_v15  ;;  %v6044_v30 = vsel %vm1264_vm0, %v7707_v1, %v1288_v40  ;;  %v1080_v21 = vmul.f32 %v5598_v36, %v5781_v29  ;;  %v1421_v58 = vmul.f32 %v7710_v6, %v5857_v23  ;;  %v1786_v45 = vrot.slane %v1399_v55, 1  ;;  %v7713_v1 = vld [vmem:[#allocation54_spill] sm:$0xff]  ;;  %v7714_v55 = vld [vmem:[#allocation72_spill] sm:$0xff] }
 0x19b   : > { %2785 = vmatmul.mubr.bf16.gmra.mrb[28].mxu0 %v1785_v4  ;;  %2624 = vmatmul.mubr.bf16.gmra.mrb[28].mxu1 %v1106_v57  ;;  %7708 = vst [vmem:[#allocation99_spill] sm:$0xff] %v6044_v30  ;;  %v1422_v47 = vmul.f32 %v7711_v28, %v5841_v53  ;;  %v1374_v40 = vmul.f32 %v6047_v35, %v5841_v53  ;;  %v1661_v57 = vrot.slane %v1659_v18, 1  ;;  %v1294_v4 = vrot.slane %v7712_v38, 6  ;;  %v7715_v35 = vld [vmem:[#allocation71_spill] sm:$0xff] }
 0x19c   : > { %2792 = vmatprep.mubr.bf16.mxu0 %v1447_v8  ;;  %2631 = vmatprep.mubr.bf16.mxu1 %v6038_v15  ;;  %v1373_v8 = vmul.f32 %v6044_v30, %v5857_v23  ;;  %v1657_v32 = vor.u32 %v1655_v61, %v1653_v63  ;;  %v1292_v36 = vrot.slane %v7713_v1, 6  ;;  %v1296_v33 = vrot.slane %v7714_v55, 6 }
 0x19d   : > { %4352 = vmatpush3.bf16.msra.mxu1 %v4911_v34  ;;  %v6068_v34 = vpop.permute.xlu0 %1242  ;;  %v1107_v15 = vpack.c.bf16 %v1080_v21, %v1079_v20  ;;  %v6073_v30 = vpack.c.bf16 %v5943_v37, %v5896_v12  ;;  %v1298_v29 = vrot.slane %v7715_v35, 6  ;;  %v1787_v63 = vsel %vm1776_vm2, %v1784_v10, %v1786_v45 }
 0x19e   : > { %4657 = vmatprep.subr.bf16.mxu1 %v6035_v3  ;;  %v1448_v18 = vpack.c.bf16 %v1422_v47, %v1421_v58  ;;  %v1400_v61 = vpack.c.bf16 %v1374_v40, %v1373_v8  ;;  %v6078_v38 = vsel %vm1610_vm3, %v1657_v32, %v1661_v57  ;;  %v1663_v1 = vshrl.u32 %v6022_v2, 16  ;;  %v7721_v8 = vld [vmem:[#allocation30_spill] sm:$0xff] }
 0x19f   : > { %7716 = vst [vmem:[#allocation53_spill] sm:$0xff] %v6078_v38  ;;  %v6082_v55 = vsel %vm1264_vm0, %v1290_v26, %v1292_v36  ;;  %v6085_v20 = vsel %vm1264_vm0, %v1292_v36, %v1294_v4  ;;  %v1302_v21 = vrot.slane %v5877_v0, 6  ;;  %v1300_v35 = vrot.slane %v5879_v46, 6  ;;  %v1255_v46 = vpop.permute.xlu1 %1254 }
 0x1a0   : > { %7717 = vst [vmem:[#allocation54_spill] sm:$0xff] %v6082_v55  ;;  %7718 = vst [vmem:[#allocation72_spill] sm:$0xff] %v6085_v20  ;;  %v6091_v10 = vsel %vm1264_vm0, %v1294_v4, %v1296_v33  ;;  %v1667_v2 = vshll.u32 %v6073_v30, 16  ;;  %v1376_v26 = vmul.f32 %v6085_v20, %v5943_v37  ;;  %v6099_v36 = vsel %vm1264_vm0, %v1296_v33, %v1298_v29 }
 0x1a1   : > { %7719 = vst [vmem:[#allocation71_spill] sm:$0xff] %v6091_v10  ;;  %7720 = vst [vmem:[#allocation101_spill] sm:$0xff] %v6099_v36  ;;  %v1304_v0 = vrot.slane %v5971_v41, 6  ;;  %v1251_v58 = vpop.permute.xlu0 %1250  ;;  %v1788_v47 = vrot.slane %v1400_v61, 1  ;;  %v1424_v40 = vmul.f32 %v7721_v8, %v5943_v37  ;;  %v1081_v32 = vmul.f32 %v7710_v6, %v5819_v17 }
 0x1a2   : > { %v1665_v4 = vor.u32 %v1663_v1, %v1661_v57  ;;  %v6113_v33 = vsel %vm1264_vm0, %v1298_v29, %v1300_v35  ;;  %v6116_v41 = vsel %vm1264_vm0, %v1300_v35, %v1302_v21  ;;  %v1306_v61 = vrot.slane %v5969_v54, 6 }
 0x1a3   : > { %2793 = vmatmul.mubr.bf16.gmra.mrb[32].mxu0 %v1787_v63  ;;  %2632 = vmatmul.mubr.bf16.gmra.mrb[32].mxu1 %v1107_v15  ;;  %v1082_v15 = vmul.f32 %v7711_v28, %v5854_v52  ;;  %v1375_v63 = vmul.f32 %v6082_v55, %v5896_v12  ;;  %7722 = vst [vmem:[#allocation102_spill] sm:$0xff] %v6113_v33  ;;  %7723 = vst [vmem:[#allocation103_spill] sm:$0xff] %v6116_v41  ;;  %v7724_v28 = vld [vmem:[#allocation31_spill] sm:$0xff]  ;;  %v7521_v57 = vrot.slane %v5998_v11, 6 }
 0x1a4   : > { %2800 = vmatprep.mubr.bf16.mxu0 %v1448_v18  ;;  %2639 = vmatprep.mubr.bf16.mxu1 %v6078_v38  ;;  %v6110_v18 = vpack.c.bf16 %v5903_v56, %v5946_v48  ;;  %v1423_v20 = vmul.f32 %v7724_v28, %v5896_v12  ;;  %v1669_v6 = vrot.slane %v1667_v2, 1  ;;  %v7522_v38 = vrot.slane %v6066_v5, 6 }
 0x1a5   : > { %v1108_v1 = vpack.c.bf16 %v1082_v15, %v1081_v32  ;;  %v1401_v55 = vpack.c.bf16 %v1376_v26, %v1375_v63  ;;  %v1320_v17 = vrot.slane %v1251_v58, 6  ;;  %v1789_v52 = vsel %vm1776_vm2, %v1786_v45, %v1788_v47  ;;  %v1263_v26 = vpop.permute.xlu1 %1262  ;;  %v1259_v32 = vpop.permute.xlu0 %1258 }
 0x1a6   : > { %v1449_v29 = vpack.c.bf16 %v1424_v40, %v1423_v20  ;;  %v6125_v3 = vsel %vm1264_vm0, %v1302_v21, %v1304_v0  ;;  %v6128_v54 = vsel %vm1610_vm3, %v1665_v4, %v1669_v6  ;;  %v1671_v35 = vshrl.u32 %v6073_v30, 16  ;;  %v7728_v40 = vld [vmem:[#allocation32_spill] sm:$0xff] }
 0x1a7   : > { %7725 = vst [vmem:[#allocation104_spill] sm:$0xff] %v6125_v3  ;;  %7726 = vst [vmem:[#allocation105_spill] sm:$0xff] %v6128_v54  ;;  %v1675_v15 = vshll.u32 %v6110_v18, 16  ;;  %v1322_v2 = vrot.slane %v1255_v46, 6  ;;  %v1083_v45 = vmul.f32 %v7724_v28, %v5857_v23  ;;  %v1378_v20 = vmul.f32 %v6099_v36, %v5903_v56  ;;  %v7727_v46 = vld [vmem:[#allocation33_spill] sm:$0xff] }
 0x1a8   : > { %v1790_v21 = vrot.slane %v1401_v55, 1  ;;  %v1084_v30 = vmul.f32 %v7721_v8, %v5841_v53  ;;  %v1425_v58 = vmul.f32 %v7727_v46, %v5946_v48  ;;  %v1426_v4 = vmul.f32 %v7728_v40, %v5903_v56 }
 0x1a9   : > { %v6146_v63 = vsel %vm1264_vm0, %v1304_v0, %v1306_v61  ;;  %v6156_v55 = vsel %vm1264_vm0, %v7522_v38, %v1320_v17  ;;  %v6160_v28 = vrot.slane %v1263_v26, 6  ;;  %v1324_v36 = vrot.slane %v1259_v32, 6 }
 0x1aa   : > { %7729 = vst [vmem:[#allocation106_spill] sm:$0xff] %v6146_v63  ;;  %v6163_v0 = vsel %vm1264_vm0, %v1320_v17, %v1322_v2  ;;  %v1791_v38 = vsel %vm1776_vm2, %v1788_v47, %v1790_v21  ;;  %v1109_v23 = vpack.c.bf16 %v1084_v30, %v1083_v45  ;;  %v1450_v27 = vpack.c.bf16 %v1426_v4, %v1425_v58  ;;  %v7735_v30 = vld [vmem:[#allocation34_spill] sm:$0xff] }
 0x1ab   : > { %2801 = vmatmul.mubr.bf16.gmra.mrb[36].mxu0 %v1789_v52  ;;  %2640 = vmatmul.mubr.bf16.gmra.mrb[36].mxu1 %v1108_v1  ;;  %v1377_v52 = vmul.f32 %v6091_v10, %v5946_v48  ;;  %v6151_v1 = vsel %vm1264_vm0, %v1306_v61, %v7521_v57  ;;  %7732 = vst [vmem:[#allocation108_spill] sm:$0xff] %v6160_v28  ;;  %v1679_v17 = vshrl.u32 %v6110_v18, 16 }
 0x1ac   : > { %2808 = vmatprep.mubr.bf16.mxu0 %v1449_v29  ;;  %2647 = vmatprep.mubr.bf16.mxu1 %v6128_v54  ;;  %7730 = vst [vmem:[#allocation107_spill] sm:$0xff] %v6151_v1  ;;  %v7731_v29 = vld [vmem:[#allocation62_spill] sm:$0xff]  ;;  %v1673_v10 = vor.u32 %v1671_v35, %v1669_v6  ;;  %v1677_v54 = vrot.slane %v1675_v15, 1  ;;  %v1086_v61 = vmul.f32 %v7728_v40, %v5943_v37  ;;  %v7733_v6 = vld [vmem:[#allocation35_spill] sm:$0xff] }
 0x1ad   : > { %v1128_v8 = vpack.c.bf16 %v7731_v29, %v5907_v51  ;;  %v1402_v53 = vpack.c.bf16 %v1378_v20, %v1377_v52  ;;  %v1379_v57 = vmul.f32 %v6113_v33, %v5907_v51  ;;  %v1085_v26 = vmul.f32 %v7727_v46, %v5896_v12 }
 0x1ae   : > { %v1427_v35 = vmul.f32 %v7733_v6, %v5907_v51  ;;  %v1380_v32 = vmul.f32 %v6116_v41, %v7731_v29  ;;  %v6178_v52 = vsel %vm1264_vm0, %v1322_v2, %v1324_v36  ;;  %v6182_v47 = vsel %vm1264_vm0, %v1324_v36, %v6160_v28  ;;  %v7740_v41 = vld [vmem:[#allocation66_spill] sm:$0xff] }
 0x1af   : > { %v1683_v15 = vshll.u32 %v1128_v8, 16  ;;  %v6185_v45 = vsel %vm1610_vm3, %v1673_v10, %v1677_v54  ;;  %v1792_v18 = vrot.slane %v1402_v53, 1  ;;  %v1110_v20 = vpack.c.bf16 %v1086_v61, %v1085_v26  ;;  %v7738_v10 = vld [vmem:[#allocation57_spill] sm:$0xff] }
 0x1b0   : > { %7734 = vst [vmem:[#allocation109_spill] sm:$0xff] %v6185_v45  ;;  %v1428_v58 = vmul.f32 %v7735_v30, %v7731_v29  ;;  %v1403_v4 = vpack.c.bf16 %v1380_v32, %v1379_v57  ;;  %v1087_v2 = vmul.f32 %v7733_v6, %v5946_v48  ;;  %v1088_v36 = vmul.f32 %v7735_v30, %v5903_v56 }
 0x1b1   : > { %v1681_v61 = vor.u32 %v1679_v17, %v1677_v54  ;;  %v1685_v26 = vrot.slane %v1683_v15, 1  ;;  %v1687_v32 = vshrl.u32 %v1128_v8, 16  ;;  %v6212_v30 = vmul.f32 %v6146_v63, %v7738_v10  ;;  %v7741_v17 = vld [vmem:[#allocation82_spill] sm:$0xff]  ;;  %v7742_v15 = vld [vmem:[#allocation65_spill] sm:$0xff] }
 0x1b2   : > { %v1451_v53 = vpack.c.bf16 %v1428_v58, %v1427_v35  ;;  %v6216_v33 = vmul.f32 %v7740_v41, %v5863_v59  ;;  %v1793_v54 = vsel %vm1776_vm2, %v1790_v21, %v1792_v18  ;;  %v6219_v35 = vrot.slane %v1403_v4, 1 }
 0x1b3   : > { %2809 = vmatmul.mubr.bf16.gmra.mrb[40].mxu0 %v1791_v38  ;;  %2648 = vmatmul.mubr.bf16.gmra.mrb[40].mxu1 %v1109_v23  ;;  %v7736_v38 = vld [vmem:[#allocation63_spill] sm:$0xff]  ;;  %v7737_v23 = vld [vmem:[#allocation37_spill] sm:$0xff]  ;;  %v6223_v58 = vmul.f32 %v7742_v15, %v7741_v17  ;;  %v1133_v8 = vpack.c.bf16 %v7741_v17, %v5863_v59  ;;  %v1390_v56 = vmul.f32 %v6163_v0, %v7741_v17 }
 0x1b4   : > { %2816 = vmatprep.mubr.bf16.mxu0 %v1450_v27  ;;  %2655 = vmatprep.mubr.bf16.mxu1 %v6185_v45  ;;  %v6196_v40 = vmul.f32 %v7737_v23, %v7736_v38  ;;  %v7739_v27 = vld [vmem:[#allocation36_spill] sm:$0xff]  ;;  %v6204_v57 = vpack.c.bf16 %v7738_v10, %v7736_v38  ;;  %v6208_v6 = vmul.f32 %v6125_v3, %v7736_v38 }
 0x1b5   : > { %v6200_v46 = vmul.f32 %v7739_v27, %v7738_v10  ;;  %v1111_v3 = vpack.c.bf16 %v1088_v36, %v1087_v2  ;;  %v1389_v45 = vmul.f32 %v6156_v55, %v5863_v59  ;;  %v6234_v21 = vsel %vm1610_vm3, %v1681_v61, %v1685_v26 }
 0x1b6   : > { %7743 = vst [vmem:[#allocation66_spill] sm:$0xff] %v6234_v21  ;;  %v1691_v4 = vshll.u32 %v6204_v57, 16  ;;  %v1723_v12 = vshll.u32 %v1133_v8, 16  ;;  %v1689_v2 = vor.u32 %v1687_v32, %v1685_v26  ;;  %v1727_v36 = vshrl.u32 %v1133_v8, 16 }
 0x1b7   : > { %v1452_v63 = vpack.c.bf16 %v6200_v46, %v6196_v40  ;;  %v1404_v46 = vpack.c.bf16 %v6212_v30, %v6208_v6  ;;  %v1408_v40 = vpack.c.bf16 %v1390_v56, %v1389_v45  ;;  %v1795_v61 = vsel %vm1776_vm2, %v1792_v18, %v6219_v35  ;;  %v7748_v30 = vld [vmem:[#allocation68_spill] sm:$0xff] }
 0x1b8   : > { %v6247_v48 = vmul.f32 %v7744_v42, %v5900_v14  ;;  %v6253_v32 = vrot.slane %v1723_v12, 1  ;;  %v1134_v56 = vpack.c.bf16 %v5949_v19, %v5900_v14  ;;  %v1391_v6 = vmul.f32 %v6178_v52, %v5900_v14 }
 0x1b9   : > { %v1392_v45 = vmul.f32 %v6182_v47, %v5949_v19  ;;  %v1693_v18 = vrot.slane %v1691_v4, 1  ;;  %v6265_v8 = vrot.slane %v1408_v40, 1  ;;  %v6272_v44 = vmul.f32 %v7744_v42, %v5863_v59 }
 0x1ba   : > { %7745 = vst [vmem:[#allocation82_spill] sm:$0xff] %v6247_v48  ;;  %v1729_v37 = vor.u32 %v1727_v36, %v6253_v32  ;;  %v6280_v50 = vmul.f32 %v5923_v49, %v5952_v22  ;;  %v6284_v40 = vmul.f32 %v5921_v25, %v5910_v39  ;;  %v1135_v36 = vpack.c.bf16 %v5952_v22, %v5952_v22 }
 0x1bb   : > { %2817 = vmatmul.mubr.bf16.gmra.mrb[44].mxu0 %v1793_v54  ;;  %2656 = vmatmul.mubr.bf16.gmra.mrb[44].mxu1 %v1110_v20  ;;  %v7746_v20 = vld [vmem:[#allocation79_spill] sm:$0xff]  ;;  %v1409_v24 = vpack.c.bf16 %v1392_v45, %v1391_v6  ;;  %v1735_v12 = vshrl.u32 %v1134_v56, 16  ;;  %v1393_v60 = vmul.f32 %v6160_v28, %v5952_v22  ;;  %v6291_v16 = vsel %vm1610_vm3, %v1689_v2, %v1693_v18 }
 0x1bc   : > { %2824 = vmatprep.mubr.bf16.mxu0 %v1451_v53  ;;  %2663 = vmatprep.mubr.bf16.mxu1 %v6234_v21  ;;  %v6251_v26 = vmul.f32 %v7746_v20, %v5949_v19  ;;  %v7749_v53 = vld [vmem:[#allocation75_spill] sm:$0xff]  ;;  %v1731_v21 = vshll.u32 %v1134_v56, 16  ;;  %v6276_v4 = vmul.f32 %v7746_v20, %v7741_v17  ;;  %7750 = vst [vmem:[#allocation80_spill] sm:$0xff] %v6280_v50  ;;  %7751 = vst [vmem:[#allocation79_spill] sm:$0xff] %v6284_v40 }
 0x1bd   : > { %v6263_v54 = vpack.c.bf16 %v7749_v53, %v7748_v30  ;;  %v1806_v45 = vrot.slane %v1409_v24, 1  ;;  %7752 = vst [vmem:[#allocation68_spill] sm:$0xff] %v6291_v16  ;;  %v1739_v48 = vshll.u32 %v1135_v36, 16  ;;  %v1410_v13 = vpack.c.bf16 %v1393_v60, %v1393_v60  ;;  %v7757_v60 = vld [vmem:[#allocation38_spill] sm:$0xff] }
 0x1be   : > { %7747 = vst [vmem:[#allocation65_spill] sm:$0xff] %v6251_v26  ;;  %v1733_v6 = vrot.slane %v1731_v21, 1  ;;  %v1695_v26 = vshrl.u32 %v6204_v57, 16  ;;  %v7755_v57 = vrot.slane %v5998_v11, 6  ;;  %v1796_v50 = vrot.slane %v1404_v46, 1 }
 0x1bf   : > { %v6303_v21 = vsel %vm1776_vm2, %v6265_v8, %v1806_v45  ;;  %v1741_v56 = vrot.slane %v1739_v48, 1  ;;  %v1432_v48 = vmul.f32 %v7757_v60, %v7749_v53  ;;  %v1699_v36 = vshll.u32 %v6263_v54, 16 }
 0x1c0   : > { %v6299_v24 = vsel %vm1610_vm3, %v1729_v37, %v1733_v6  ;;  %v6305_v2 = vor.u32 %v1735_v12, %v1733_v6  ;;  %v7754_v37 = vrot.slane %v5996_v7, 6  ;;  %v1314_v11 = vrot.slane %v6030_v62, 6 }
 0x1c2   : > { %v6321_v12 = vsel %vm1264_vm0, %v7755_v57, %v7754_v37  ;;  %v6332_v43 = vsel %vm1610_vm3, %v6305_v2, %v1741_v56  ;;  %v1312_v37 = vrot.slane %v6032_v31, 6  ;;  %v1090_v57 = vmul.f32 %v7739_v27, %v7731_v29 }
 0x1c3   : > { %2825 = vmatmul.mubr.bf16.gmra.mrb[48].mxu0 %v1795_v61  ;;  %2664 = vmatmul.mubr.bf16.gmra.mrb[48].mxu1 %v1111_v3  ;;  %v6310_v61 = vmul.f32 %v5923_v49, %v5900_v14  ;;  %v6314_v3 = vmul.f32 %v5921_v25, %v5949_v19  ;;  %7756 = vst [vmem:[#allocation110_spill] sm:$0xff] %v6321_v12  ;;  %v1808_v25 = vrot.slane %v1410_v13, 1  ;;  %v1703_v29 = vshrl.u32 %v6263_v54, 16  ;;  %v7763_v54 = vld [vmem:[#allocation41_spill] sm:$0xff] }
 0x1c4   : > { %2832 = vmatprep.mubr.bf16.mxu0 %v1452_v63  ;;  %2671 = vmatprep.mubr.bf16.mxu1 %v6291_v16  ;;  %v1089_v63 = vmul.f32 %v7737_v23, %v5907_v51  ;;  %v1384_v6 = vmul.f32 %v6321_v12, %v7749_v53  ;;  %v1697_v49 = vor.u32 %v1695_v26, %v1693_v18  ;;  %v7758_v23 = vld [vmem:[#allocation76_spill] sm:$0xff]  ;;  %v7759_v16 = vld [vmem:[#allocation70_spill] sm:$0xff]  ;;  %v7760_v12 = vld [vmem:[#allocation39_spill] sm:$0xff] }
 0x1c5   : > { %7753 = vst [vmem:[#allocation75_spill] sm:$0xff] %v6310_v61  ;;  %v1131_v51 = vpack.c.bf16 %v7759_v16, %v7758_v23  ;;  %v1431_v40 = vmul.f32 %v7760_v12, %v7748_v30  ;;  %v1383_v56 = vmul.f32 %v6151_v1, %v7748_v30  ;;  %v6346_v13 = vsel %vm1776_vm2, %v1806_v45, %v1808_v25 }
 0x1c6   : > { %v1112_v31 = vpack.c.bf16 %v1090_v57, %v1089_v63  ;;  %v1701_v61 = vrot.slane %v1699_v36, 1  ;;  %v1797_v26 = vsel %vm1776_vm2, %v6219_v35, %v1796_v50  ;;  %v7762_v25 = vrot.slane %v5996_v7, 6  ;;  %v7764_v7 = vld [vmem:[#allocation40_spill] sm:$0xff] }
 0x1c7   : > { %v1453_v18 = vpack.c.bf16 %v1432_v48, %v1431_v40  ;;  %v1405_v27 = vpack.c.bf16 %v1384_v6, %v1383_v56  ;;  %v1707_v1 = vshll.u32 %v1131_v51, 16  ;;  %v6362_v62 = vsel %vm1264_vm0, %v1312_v37, %v1314_v11 }
 0x1c8   : > { %v6352_v46 = vsel %vm1610_vm3, %v1697_v49, %v1701_v61  ;;  %v6358_v45 = vsel %vm1264_vm0, %v7762_v25, %v1312_v37  ;;  %v1091_v35 = vmul.f32 %v7760_v12, %v7736_v38  ;;  %v1092_v49 = vmul.f32 %v7757_v60, %v7738_v10 }
 0x1c9   : > { %7761 = vst [vmem:[#allocation76_spill] sm:$0xff] %v6352_v46  ;;  %v1433_v40 = vmul.f32 %v7763_v54, %v7758_v23  ;;  %v1798_v63 = vrot.slane %v1405_v27, 1  ;;  %v1434_v48 = vmul.f32 %v7764_v7, %v7759_v16  ;;  %v1385_v36 = vmul.f32 %v6358_v45, %v7758_v23 }
 0x1ca   : > { %v1386_v6 = vmul.f32 %v6362_v62, %v7759_v16  ;;  %v1316_v37 = vrot.slane %v6068_v34, 6  ;;  %v1705_v57 = vor.u32 %v1703_v29, %v1701_v61  ;;  %v1709_v56 = vrot.slane %v1707_v1, 1 }
 0x1cb   : > { %2833 = vmatmul.mubr.bf16.gmra.mrb[52].mxu0 %v1797_v26  ;;  %2672 = vmatmul.mubr.bf16.gmra.mrb[52].mxu1 %v1112_v31  ;;  %v1113_v31 = vpack.c.bf16 %v1092_v49, %v1091_v35  ;;  %v7765_v26 = vld [vmem:[#allocation78_spill] sm:$0xff]  ;;  %v1799_v60 = vsel %vm1776_vm2, %v1796_v50, %v1798_v63  ;;  %v1454_v27 = vpack.c.bf16 %v1434_v48, %v1433_v40  ;;  %v1711_v34 = vshrl.u32 %v1131_v51, 16  ;;  %v7769_v40 = vld [vmem:[#allocation47_spill] sm:$0xff] }
 0x1cc   : > { %2840 = vmatprep.mubr.bf16.mxu0 %v1453_v18  ;;  %2679 = vmatprep.mubr.bf16.mxu1 %v6352_v46  ;;  %v7766_v18 = vld [vmem:[#allocation85_spill] sm:$0xff]  ;;  %v1406_v12 = vpack.c.bf16 %v1386_v6, %v1385_v36  ;;  %v7767_v46 = vrot.slane %v6066_v5, 6  ;;  %v6386_v38 = vsel %vm1610_vm3, %v1705_v57, %v1709_v56  ;;  %v6392_v50 = vsel %vm1264_vm0, %v1314_v11, %v1316_v37 }
 0x1cd   : > { %v1132_v25 = vpack.c.bf16 %v7766_v18, %v7765_v26  ;;  %v1094_v5 = vmul.f32 %v7764_v7, %v7749_v53  ;;  %v1387_v51 = vmul.f32 %v6392_v50, %v7765_v26  ;;  %v1093_v35 = vmul.f32 %v7763_v54, %v7748_v30 }
 0x1ce   : > { %v6383_v10 = vsel %vm1264_vm0, %v1316_v37, %v7767_v46  ;;  %v1800_v61 = vrot.slane %v1406_v12, 1  ;;  %v1713_v49 = vor.u32 %v1711_v34, %v1709_v56  ;;  %v1435_v48 = vmul.f32 %v7769_v40, %v7765_v26 }
 0x1cf   : > { %v1388_v1 = vmul.f32 %v6383_v10, %v7766_v18  ;;  %v1715_v29 = vshll.u32 %v1132_v25, 16  ;;  %v1114_v36 = vpack.c.bf16 %v1094_v5, %v1093_v35  ;;  %v1719_v12 = vshrl.u32 %v1132_v25, 16 }
 0x1d0   : > { %v1801_v37 = vsel %vm1776_vm2, %v1798_v63, %v1800_v61  ;;  %v1095_v56 = vmul.f32 %v7769_v40, %v7758_v23  ;;  %v1487_v63 = vmul.f32 %v6392_v50, %v5863_v59  ;;  %v1488_v25 = vmul.f32 %v6383_v10, %v7741_v17 }
 0x1d1   : > { %v1407_v11 = vpack.c.bf16 %v1388_v1, %v1387_v51  ;;  %v1717_v6 = vrot.slane %v1715_v29, 1  ;;  %v6419_v5 = vmul.f32 %v7769_v40, %v5863_v59  ;;  %v1489_v40 = vmul.f32 %v6156_v55, %v5900_v14 }
 0x1d3   : > { %2841 = vmatmul.mubr.bf16.gmra.mrb[56].mxu0 %v1799_v60  ;;  %2680 = vmatmul.mubr.bf16.gmra.mrb[56].mxu1 %v1113_v31  ;;  %v7768_v60 = vld [vmem:[#allocation46_spill] sm:$0xff]  ;;  %v6406_v31 = vsel %vm1610_vm3, %v1713_v49, %v1717_v6  ;;  %v1721_v1 = vor.u32 %v1719_v12, %v1717_v6  ;;  %v1098_v49 = vmul.f32 %v7742_v15, %v7766_v18 }
 0x1d4   : > { %2848 = vmatprep.mubr.bf16.mxu0 %v1454_v27  ;;  %2687 = vmatprep.mubr.bf16.mxu1 %v6386_v38  ;;  %v1436_v46 = vmul.f32 %v7768_v60, %v7766_v18  ;;  %v1802_v27 = vrot.slane %v1407_v11, 1  ;;  %v1096_v34 = vmul.f32 %v7768_v60, %v7759_v16  ;;  %v6423_v29 = vmul.f32 %v7768_v60, %v7741_v17 }
 0x1d5   : > { %v1490_v60 = vmul.f32 %v6163_v0, %v5949_v19  ;;  %v6438_v6 = vsel %vm1610_vm3, %v1721_v1, %v6253_v32  ;;  %v1491_v32 = vmul.f32 %v6178_v52, %v5952_v22  ;;  %v7770_v1 = vpack.c.bf16 %v6223_v58, %v6216_v33 }
 0x1d6   : > { %v1455_v57 = vpack.c.bf16 %v1436_v46, %v1435_v48  ;;  %v1459_v46 = vpack.c.bf16 %v5910_v39, %v5952_v22  ;;  %v1803_v51 = vsel %vm1776_vm2, %v1800_v61, %v1802_v27  ;;  %v1115_v35 = vpack.c.bf16 %v1096_v34, %v1095_v56 }
 0x1d7   : > { %v1507_v48 = vpack.c.bf16 %v1488_v25, %v1487_v63  ;;  %v6442_v61 = vmul.f32 %v7740_v41, %v5900_v14  ;;  %v1508_v34 = vpack.c.bf16 %v1490_v60, %v1489_v40  ;;  %v6470_v33 = vmul.f32 %v7744_v42, %v5952_v22 }
 0x1d8   : > { %v1831_v63 = vshrl.u32 %v1459_v46, 16  ;;  %v6476_v60 = vmul.f32 %v7746_v20, %v5910_v39  ;;  %v1460_v42 = vpack.c.bf16 %v5913_v9, %v5913_v9 }
 0x1d9   : > { %7771 = vst [vmem:[#allocation70_spill] sm:$0xff] %v6470_v33  ;;  %v7792_v33 = vld [vmem:[#allocation52_spill] sm:$0xff] }
 0x1db   : > { %2849 = vmatmul.mubr.bf16.gmra.mrb[60].mxu0 %v1801_v37  ;;  %2688 = vmatmul.mubr.bf16.gmra.mrb[60].mxu1 %v1114_v36  ;;  %v1827_v36 = vshll.u32 %v1459_v46, 16  ;;  %v6446_v37 = vmul.f32 %v7742_v15, %v5949_v19  ;;  %v6457_v15 = vrot.slane %v1507_v48, 1 }
 0x1dc   : > { %2856 = vmatprep.mubr.bf16.mxu0 %v1455_v57  ;;  %2695 = vmatprep.mubr.bf16.mxu1 %v6406_v31  ;;  %v5133_v57 = vmov 0.0  }
 0x1dd   : > { %v6449_v12 = vpack.c.bf16 %v5133_v57, %v5913_v9  ;;  %v1829_v56 = vrot.slane %v1827_v36, 1  ;;  %v1885_v36 = vrot.slane %v1508_v34, 1  ;;  %v1097_v57 = vmul.f32 %v7740_v41, %v7765_v26 }
 0x1df   : > { %v6466_v46 = vsel %vm1610_vm3, %v6305_v2, %v1829_v56  ;;  %v1833_v40 = vor.u32 %v1831_v63, %v1829_v56  ;;  %v6482_v2 = vsel %vm1776_vm2, %v6457_v15, %v1885_v36  ;;  %v1493_v56 = vmul.f32 %v6160_v28, %v5913_v9  ;;  %v7774_v28 = vld [vmem:[#allocation65_spill] sm:$0xff] }
 0x1e1   : > { %v1510_v41 = vpack.c.bf16 %v1493_v56, %v1493_v56  ;;  %v7782_v56 = vld [vmem:[#allocation49_spill] sm:$0xff] }
 0x1e3   : > { %2857 = vmatmul.mubr.bf16.gmra.mrb[64].mxu0 %v1803_v51  ;;  %2696 = vmatmul.mubr.bf16.gmra.mrb[64].mxu1 %v1115_v35  ;;  %v1908_v51 = vshll.u32 %v6449_v12, 16  ;;  %v1492_v35 = vmul.f32 %v6182_v47, %v5910_v39  ;;  %v1889_v25 = vrot.slane %v1510_v41, 1  ;;  %v7784_v41 = vld [vmem:[#allocation50_spill] sm:$0xff] }
 0x1e4   : > { %2864 = vmatprep.mubr.bf16.mxu0 %v7770_v1  ;;  %2703 = vmatprep.mubr.bf16.mxu1 %v6438_v6  ;;  %v1835_v1 = vshll.u32 %v1460_v42, 16 }
 0x1e5   : > { %v6472_v58 = vrot.slane %v1908_v51, 1  ;;  %v1509_v48 = vpack.c.bf16 %v1492_v35, %v1491_v32  ;;  %v1116_v32 = vpack.c.bf16 %v1098_v49, %v1097_v57  ;;  %v1805_v51 = vsel %vm1776_vm2, %v1802_v27, %v6265_v8  ;;  %v7779_v8 = vld [vmem:[#allocation60_spill] sm:$0xff]  ;;  %v7780_v27 = vld [vmem:[#allocation45_spill] sm:$0xff] }
 0x1e6   : > { %v1837_v11 = vrot.slane %v1835_v1, 1  ;;  %v7781_v57 = vld [vmem:[#allocation61_spill] sm:$0xff] }
 0x1e7   : > { %7772 = vst [vmem:[#allocation41_spill] sm:$0xff] %v6472_v58  ;;  %v6490_v34 = vsel %vm1610_vm3, %v1833_v40, %v6472_v58  ;;  %v1887_v63 = vrot.slane %v1509_v48, 1  ;;  %v7775_v58 = vld [vmem:[#allocation82_spill] sm:$0xff]  ;;  %v1463_v42 = vmul.f32 %v7782_v56, %v7781_v57 }
 0x1e8   : > { %7773 = vst [vmem:[#allocation40_spill] sm:$0xff] %v6490_v34  ;;  %v7776_v34 = vpack.c.bf16 %v7774_v28, %v7775_v58  ;;  %v6507_v48 = vsel %vm1610_vm3, %v1833_v40, %v1837_v11  ;;  %v7786_v28 = vld [vmem:[#allocation42_spill] sm:$0xff] }
 0x1e9   : > { %v6497_v35 = vsel %vm1776_vm2, %v1885_v36, %v1887_v63  ;;  %v6504_v49 = vsel %vm1776_vm2, %v1887_v63, %v1889_v25  ;;  %7778 = vst [vmem:[#allocation85_spill] sm:$0xff] %v6507_v48  ;;  %v1462_v36 = vmul.f32 %v7780_v27, %v7779_v8  ;;  %v7787_v25 = vpack.c.bf16 %v6276_v4, %v6272_v44  ;;  %v7789_v63 = vld [vmem:[#allocation80_spill] sm:$0xff] }
 0x1ea   : > { %7777 = vst [vmem:[#allocation78_spill] sm:$0xff] %v6504_v49  ;;  %v1584_v49 = vmul.f32 %v6358_v45, %v5863_v59  ;;  %v1585_v44 = vmul.f32 %v6362_v62, %v7741_v17  ;;  %v1586_v4 = vmul.f32 %v6392_v50, %v5900_v14  ;;  %v1589_v59 = vmul.f32 %v6163_v0, %v5910_v39  ;;  %v7795_v17 = vld [vmem:[#allocation75_spill] sm:$0xff] }
 0x1eb   : > { %2865 = vmatmul.mubr.bf16.gmra.mrb[68].mxu0 %v1805_v51  ;;  %2704 = vmatmul.mubr.bf16.gmra.mrb[68].mxu1 %v1116_v32  ;;  %v7783_v32 = vld [vmem:[#allocation56_spill] sm:$0xff]  ;;  %v7785_v51 = vld [vmem:[#allocation59_spill] sm:$0xff]  ;;  %v7796_v14 = vpack.c.bf16 %v6314_v3, %v7795_v17  ;;  %v1590_v50 = vmul.f32 %v6178_v52, %v5913_v9  ;;  %v7803_v52 = vld [vmem:[#allocation69_spill] sm:$0xff] }
 0x1ec   : > { %2872 = vmatprep.mubr.bf16.mxu0 %v7776_v34  ;;  %2711 = vmatprep.mubr.bf16.mxu1 %v6299_v24  ;;  %v1464_v1 = vmul.f32 %v7784_v41, %v7783_v32  ;;  %v1461_v58 = vmul.f32 %v7786_v28, %v7785_v51  ;;  %v7788_v34 = vld [vmem:[#allocation79_spill] sm:$0xff]  ;;  %v7791_v51 = vld [vmem:[#allocation73_spill] sm:$0xff] }
 0x1ed   : > { %v7790_v8 = vpack.c.bf16 %v7788_v34, %v7789_v63  ;;  %v7801_v63 = vld [vmem:[#allocation74_spill] sm:$0xff] }
 0x1ee   : > { %v1494_v11 = vpack.c.bf16 %v1462_v36, %v1461_v58  ;;  %v1495_v40 = vpack.c.bf16 %v1464_v1, %v1463_v42  ;;  %v1587_v36 = vmul.f32 %v6383_v10, %v5949_v19  ;;  %v7793_v42 = vld [vmem:[#allocation67_spill] sm:$0xff]  ;;  %v1605_v58 = vpack.c.bf16 %v1585_v44, %v1584_v49 }
 0x1ef   : > { %v7794_v1 = vld [vmem:[#allocation51_spill] sm:$0xff] }
 0x1f0   : > { %v1858_v20 = vrot.slane %v1494_v11, 1  ;;  %v1859_v48 = vrot.slane %v1495_v40, 1  ;;  %v1591_v11 = vmul.f32 0.0, %v6182_v47  ;;  %v1606_v10 = vpack.c.bf16 %v1587_v36, %v1586_v4  ;;  %v7797_v49 = vld [vmem:[#allocation95_spill] sm:$0xff]  ;;  %v7799_v47 = vld [vmem:[#allocation21_spill] sm:$0xff]  ;;  %v7804_v4 = vld [vmem:[#allocation58_spill] sm:$0xff] }
 0x1f1   : > { %v6554_v40 = vrot.slane %v1605_v58, 1  ;;  %v1468_v36 = vmul.f32 %v7804_v4, %v7803_v52 }
 0x1f2   : > { %v1860_v19 = vsel %vm1776_vm2, %v1858_v20, %v1859_v48  ;;  %v1960_v3 = vrot.slane %v1606_v10, 1  ;;  %v1608_v34 = vpack.c.bf16 %v1591_v11, %v1590_v50  ;;  %v7810_v10 = vld [vmem:[#allocation96_spill] sm:$0xff]  ;;  %v7811_v50 = vld [vmem:[#allocation43_spill] sm:$0xff] }
 0x1f3   : > { %2873 = vmatmul.mubr.bf16.gmra.mrb[72].mxu0 %v6303_v21  ;;  %2712 = vmatmul.mubr.bf16.gmra.mrb[72].mxu1 %v7787_v25  ;;  %v1466_v21 = vmul.f32 %v7792_v33, %v7791_v51  ;;  %v1588_v25 = vmul.f32 %v6156_v55, %v5952_v22  ;;  %v7798_v22 = vld [vmem:[#allocation19_spill] sm:$0xff]  ;;  %7800 = vst [vmem:[#allocation46_spill] sm:$0xff] %v6554_v40 }
 0x1f4   : > { %2880 = vmatprep.mubr.bf16.mxu0 %v7790_v8  ;;  %2719 = vmatprep.mubr.bf16.mxu1 %v6332_v43  ;;  %v1465_v43 = vmul.f32 %v7794_v1, %v7793_v42  ;;  %v1511_v39 = vmul.f32 %v7798_v22, %v7781_v57  ;;  %v7802_v8 = vld [vmem:[#allocation55_spill] sm:$0xff]  ;;  %v6562_v17 = vsel %vm1776_vm2, %v6554_v40, %v1960_v3  ;;  %v7824_v40 = vld [vmem:[#allocation97_spill] sm:$0xff] }
 0x1f5   : > { %v1607_v0 = vpack.c.bf16 %v1589_v59, %v1588_v25  ;;  %v1467_v44 = vmul.f32 %v7802_v8, %v7801_v63  ;;  %7805 = vst [vmem:[#allocation47_spill] sm:$0xff] %v6562_v17  ;;  %v4920_v59 = vld [vmem:[#allocation5 + $0x208] sm:$0xff]   ;;  %v7837_v8 = vld [vmem:[#allocation88_spill] sm:$0xff] }
 0x1f6   : > { %v1496_v55 = vpack.c.bf16 %v1466_v21, %v1465_v43  ;;  %v6564_v21 = vrot.slane %v1608_v34, 1  ;;  %v7814_v34 = vld [vmem:[#allocation83_spill] sm:$0xff] }
 0x1f7   : > { %v1962_v20 = vrot.slane %v1607_v0, 1 }
 0x1f8   : > { %7806 = vst [vmem:[#allocation65_spill] sm:$0xff] %v6564_v21  ;;  %v1861_v43 = vrot.slane %v1496_v55, 1  ;;  %v7812_v55 = vld [vmem:[#allocation20_spill] sm:$0xff] }
 0x1f9   : > { %v6567_v25 = vsel %vm1776_vm2, %v1960_v3, %v1962_v20  ;;  %v6571_v11 = vsel %vm1776_vm2, %v1962_v20, %v6564_v21  ;;  %v1514_v0 = vmul.f32 %v7812_v55, %v7791_v51  ;;  %v7815_v20 = vld [vmem:[#allocation92_spill] sm:$0xff] }
 0x1fa   : > { %7807 = vst [vmem:[#allocation82_spill] sm:$0xff] %v6567_v25  ;;  %7808 = vst [vmem:[#allocation60_spill] sm:$0xff] %v6571_v11  ;;  %v1862_v22 = vsel %vm1776_vm2, %v1859_v48, %v1861_v43  ;;  %v4922_v48 = vld [vmem:[#allocation5 + $0x218] sm:$0xff]   ;;  %v7818_v21 = vld [vmem:[#allocation44_spill] sm:$0xff] }
 0x1fb   : > { %2881 = vmatmul.mubr.bf16.gmra.mrb[76].mxu0 %v6346_v13  ;;  %2720 = vmatmul.mubr.bf16.gmra.mrb[76].mxu1 %v7796_v14  ;;  %v1512_v13 = vmul.f32 %v7799_v47, %v7783_v32  ;;  %v7809_v14 = vld [vmem:[#allocation86_spill] sm:$0xff]  ;;  %v7821_v25 = vld [vmem:[#allocation84_spill] sm:$0xff] }
 0x1fc   : > { %3082 = vmatprep.mubr.bf16.mxu0 %v7797_v49  ;;  %2921 = vmatprep.mubr.bf16.mxu1 %v1860_v19  ;;  %v1497_v19 = vpack.c.bf16 %v1468_v36, %v1467_v44  ;;  %v7813_v47 = vld [vmem:[#allocation18_spill] sm:$0xff]  ;;  %v7816_v36 = vld [vmem:[#allocation77_spill] sm:$0xff] }
 0x1fd   : > { %v1543_v58 = vpack.c.bf16 %v1512_v13, %v1511_v39  ;;  %v4921_v39 = vld [vmem:[#allocation5 + $0x210] sm:$0xff]   ;;  %v1513_v13 = vmul.f32 %v7813_v47, %v7793_v42 }
 0x1fe   : > { %v1863_v3 = vrot.slane %v1497_v19, 1  ;;  %v7819_v19 = vld [vmem:[#allocation23_spill] sm:$0xff] }
 0x1ff   : > { %v1544_v44 = vpack.c.bf16 %v1514_v0, %v1513_v13  ;;  %v1515_v47 = vmul.f32 %v7819_v19, %v7801_v63  ;;  %v4923_v13 = vld [vmem:[#allocation5 + $0x220] sm:$0xff]  }
 0x203   : > { %3083 = vmatmul.mubr.bf16.vlgmr.msra.gmra.mrb[80].mxu0 %v1543_v58  ;;  %2922 = vmatmul.mubr.bf16.vlgmr.msra.gmra.mrb[80].mxu1 %v7809_v14  ;;  %v1470_v58 = vmul.f32 %v7815_v20, %v7814_v34  ;;  %v7817_v14 = vld [vmem:[#allocation64_spill] sm:$0xff] }
 0x204   : > { %3090 = vmatprep.mubr.bf16.mxu0 %v7810_v10  ;;  %4658 = vmatpush3.bf16.msra.mxu1 %v7811_v50  ;;  %v1469_v50 = vmul.f32 %v7817_v14, %v7816_v36  ;;  %v7830_v14 = vld [vmem:[#allocation87_spill] sm:$0xff] }
 0x205   : > { %2929 = vmatprep.mubr.bf16.mxu1 %v1862_v22  ;;  %4659 = vmatprep.subr.bf16.mxu1 %v4920_v59  ;;  %v1864_v22 = vsel %vm1776_vm2, %v1861_v43, %v1863_v3 }
 0x206   : > { %v1498_v55 = vpack.c.bf16 %v1470_v58, %v1469_v50  ;;  %v4924_v50 = vld [vmem:[#allocation5 + $0x228] sm:$0xff]  }
 0x208   : > { %4660 = vmatpush3.bf16.msra.mxu1 %v4920_v59  ;;  %v7820_v59 = vld [vmem:[#allocation22_spill] sm:$0xff]  ;;  %v1865_v11 = vrot.slane %v1498_v55, 1  ;;  %v7826_v55 = vld [vmem:[#allocation24_spill] sm:$0xff] }
 0x209   : > { %4661 = vmatprep.subr.bf16.mxu1 %v4921_v39  ;;  %v1516_v0 = vmul.f32 %v7820_v59, %v7803_v52  ;;  %v1518_v59 = vmul.f32 %v7826_v55, %v7814_v34  ;;  %v7832_v55 = vld [vmem:[#allocation105_spill] sm:$0xff] }
 0x20b   : > { %3091 = vmatmul.mubr.bf16.gmra.mrb[84].mxu0 %v1544_v44  ;;  %2930 = vmatmul.mubr.bf16.gmra.mrb[84].mxu1 %v7797_v49  ;;  %v7822_v44 = vld [vmem:[#allocation98_spill] sm:$0xff]  ;;  %v7823_v49 = vld [vmem:[#allocation81_spill] sm:$0xff]  ;;  %v1545_v58 = vpack.c.bf16 %v1516_v0, %v1515_v47 }
 0x20c   : > { %3098 = vmatprep.mubr.bf16.mxu0 %v7818_v21  ;;  %2937 = vmatprep.mubr.bf16.mxu1 %v1864_v22  ;;  %v1471_v17 = vmul.f32 %v7822_v44, %v7821_v25  ;;  %v1472_v43 = vmul.f32 %v7824_v40, %v7823_v49  ;;  %v1866_v22 = vsel %vm1776_vm2, %v1863_v3, %v1865_v11  ;;  %v4925_v44 = vld [vmem:[#allocation5 + $0x230] sm:$0xff]   ;;  %v7827_v47 = vld [vmem:[#allocation25_spill] sm:$0xff]  ;;  %v7831_v3 = vld [vmem:[#allocation99_spill] sm:$0xff] }
 0x20d   : > { %4662 = vmatpush3.bf16.msra.mxu1 %v4921_v39  ;;  %v7825_v39 = vld [vmem:[#allocation53_spill] sm:$0xff] }
 0x20e   : > { %4663 = vmatprep.subr.bf16.mxu1 %v4922_v48  ;;  %v1499_v19 = vpack.c.bf16 %v1472_v43, %v1471_v17  ;;  %v7828_v40 = vld [vmem:[#allocation93_spill] sm:$0xff]  ;;  %v1473_v17 = vmul.f32 %v7831_v3, %v7830_v14  ;;  %v7836_v3 = vld [vmem:[#allocation54_spill] sm:$0xff] }
 0x20f   : > { %v4926_v43 = vld [vmem:[#allocation5 + $0x238] sm:$0xff]  }
 0x210   : > { %v1867_v0 = vrot.slane %v1499_v19, 1  ;;  %v7833_v19 = vld [vmem:[#allocation27_spill] sm:$0xff] }
 0x211   : > { %4664 = vmatpush3.bf16.msra.mxu1 %v4922_v48  ;;  %v1517_v48 = vmul.f32 %v7827_v47, %v7816_v36  ;;  %v1519_v47 = vmul.f32 %v7833_v19, %v7821_v25  ;;  %v7841_v19 = vld [vmem:[#allocation29_spill] sm:$0xff] }
 0x212   : > { %4665 = vmatprep.subr.bf16.mxu1 %v4923_v13 }
 0x213   : > { %3099 = vmatmul.mubr.bf16.gmra.mrb[88].mxu0 %v1545_v58  ;;  %2938 = vmatmul.mubr.bf16.gmra.mrb[88].mxu1 %v7810_v10  ;;  %v7829_v58 = vld [vmem:[#allocation100_spill] sm:$0xff]  ;;  %v1546_v10 = vpack.c.bf16 %v1518_v59, %v1517_v48  ;;  %v7834_v59 = vld [vmem:[#allocation26_spill] sm:$0xff] }
 0x214   : > { %3106 = vmatprep.mubr.bf16.mxu0 %v7825_v39  ;;  %2945 = vmatprep.mubr.bf16.mxu1 %v1866_v22  ;;  %v1474_v20 = vmul.f32 %v7829_v58, %v7828_v40  ;;  %v1520_v48 = vmul.f32 %v7834_v59, %v7823_v49  ;;  %v7835_v58 = vld [vmem:[#allocation94_spill] sm:$0xff]  ;;  %v1521_v59 = vmul.f32 %v7841_v19, %v7830_v14  ;;  %v7842_v49 = vld [vmem:[#allocation89_spill] sm:$0xff] }
 0x215   : > { %4666 = vmatpush3.bf16.msra.mxu1 %v4923_v13  ;;  %v1868_v13 = vsel %vm1776_vm2, %v1865_v11, %v1867_v0  ;;  %v7850_v14 = vld [vmem:[#allocation102_spill] sm:$0xff] }
 0x216   : > { %4667 = vmatprep.subr.bf16.mxu1 %v4924_v50  ;;  %v1500_v22 = vpack.c.bf16 %v1474_v20, %v1473_v17  ;;  %v1547_v11 = vpack.c.bf16 %v1520_v48, %v1519_v47  ;;  %v7844_v48 = vld [vmem:[#allocation62_spill] sm:$0xff] }
 0x219   : > { %4668 = vmatpush3.bf16.msra.mxu1 %v4924_v50  ;;  %v1869_v50 = vrot.slane %v1500_v22, 1 }
 0x21a   : > { %4669 = vmatprep.subr.bf16.mxu1 %v4925_v44 }
 0x21b   : > { %3107 = vmatmul.mubr.bf16.gmra.mrb[92].mxu0 %v1546_v10  ;;  %2946 = vmatmul.mubr.bf16.gmra.mrb[92].mxu1 %v7818_v21  ;;  %v1475_v10 = vmul.f32 %v7836_v3, %v7835_v58  ;;  %v7838_v21 = vld [vmem:[#allocation72_spill] sm:$0xff]  ;;  %v1870_v20 = vsel %vm1776_vm2, %v1867_v0, %v1869_v50 }
 0x21c   : > { %3114 = vmatprep.mubr.bf16.mxu0 %v7832_v55  ;;  %2953 = vmatprep.mubr.bf16.mxu1 %v1868_v13  ;;  %v1476_v36 = vmul.f32 %v7838_v21, %v7837_v8  ;;  %v7839_v13 = vld [vmem:[#allocation109_spill] sm:$0xff]  ;;  %v7843_v21 = vld [vmem:[#allocation71_spill] sm:$0xff] }
 0x21d   : > { %4670 = vmatpush3.bf16.msra.mxu1 %v4925_v44  ;;  %v7840_v44 = vld [vmem:[#allocation28_spill] sm:$0xff]  ;;  %v1477_v47 = vmul.f32 %v7843_v21, %v7842_v49 }
 0x21e   : > { %4671 = vmatprep.subr.bf16.mxu1 %v4926_v43  ;;  %v1501_v17 = vpack.c.bf16 %v1476_v36, %v1475_v10  ;;  %v1522_v22 = vmul.f32 %v7840_v44, %v7828_v40  ;;  %v7846_v10 = vld [vmem:[#allocation66_spill] sm:$0xff]  ;;  %v7852_v40 = vld [vmem:[#allocation103_spill] sm:$0xff] }
 0x220   : > { %v1871_v3 = vrot.slane %v1501_v17, 1  ;;  %v7848_v17 = vld [vmem:[#allocation30_spill] sm:$0xff] }
 0x221   : > { %4672 = vmatpush3.bf16.msra.mxu1 %v4926_v43  ;;  %v1548_v43 = vpack.c.bf16 %v1522_v22, %v1521_v59  ;;  %v1524_v19 = vmul.f32 %v7848_v17, %v7837_v8  ;;  %v7849_v59 = vld [vmem:[#allocation63_spill] sm:$0xff]  ;;  %v7856_v17 = vld [vmem:[#allocation106_spill] sm:$0xff]  ;;  %v7858_v8 = vld [vmem:[#allocation76_spill] sm:$0xff] }
 0x222   : > { %v1872_v36 = vsel %vm1776_vm2, %v1869_v50, %v1871_v3 }
 0x223   : > { %3115 = vmatmul.mubr.bf16.gmra.mrb[96].mxu0 %v1547_v11  ;;  %2954 = vmatmul.mubr.bf16.gmra.mrb[96].mxu1 %v7825_v39  ;;  %v7845_v11 = vld [vmem:[#allocation101_spill] sm:$0xff] }
 0x224   : > { %3122 = vmatprep.mubr.bf16.mxu0 %v7839_v13  ;;  %2961 = vmatprep.mubr.bf16.mxu1 %v1870_v20  ;;  %v1478_v39 = vmul.f32 %v7845_v11, %v7844_v48  ;;  %v7847_v20 = vld [vmem:[#allocation31_spill] sm:$0xff]  ;;  %v1479_v11 = vmul.f32 %v7850_v14, %v7849_v59 }
 0x225   : > { %v1523_v44 = vmul.f32 %v7847_v20, %v7835_v58 }
 0x226   : > { %v1502_v0 = vpack.c.bf16 %v1478_v39, %v1477_v47  ;;  %v7853_v47 = vld [vmem:[#allocation68_spill] sm:$0xff]  ;;  %v7854_v39 = vld [vmem:[#allocation33_spill] sm:$0xff] }
 0x227   : > { %v1549_v22 = vpack.c.bf16 %v1524_v19, %v1523_v44  ;;  %v1482_v19 = vmul.f32 %v7856_v17, %v7749_v53 }
 0x228   : > { %v1873_v21 = vrot.slane %v1502_v0, 1  ;;  %v7855_v0 = vld [vmem:[#allocation32_spill] sm:$0xff] }
 0x229   : > { %v1526_v44 = vmul.f32 %v7855_v0, %v7844_v48 }
 0x22a   : > { %v1874_v50 = vsel %vm1776_vm2, %v1871_v3, %v1873_v21 }
 0x22b   : > { %3123 = vmatmul.mubr.bf16.gmra.mrb[100].mxu0 %v1548_v43  ;;  %2962 = vmatmul.mubr.bf16.gmra.mrb[100].mxu1 %v7832_v55  ;;  %v7851_v43 = vld [vmem:[#allocation57_spill] sm:$0xff] }
 0x22c   : > { %3130 = vmatprep.mubr.bf16.mxu0 %v7846_v10  ;;  %2969 = vmatprep.mubr.bf16.mxu1 %v1872_v36  ;;  %v1480_v55 = vmul.f32 %v7852_v40, %v7851_v43  ;;  %v1525_v36 = vmul.f32 %v7854_v39, %v7842_v49  ;;  %v7860_v39 = vld [vmem:[#allocation34_spill] sm:$0xff] }
 0x22d   : > { %v1528_v0 = vmul.f32 %v7860_v39, %v7851_v43 }
 0x22e   : > { %v1503_v20 = vpack.c.bf16 %v1480_v55, %v1479_v11  ;;  %v1550_v14 = vpack.c.bf16 %v1526_v44, %v1525_v36  ;;  %v7859_v11 = vld [vmem:[#allocation35_spill] sm:$0xff] }
 0x22f   : > { %v1527_v55 = vmul.f32 %v7859_v11, %v7849_v59 }
 0x230   : > { %v1875_v40 = vrot.slane %v1503_v20, 1  ;;  %v7861_v20 = vld [vmem:[#allocation107_spill] sm:$0xff] }
 0x231   : > { %v1483_v44 = vmul.f32 %v7861_v20, %v7758_v23  ;;  %v1486_v20 = vmul.f32 %v6362_v62, %v7766_v18 }
 0x232   : > { %v1876_v3 = vsel %vm1776_vm2, %v1873_v21, %v1875_v40 }
 0x233   : > { %3131 = vmatmul.mubr.bf16.gmra.mrb[104].mxu0 %v1549_v22  ;;  %2970 = vmatmul.mubr.bf16.gmra.mrb[104].mxu1 %v7839_v13  ;;  %v7857_v22 = vld [vmem:[#allocation104_spill] sm:$0xff] }
 0x234   : > { %3138 = vmatprep.mubr.bf16.mxu0 %v7853_v47  ;;  %2977 = vmatprep.mubr.bf16.mxu1 %v1874_v50  ;;  %v1481_v13 = vmul.f32 %v7857_v22, %v7748_v30 }
 0x236   : > { %v1504_v50 = vpack.c.bf16 %v1482_v19, %v1481_v13  ;;  %v7863_v13 = vld [vmem:[#allocation36_spill] sm:$0xff] }
 0x238   : > { %v1877_v36 = vrot.slane %v1504_v50, 1  ;;  %v7864_v50 = vld [vmem:[#allocation37_spill] sm:$0xff] }
 0x239   : > { %v1529_v11 = vmul.f32 %v7864_v50, %v7748_v30 }
 0x23a   : > { %v1878_v21 = vsel %vm1776_vm2, %v1875_v40, %v1877_v36 }
 0x23b   : > { %3139 = vmatmul.mubr.bf16.gmra.mrb[108].mxu0 %v1550_v14  ;;  %2978 = vmatmul.mubr.bf16.gmra.mrb[108].mxu1 %v7846_v10  ;;  %v7862_v14 = vld [vmem:[#allocation110_spill] sm:$0xff]  ;;  %v1551_v10 = vpack.c.bf16 %v1528_v0, %v1527_v55  ;;  %v7865_v0 = vld [vmem:[#allocation39_spill] sm:$0xff] }
 0x23c   : > { %3146 = vmatprep.mubr.bf16.mxu0 %v7858_v8  ;;  %2985 = vmatprep.mubr.bf16.mxu1 %v1876_v3  ;;  %v1484_v17 = vmul.f32 %v7862_v14, %v7759_v16  ;;  %v1530_v3 = vmul.f32 %v7863_v13, %v7749_v53 }
 0x23e   : > { %v1505_v19 = vpack.c.bf16 %v1484_v17, %v1483_v44  ;;  %v1552_v55 = vpack.c.bf16 %v1530_v3, %v1529_v11  ;;  %v1531_v44 = vmul.f32 %v7865_v0, %v7758_v23 }
 0x240   : > { %v1879_v39 = vrot.slane %v1505_v19, 1 }
 0x242   : > { %v1880_v40 = vsel %vm1776_vm2, %v1877_v36, %v1879_v39  ;;  %v6683_v36 = vld [vmem:[%s7408_s5] ss:$0 sm:$0xff] }
 0x243   : > { %3147 = vmatmul.mubr.bf16.gmra.mrb[112].mxu0 %v1551_v10  ;;  %2986 = vmatmul.mubr.bf16.gmra.mrb[112].mxu1 %v7853_v47  ;;  %v1485_v47 = vmul.f32 %v6358_v45, %v7765_v26  ;;  %v7866_v10 = vld [vmem:[#allocation38_spill] sm:$0xff] }
 0x244   : > { %3154 = vmatprep.mubr.bf16.mxu0 %v6386_v38  ;;  %2993 = vmatprep.mubr.bf16.mxu1 %v1878_v21  ;;  %v1532_v21 = vmul.f32 %v7866_v10, %v7759_v16 }
 0x245   : > { %v1506_v17 = vpack.c.bf16 %v1486_v20, %v1485_v47 }
 0x246   : > { %v1553_v50 = vpack.c.bf16 %v1532_v21, %v1531_v44  ;;  %v1534_v21 = vmul.f32 %v7764_v7, %v7766_v18 }
 0x247   : > { %v1881_v19 = vrot.slane %v1506_v17, 1 }
 0x249   : > { %v1882_v47 = vsel %vm1776_vm2, %v1879_v39, %v1881_v19 }
 0x24b   : > { %3155 = vmatmul.mubr.bf16.gmra.mrb[116].mxu0 %v1552_v55  ;;  %2994 = vmatmul.mubr.bf16.gmra.mrb[116].mxu1 %v7858_v8 }
 0x24c   : > { %3162 = vmatprep.mubr.bf16.mxu0 %v6406_v31  ;;  %3001 = vmatprep.mubr.bf16.mxu1 %v1880_v40 }
 0x24d   : > { %v4241_v62 = vpop.f32.mrb[16].mxu0 }
 0x24e   : > { %v4242_v13 = vpop.f32.mrb[17].mxu0 }
 0x24f   : > { %v4243_v3 = vadd.f32 %v4242_v13, %v4241_v62  ;;  %v4244_v45 = vpop.f32.mrb[18].mxu0  ;;  %v1533_v13 = vmul.f32 %v7763_v54, %v7765_v26 }
 0x250   : > { %v4245_v8 = vpop.f32.mrb[19].mxu0 }
 0x251   : > { %v4246_v55 = vadd.f32 %v4245_v8, %v4244_v45  ;;  %v1554_v39 = vpack.c.bf16 %v1534_v21, %v1533_v13 }
 0x252   : > { %v4129_v11 = vpop.f32.mrb[16].mxu1 }
 0x253   : > { %v4130_v20 = vpop.f32.mrb[17].mxu1  ;;  %3163 = vmatmul.mubr.bf16.gmra.mrb[120].mxu0 %v1553_v50  ;;  %3002 = vmatmul.mubr.bf16.gmra.mrb[120].mxu1 %v6386_v38  ;;  %v1884_v50 = vsel %vm1776_vm2, %v1881_v19, %v6457_v15  ;;  %v7867_v15 = vpack.c.bf16 %v6423_v29, %v6419_v5 }
 0x254   : > { %v4131_v40 = vadd.f32 %v4130_v20, %v4129_v11  ;;  %v4132_v17 = vpop.f32.mrb[18].mxu1  ;;  %3170 = vmatprep.mubr.bf16.mxu0 %v6438_v6  ;;  %3009 = vmatprep.mubr.bf16.mxu1 %v1882_v47 }
 0x255   : > { %v4133_v0 = vpop.f32.mrb[19].mxu1 }
 0x256   : > { %v2602_v44 = vadd.f32 %v4131_v40, %v6683_v36  ;;  %v4134_v10 = vadd.f32 %v4133_v0, %v4132_v17 }
 0x258   : > { %v2605_v62 = vadd.f32 %v4134_v10, %v6683_v36  ;;  %v6694_v38 = vadd.f32 %v4243_v3, %v2602_v44  ;;  %v4927_v10 = vld [vmem:[#allocation7] sm:$0xff]  }
 0x259   : > { %4705 = vmatprep.subr.bf16.mxu0 %v4927_v10 }
 0x25a   : > { %v6696_v45 = vadd.f32 %v4246_v55, %v2605_v62  ;;  %4706 = vmatpush3.bf16.msra.mxu0 %v4927_v10 }
 0x25b   : > { %3171 = vmatmul.mubr.bf16.gmra.mrb[124].mxu0 %v1554_v39  ;;  %3010 = vmatmul.mubr.bf16.gmra.mrb[124].mxu1 %v6406_v31 }
 0x25c   : > { %3178 = vmatprep.mubr.bf16.mxu0 %v6299_v24  ;;  %3017 = vmatprep.mubr.bf16.mxu1 %v1884_v50 }
 0x25d   : > { %v4247_v7 = vpop.f32.mrb[20].mxu0 }
 0x25e   : > { %v4135_v11 = vpop.f32.mrb[20].mxu1  ;;  %v4248_v8 = vpop.f32.mrb[21].mxu0 }
 0x25f   : > { %v4136_v20 = vpop.f32.mrb[21].mxu1  ;;  %v4249_v47 = vadd.f32 %v4248_v8, %v4247_v7  ;;  %v4250_v3 = vpop.f32.mrb[22].mxu0 }
 0x260   : > { %v4137_v54 = vadd.f32 %v4136_v20, %v4135_v11  ;;  %v4138_v40 = vpop.f32.mrb[22].mxu1  ;;  %v4251_v17 = vpop.f32.mrb[23].mxu0 }
 0x261   : > { %v4139_v55 = vpop.f32.mrb[23].mxu1  ;;  %v4252_v44 = vadd.f32 %v4251_v17, %v4250_v3 }
 0x262   : > { %v2610_v0 = vadd.f32 %v4137_v54, %v6683_v36  ;;  %v4140_v31 = vadd.f32 %v4139_v55, %v4138_v40  ;;  %v1912_v40 = vshrl.u32 %v6449_v12, 16  ;;  %v7869_v55 = vld [vmem:[#allocation40_spill] sm:$0xff] }
 0x263   : > { %3179 = vmatmul.mubr.bf16.gmra.mrb[128].mxu0 %v7867_v15  ;;  %3018 = vmatmul.mubr.bf16.gmra.mrb[128].mxu1 %v6438_v6 }
 0x264   : > { %v2613_v19 = vadd.f32 %v4140_v31, %v6683_v36  ;;  %3186 = vmatprep.mubr.bf16.mxu0 %v6466_v46  ;;  %3025 = vmatprep.mubr.bf16.mxu1 %v6482_v2  ;;  %v6710_v21 = vadd.f32 %v4249_v47, %v2610_v0  ;;  %v7868_v47 = vpack.c.bf16 %v6446_v37, %v6442_v61  ;;  %v7870_v61 = vld [vmem:[#allocation41_spill] sm:$0xff] }
 0x265   : > { %v1914_v37 = vor.u32 %v1912_v40, %v7870_v61 }
 0x266   : > { %v4253_v62 = vpop.f32.mrb[24].mxu0  ;;  %v4141_v13 = vpop.f32.mrb[24].mxu1  ;;  %v6712_v39 = vadd.f32 %v4252_v44, %v2613_v19 }
 0x267   : > { %v4254_v50 = vpop.f32.mrb[25].mxu0  ;;  %v4142_v7 = vpop.f32.mrb[25].mxu1 }
 0x268   : > { %v4255_v5 = vadd.f32 %v4254_v50, %v4253_v62  ;;  %v4143_v29 = vadd.f32 %v4142_v7, %v4141_v13  ;;  %v4256_v11 = vpop.f32.mrb[26].mxu0  ;;  %v4144_v6 = vpop.f32.mrb[26].mxu1 }
 0x269   : > { %v4257_v8 = vpop.f32.mrb[27].mxu0  ;;  %v4145_v20 = vpop.f32.mrb[27].mxu1 }
 0x26a   : > { %v2618_v54 = vadd.f32 %v4143_v29, %v6683_v36  ;;  %v4258_v3 = vadd.f32 %v4257_v8, %v4256_v11  ;;  %v4146_v2 = vadd.f32 %v4145_v20, %v4144_v6  ;;  %v1562_v11 = vmul.f32 %v7782_v56, %v7793_v42  ;;  %v7875_v42 = vld [vmem:[#allocation91_spill] sm:$0xff] }
 0x26b   : > { %3187 = vmatmul.mubr.bf16.gmra.mrb[132].mxu0 %v7868_v47  ;;  %3026 = vmatmul.mubr.bf16.gmra.mrb[132].mxu1 %v6299_v24  ;;  %v1563_v24 = vmul.f32 %v7784_v41, %v7791_v51  ;;  %v4928_v41 = vld [vmem:[#allocation7 + $0x8] sm:$0xff]   ;;  %v7871_v51 = vld [vmem:[#allocation70_spill] sm:$0xff] }
 0x26c   : > { %v2621_v17 = vadd.f32 %v4146_v2, %v6683_v36  ;;  %3194 = vmatprep.mubr.bf16.mxu0 %v7869_v55  ;;  %3033 = vmatprep.mubr.bf16.mxu1 %v6497_v35  ;;  %v6723_v0 = vadd.f32 %v4255_v5, %v2618_v54  ;;  %v1560_v35 = vmul.f32 %v7786_v28, %v7781_v57 }
 0x26d   : > { %v1561_v5 = vmul.f32 %v7780_v27, %v7783_v32  ;;  %v7872_v54 = vpack.c.bf16 %v6476_v60, %v7871_v51  ;;  %v1594_v28 = vpack.c.bf16 %v1563_v24, %v1562_v11  ;;  %v7874_v32 = vld [vmem:[#allocation78_spill] sm:$0xff]  ;;  %v1541_v2 = vmul.f32 %v7875_v42, %v5913_v9  ;;  %4707 = vmatprep.subr.bf16.mxu0 %v4928_v41 }
 0x26e   : > { %v4259_v44 = vpop.f32.mrb[28].mxu0  ;;  %v4147_v31 = vpop.f32.mrb[28].mxu1  ;;  %v6725_v10 = vadd.f32 %v4258_v3, %v2621_v17  ;;  %v7873_v3 = vld [vmem:[#allocation48_spill] sm:$0xff]  ;;  %v1565_v17 = vmul.f32 %v7792_v33, %v7803_v52  ;;  %4708 = vmatpush3.bf16.msra.mxu0 %v4928_v41  ;;  %v1567_v9 = vmul.f32 %v7804_v4, %v7814_v34  ;;  %v7877_v33 = vld [vmem:[#allocation77_spill] sm:$0xff]  ;;  %v7878_v52 = vld [vmem:[#allocation55_spill] sm:$0xff] }
 0x26f   : > { %v4260_v15 = vpop.f32.mrb[29].mxu0  ;;  %v4148_v19 = vpop.f32.mrb[29].mxu1  ;;  %v1915_v57 = vsel %vm1610_vm3, %v1914_v37, %v7873_v3  ;;  %v1593_v47 = vpack.c.bf16 %v1561_v5, %v1560_v35  ;;  %v1936_v61 = vrot.slane %v1594_v28, 1  ;;  %v7880_v41 = vld [vmem:[#allocation64_spill] sm:$0xff] }
 0x270   : > { %v4261_v12 = vadd.f32 %v4260_v15, %v4259_v44  ;;  %v4149_v62 = vadd.f32 %v4148_v19, %v4147_v31  ;;  %v4262_v13 = vpop.f32.mrb[30].mxu0  ;;  %v4150_v50 = vpop.f32.mrb[30].mxu1  ;;  %v7876_v44 = vld [vmem:[#allocation90_spill] sm:$0xff]  ;;  %v1568_v51 = vmul.f32 %v7880_v41, %v7821_v25  ;;  %v7882_v3 = vld [vmem:[#allocation92_spill] sm:$0xff] }
 0x271   : > { %v4263_v7 = vpop.f32.mrb[31].mxu0  ;;  %v4151_v29 = vpop.f32.mrb[31].mxu1  ;;  %v1542_v31 = vmul.f32 0.0, %v7876_v44 }
 0x272   : > { %v2626_v6 = vadd.f32 %v4149_v62, %v6683_v36  ;;  %v4264_v8 = vadd.f32 %v4263_v7, %v4262_v13  ;;  %v4152_v20 = vadd.f32 %v4151_v29, %v4150_v50  ;;  %v1935_v50 = vrot.slane %v1593_v47, 1 }
 0x273   : > { %3195 = vmatmul.mubr.bf16.gmra.mrb[136].mxu0 %v7872_v54  ;;  %3034 = vmatmul.mubr.bf16.gmra.mrb[136].mxu1 %v6466_v46  ;;  %v1564_v46 = vmul.f32 %v7794_v1, %v7801_v63  ;;  %v1558_v63 = vpack.c.bf16 %v1542_v31, %v1541_v2  ;;  %v1566_v7 = vmul.f32 %v7878_v52, %v7877_v33  ;;  %v7881_v54 = vld [vmem:[#allocation81_spill] sm:$0xff]  ;;  %v4929_v33 = vld [vmem:[#allocation7 + $0x10] sm:$0xff]  }
 0x274   : > { %v2629_v27 = vadd.f32 %v4152_v20, %v6683_v36  ;;  %3202 = vmatprep.mubr.bf16.mxu0 %v1915_v57  ;;  %3041 = vmatprep.mubr.bf16.mxu1 %v7874_v32  ;;  %v6745_v56 = vadd.f32 %v4261_v12, %v2626_v6  ;;  %v7879_v6 = vld [vmem:[#allocation85_spill] sm:$0xff]  ;;  %v1937_v4 = vsel %vm1776_vm2, %v1935_v50, %v1936_v61 }
 0x275   : > { %v1595_v11 = vpack.c.bf16 %v1565_v17, %v1564_v46  ;;  %v1596_v34 = vpack.c.bf16 %v1567_v9, %v1566_v7  ;;  %v1569_v57 = vmul.f32 %v7882_v3, %v7881_v54  ;;  %v7884_v46 = vld [vmem:[#allocation97_spill] sm:$0xff]  ;;  %4709 = vmatprep.subr.bf16.mxu0 %v4929_v33 }
 0x276   : > { %v4265_v60 = vpop.f32.mrb[32].mxu0  ;;  %v4153_v40 = vpop.f32.mrb[32].mxu1  ;;  %v6753_v55 = vadd.f32 %v4264_v8, %v2629_v27  ;;  %4710 = vmatpush3.bf16.msra.mxu0 %v4929_v33 }
 0x277   : > { %v4266_v15 = vpop.f32.mrb[33].mxu0  ;;  %v4154_v19 = vpop.f32.mrb[33].mxu1  ;;  %v1938_v32 = vrot.slane %v1595_v11, 1 }
 0x278   : > { %v4267_v37 = vadd.f32 %v4266_v15, %v4265_v60  ;;  %v4155_v24 = vadd.f32 %v4154_v19, %v4153_v40  ;;  %v4268_v12 = vpop.f32.mrb[34].mxu0  ;;  %v4156_v62 = vpop.f32.mrb[34].mxu1  ;;  %v1940_v60 = vrot.slane %v1596_v34, 1  ;;  %v7883_v40 = vld [vmem:[#allocation93_spill] sm:$0xff] }
 0x279   : > { %v4269_v13 = vpop.f32.mrb[35].mxu0  ;;  %v4157_v1 = vpop.f32.mrb[35].mxu1  ;;  %v1571_v17 = vmul.f32 %v7884_v46, %v7883_v40  ;;  %v1939_v50 = vsel %vm1776_vm2, %v1936_v61, %v1938_v32 }
 0x27a   : > { %v2634_v29 = vadd.f32 %v4155_v24, %v6683_v36  ;;  %v4270_v35 = vadd.f32 %v4269_v13, %v4268_v12  ;;  %v4158_v5 = vadd.f32 %v4157_v1, %v4156_v62  ;;  %v7885_v24 = vld [vmem:[#allocation87_spill] sm:$0xff]  ;;  %v7886_v12 = vld [vmem:[#allocation98_spill] sm:$0xff]  ;;  %v1941_v52 = vsel %vm1776_vm2, %v1938_v32, %v1940_v60 }
 0x27b   : > { %3203 = vmatmul.mubr.bf16.gmra.mrb[140].mxu0 %v1558_v63  ;;  %3042 = vmatmul.mubr.bf16.gmra.mrb[140].mxu1 %v7879_v6  ;;  %v1570_v62 = vmul.f32 %v7886_v12, %v7885_v24  ;;  %v7888_v6 = vld [vmem:[#allocation88_spill] sm:$0xff] }
 0x27c   : > { %v2637_v8 = vadd.f32 %v4158_v5, %v6683_v36  ;;  %4673 = vmatprep.mubr.bf16.mxu1 %v1937_v4  ;;  %v6764_v20 = vadd.f32 %v4267_v37, %v2634_v29  ;;  %v1597_v37 = vpack.c.bf16 %v1569_v57, %v1568_v51  ;;  %v7887_v5 = vld [vmem:[#allocation99_spill] sm:$0xff]  ;;  %v7889_v4 = vld [vmem:[#allocation100_spill] sm:$0xff] }
 0x27d   : > { %v1598_v7 = vpack.c.bf16 %v1571_v17, %v1570_v62  ;;  %v1572_v11 = vmul.f32 %v7887_v5, %v7835_v58  ;;  %v1573_v34 = vmul.f32 %v7889_v4, %v7888_v6  ;;  %v7893_v6 = vld [vmem:[#allocation71_spill] sm:$0xff] }
 0x27e   : > { %v4271_v28 = vpop.f32.mrb[36].mxu0  ;;  %v4159_v27 = vpop.f32.mrb[36].mxu1  ;;  %v6770_v42 = vadd.f32 %v4270_v35, %v2637_v8  ;;  %v1942_v41 = vrot.slane %v1597_v37, 1  ;;  %v1576_v4 = vmul.f32 %v7893_v6, %v7849_v59 }
 0x27f   : > { %v4272_v2 = vpop.f32.mrb[37].mxu0  ;;  %v4160_v47 = vpop.f32.mrb[37].mxu1  ;;  %v1944_v57 = vrot.slane %v1598_v7, 1  ;;  %v1599_v17 = vpack.c.bf16 %v1573_v34, %v1572_v11  ;;  %v7894_v34 = vld [vmem:[#allocation101_spill] sm:$0xff] }
 0x280   : > { %v4273_v44 = vadd.f32 %v4272_v2, %v4271_v28  ;;  %v4161_v31 = vadd.f32 %v4160_v47, %v4159_v27  ;;  %v4274_v15 = vpop.f32.mrb[38].mxu0  ;;  %v4162_v19 = vpop.f32.mrb[38].mxu1  ;;  %v7890_v28 = vld [vmem:[#allocation54_spill] sm:$0xff] }
 0x281   : > { %v4275_v9 = vpop.f32.mrb[39].mxu0  ;;  %v4163_v25 = vpop.f32.mrb[39].mxu1  ;;  %v1574_v27 = vmul.f32 %v7890_v28, %v7842_v49  ;;  %v1945_v37 = vsel %vm1776_vm2, %v1942_v41, %v1944_v57 }
 0x282   : > { %v2642_v13 = vadd.f32 %v4161_v31, %v6683_v36  ;;  %v4276_v1 = vadd.f32 %v4275_v9, %v4274_v15  ;;  %v4164_v63 = vadd.f32 %v4163_v25, %v4162_v19  ;;  %v1943_v25 = vsel %vm1776_vm2, %v1940_v60, %v1942_v41 }
 0x283   : > { %4674 = vmatmul.mubr.bf16.vlgmr.msra.gmra.mrb[144].mxu1 %v1939_v50 }
 0x284   : > { %v2645_v29 = vadd.f32 %v4164_v63, %v6683_v36  ;;  %4677 = vmatprep.mubr.bf16.mxu1 %v1941_v52  ;;  %v6780_v35 = vadd.f32 %v4273_v44, %v2642_v13  ;;  %v7891_v44 = vld [vmem:[#allocation72_spill] sm:$0xff]  ;;  %v7892_v52 = vld [vmem:[#allocation103_spill] sm:$0xff] }
 0x285   : > { %v1575_v31 = vmul.f32 %v7891_v44, %v7844_v48  ;;  %v1579_v60 = vmul.f32 %v7892_v52, %v7749_v53 }
 0x286   : > { %v4277_v8 = vpop.f32.mrb[40].mxu0  ;;  %v4165_v61 = vpop.f32.mrb[40].mxu1  ;;  %v6786_v51 = vadd.f32 %v4276_v1, %v2645_v29  ;;  %v1946_v1 = vrot.slane %v1599_v17, 1 }
 0x287   : > { %v4278_v54 = vpop.f32.mrb[41].mxu0  ;;  %v4166_v3 = vpop.f32.mrb[41].mxu1  ;;  %v1600_v49 = vpack.c.bf16 %v1575_v31, %v1574_v27 }
 0x288   : > { %v4279_v32 = vadd.f32 %v4278_v54, %v4277_v8  ;;  %v4167_v2 = vadd.f32 %v4166_v3, %v4165_v61  ;;  %v4280_v47 = vpop.f32.mrb[42].mxu0  ;;  %v4168_v40 = vpop.f32.mrb[42].mxu1  ;;  %v1577_v8 = vmul.f32 %v7894_v34, %v7851_v43  ;;  %v7895_v54 = vld [vmem:[#allocation102_spill] sm:$0xff]  ;;  %v1947_v53 = vsel %vm1776_vm2, %v1944_v57, %v1946_v1 }
 0x289   : > { %v4281_v58 = vpop.f32.mrb[43].mxu0  ;;  %v4169_v46 = vpop.f32.mrb[43].mxu1  ;;  %v1948_v33 = vrot.slane %v1600_v49, 1  ;;  %v1578_v3 = vmul.f32 %v7895_v54, %v7748_v30  ;;  %v1580_v30 = vmul.f32 %v7857_v22, %v7758_v23 }
 0x28a   : > { %v2650_v15 = vadd.f32 %v4167_v2, %v6683_v36  ;;  %v4282_v19 = vadd.f32 %v4281_v58, %v4280_v47  ;;  %v4170_v9 = vadd.f32 %v4169_v46, %v4168_v40  ;;  %v4930_v2 = vld [vmem:[#allocation7 + $0x18] sm:$0xff]   ;;  %v1601_v43 = vpack.c.bf16 %v1577_v8, %v1576_v4  ;;  %v7896_v46 = vld [vmem:[#allocation106_spill] sm:$0xff] }
 0x28b   : > { %4678 = vmatmul.mubr.bf16.gmra.mrb[148].mxu1 %v1943_v25  ;;  %v1949_v47 = vsel %vm1776_vm2, %v1946_v1, %v1948_v33  ;;  %v1602_v40 = vpack.c.bf16 %v1579_v60, %v1578_v3  ;;  %4711 = vmatprep.subr.bf16.mxu0 %v4930_v2  ;;  %v1581_v17 = vmul.f32 %v7896_v46, %v7759_v16  ;;  %v7897_v16 = vld [vmem:[#allocation107_spill] sm:$0xff] }
 0x28c   : > { %v2653_v24 = vadd.f32 %v4170_v9, %v6683_v36  ;;  %4681 = vmatprep.mubr.bf16.mxu1 %v1945_v37  ;;  %v6796_v12 = vadd.f32 %v4279_v32, %v2650_v15  ;;  %4712 = vmatpush3.bf16.msra.mxu0 %v4930_v2  ;;  %v1583_v25 = vmul.f32 %v7862_v14, %v7766_v18 }
 0x28d   : > { %v1952_v9 = vrot.slane %v1602_v40, 1  ;;  %v1603_v1 = vpack.c.bf16 %v1581_v17, %v1580_v30  ;;  %v4931_v40 = vld [vmem:[#allocation7 + $0x20] sm:$0xff]  }
 0x28e   : > { %v4283_v62 = vpop.f32.mrb[44].mxu0  ;;  %v4171_v13 = vpop.f32.mrb[44].mxu1  ;;  %v6798_v63 = vadd.f32 %v4282_v19, %v2653_v24  ;;  %4713 = vmatprep.subr.bf16.mxu0 %v4931_v40 }
 0x28f   : > { %v4284_v48 = vpop.f32.mrb[45].mxu0  ;;  %v4172_v50 = vpop.f32.mrb[45].mxu1  ;;  %v1954_v4 = vrot.slane %v1603_v1, 1 }
 0x290   : > { %v4285_v7 = vadd.f32 %v4284_v48, %v4283_v62  ;;  %v4173_v29 = vadd.f32 %v4172_v50, %v4171_v13  ;;  %v4286_v5 = vpop.f32.mrb[46].mxu0  ;;  %v4174_v11 = vpop.f32.mrb[46].mxu1  ;;  %v1950_v13 = vrot.slane %v1601_v43, 1  ;;  %v1582_v48 = vmul.f32 %v7897_v16, %v7765_v26  ;;  %4714 = vmatpush3.bf16.msra.mxu0 %v4931_v40 }
 0x291   : > { %v4287_v61 = vpop.f32.mrb[47].mxu0  ;;  %v4175_v41 = vpop.f32.mrb[47].mxu1 }
 0x292   : > { %v2658_v28 = vadd.f32 %v4173_v29, %v6683_v36  ;;  %v4288_v27 = vadd.f32 %v4287_v61, %v4286_v5  ;;  %v4176_v32 = vadd.f32 %v4175_v41, %v4174_v11  ;;  %v1953_v18 = vsel %vm1776_vm2, %v1950_v13, %v1952_v9 }
 0x293   : > { %4682 = vmatmul.mubr.bf16.gmra.mrb[152].mxu1 %v1947_v53  ;;  %v1604_v14 = vpack.c.bf16 %v1583_v25, %v1582_v48  ;;  %v7899_v48 = vld [vmem:[#allocation47_spill] sm:$0xff] }
 0x294   : > { %v2661_v59 = vadd.f32 %v4176_v32, %v6683_v36  ;;  %4685 = vmatprep.mubr.bf16.mxu1 %v1949_v47  ;;  %v6812_v58 = vadd.f32 %v4285_v7, %v2658_v28  ;;  %v1951_v7 = vsel %vm1776_vm2, %v1948_v33, %v1950_v13  ;;  %v1955_v47 = vsel %vm1776_vm2, %v1952_v9, %v1954_v4 }
 0x295   : > { %v1956_v61 = vrot.slane %v1604_v14, 1 }
 0x296   : > { %v4289_v57 = vpop.f32.mrb[48].mxu0  ;;  %v4177_v44 = vpop.f32.mrb[48].mxu1  ;;  %v6818_v31 = vadd.f32 %v4288_v27, %v2661_v59 }
 0x297   : > { %v4290_v15 = vpop.f32.mrb[49].mxu0  ;;  %v4178_v19 = vpop.f32.mrb[49].mxu1  ;;  %v1957_v59 = vsel %vm1776_vm2, %v1954_v4, %v1956_v61 }
 0x298   : > { %v4291_v37 = vadd.f32 %v4290_v15, %v4289_v57  ;;  %v4179_v49 = vadd.f32 %v4178_v19, %v4177_v44  ;;  %v4292_v24 = vpop.f32.mrb[50].mxu0  ;;  %v4180_v62 = vpop.f32.mrb[50].mxu1 }
 0x299   : > { %v4293_v23 = vpop.f32.mrb[51].mxu0  ;;  %v4181_v22 = vpop.f32.mrb[51].mxu1 }
 0x29a   : > { %v2666_v50 = vadd.f32 %v4179_v49, %v6683_v36  ;;  %v4294_v52 = vadd.f32 %v4293_v23, %v4292_v24  ;;  %v4182_v60 = vadd.f32 %v4181_v22, %v4180_v62  ;;  %v7898_v22 = vld [vmem:[#allocation46_spill] sm:$0xff] }
 0x29b   : > { %4686 = vmatmul.mubr.bf16.gmra.mrb[156].mxu1 %v1951_v7  ;;  %v1959_v1 = vsel %vm1776_vm2, %v1956_v61, %v7898_v22 }
 0x29c   : > { %v2669_v29 = vadd.f32 %v4182_v60, %v6683_v36  ;;  %4689 = vmatprep.mubr.bf16.mxu1 %v1953_v18  ;;  %v6828_v5 = vadd.f32 %v4291_v37, %v2666_v50 }
 0x29e   : > { %v4295_v11 = vpop.f32.mrb[52].mxu0  ;;  %v4183_v6 = vpop.f32.mrb[52].mxu1  ;;  %v6830_v34 = vadd.f32 %v4294_v52, %v2669_v29 }
 0x29f   : > { %v4296_v26 = vpop.f32.mrb[53].mxu0  ;;  %v4184_v8 = vpop.f32.mrb[53].mxu1 }
 0x2a0   : > { %v4297_v41 = vadd.f32 %v4296_v26, %v4295_v11  ;;  %v4185_v54 = vadd.f32 %v4184_v8, %v4183_v6  ;;  %v4298_v33 = vpop.f32.mrb[54].mxu0  ;;  %v4186_v3 = vpop.f32.mrb[54].mxu1  ;;  %v7900_v26 = vld [vmem:[#allocation108_spill] sm:$0xff] }
 0x2a1   : > { %v4299_v28 = vpop.f32.mrb[55].mxu0  ;;  %v4187_v27 = vpop.f32.mrb[55].mxu1  ;;  %v1592_v8 = vmul.f32 0.0, %v7900_v26 }
 0x2a2   : > { %v2674_v32 = vadd.f32 %v4185_v54, %v6683_v36  ;;  %v4300_v53 = vadd.f32 %v4299_v28, %v4298_v33  ;;  %v4188_v2 = vadd.f32 %v4187_v27, %v4186_v3  ;;  %v4932_v28 = vld [vmem:[#allocation7 + $0x28] sm:$0xff]   ;;  %v7901_v27 = vld [vmem:[#allocation82_spill] sm:$0xff] }
 0x2a3   : > { %4690 = vmatmul.mubr.bf16.gmra.mrb[160].mxu1 %v1955_v47  ;;  %4715 = vmatprep.subr.bf16.mxu0 %v4932_v28 }
 0x2a4   : > { %v2677_v43 = vadd.f32 %v4188_v2, %v6683_v36  ;;  %4693 = vmatprep.mubr.bf16.mxu1 %v1957_v59  ;;  %v6836_v30 = vadd.f32 %v4297_v41, %v2674_v32  ;;  %v1609_v2 = vpack.c.bf16 %v1592_v8, %v1592_v8  ;;  %4716 = vmatpush3.bf16.msra.mxu0 %v4932_v28 }
 0x2a6   : > { %v4301_v46 = vpop.f32.mrb[56].mxu0  ;;  %v4189_v17 = vpop.f32.mrb[56].mxu1  ;;  %v6838_v57 = vadd.f32 %v4300_v53, %v2677_v43  ;;  %v7902_v53 = vld [vmem:[#allocation60_spill] sm:$0xff] }
 0x2a7   : > { %v4302_v44 = vpop.f32.mrb[57].mxu0  ;;  %v4190_v15 = vpop.f32.mrb[57].mxu1 }
 0x2a8   : > { %v4303_v19 = vadd.f32 %v4302_v44, %v4301_v46  ;;  %v4191_v25 = vadd.f32 %v4190_v15, %v4189_v17  ;;  %v4304_v9 = vpop.f32.mrb[58].mxu0  ;;  %v4192_v37 = vpop.f32.mrb[58].mxu1 }
 0x2a9   : > { %v4305_v49 = vpop.f32.mrb[59].mxu0  ;;  %v4193_v24 = vpop.f32.mrb[59].mxu1 }
 0x2aa   : > { %v2682_v62 = vadd.f32 %v4191_v25, %v6683_v36  ;;  %v4306_v13 = vadd.f32 %v4305_v49, %v4304_v9  ;;  %v4194_v23 = vadd.f32 %v4193_v24, %v4192_v37  ;;  %v1966_v9 = vrot.slane %v1609_v2, 1 }
 0x2ab   : > { %4694 = vmatmul.mubr.bf16.gmra.mrb[164].mxu1 %v1959_v1 }
 0x2ac   : > { %v2685_v16 = vadd.f32 %v4194_v23, %v6683_v36  ;;  %4697 = vmatprep.mubr.bf16.mxu1 %v7899_v48  ;;  %v6845_v50 = vadd.f32 %v4303_v19, %v2682_v62  ;;  %v7903_v23 = vld [vmem:[#allocation65_spill] sm:$0xff] }
 0x2ad   : > { %v1967_v22 = vsel %vm1776_vm2, %v7903_v23, %v1966_v9 }
 0x2ae   : > { %v4307_v52 = vpop.f32.mrb[60].mxu0  ;;  %v4195_v60 = vpop.f32.mrb[60].mxu1  ;;  %v6847_v7 = vadd.f32 %v4306_v13, %v2685_v16 }
 0x2af   : > { %v4308_v18 = vpop.f32.mrb[61].mxu0  ;;  %v4196_v14 = vpop.f32.mrb[61].mxu1 }
 0x2b0   : > { %v4309_v29 = vadd.f32 %v4308_v18, %v4307_v52  ;;  %v4197_v11 = vadd.f32 %v4196_v14, %v4195_v60  ;;  %v4310_v6 = vpop.f32.mrb[62].mxu0  ;;  %v4198_v4 = vpop.f32.mrb[62].mxu1 }
 0x2b1   : > { %v4311_v61 = vpop.f32.mrb[63].mxu0  ;;  %v4199_v41 = vpop.f32.mrb[63].mxu1 }
 0x2b2   : > { %v2690_v54 = vadd.f32 %v4197_v11, %v6683_v36  ;;  %v4312_v33 = vadd.f32 %v4311_v61, %v4310_v6  ;;  %v4200_v3 = vadd.f32 %v4199_v41, %v4198_v4 }
 0x2b3   : > { %4698 = vmatmul.mubr.bf16.gmra.mrb[168].mxu1 %v7901_v27 }
 0x2b4   : > { %v2693_v32 = vadd.f32 %v4200_v3, %v6683_v36  ;;  %4701 = vmatprep.mubr.bf16.mxu1 %v7902_v53  ;;  %v6854_v47 = vadd.f32 %v4309_v29, %v2690_v54 }
 0x2b6   : > { %v4313_v40 = vpop.f32.mrb[64].mxu0  ;;  %v4201_v59 = vpop.f32.mrb[64].mxu1  ;;  %v6856_v43 = vadd.f32 %v4312_v33, %v2693_v32  ;;  %v4933_v33 = vld [vmem:[#allocation7 + $0x30] sm:$0xff]  }
 0x2b7   : > { %v4314_v46 = vpop.f32.mrb[65].mxu0  ;;  %v4202_v17 = vpop.f32.mrb[65].mxu1  ;;  %4717 = vmatprep.subr.bf16.mxu0 %v4933_v33 }
 0x2b8   : > { %v4315_v44 = vadd.f32 %v4314_v46, %v4313_v40  ;;  %v4203_v15 = vadd.f32 %v4202_v17, %v4201_v59  ;;  %v4316_v19 = vpop.f32.mrb[66].mxu0  ;;  %v4204_v25 = vpop.f32.mrb[66].mxu1  ;;  %4718 = vmatpush3.bf16.msra.mxu0 %v4933_v33 }
 0x2b9   : > { %v4317_v37 = vpop.f32.mrb[67].mxu0  ;;  %v4205_v49 = vpop.f32.mrb[67].mxu1 }
 0x2ba   : > { %v2698_v24 = vadd.f32 %v4203_v15, %v6683_v36  ;;  %v4318_v62 = vadd.f32 %v4317_v37, %v4316_v19  ;;  %v4206_v13 = vadd.f32 %v4205_v49, %v4204_v25 }
 0x2bb   : > { %4702 = vmatmul.mubr.bf16.gmra.mrb[172].mxu1 %v1967_v22 }
 0x2bc   : > { %v2701_v1 = vadd.f32 %v4206_v13, %v6683_v36  ;;  %v6862_v16 = vadd.f32 %v4315_v44, %v2698_v24 }
 0x2be   : > { %v4319_v48 = vpop.f32.mrb[68].mxu0  ;;  %v4207_v52 = vpop.f32.mrb[68].mxu1  ;;  %v6864_v60 = vadd.f32 %v4318_v62, %v2701_v1 }
 0x2bf   : > { %v4320_v18 = vpop.f32.mrb[69].mxu0  ;;  %v4208_v14 = vpop.f32.mrb[69].mxu1 }
 0x2c0   : > { %v4321_v29 = vadd.f32 %v4320_v18, %v4319_v48  ;;  %v4209_v11 = vadd.f32 %v4208_v14, %v4207_v52  ;;  %v4322_v6 = vpop.f32.mrb[70].mxu0  ;;  %v4210_v4 = vpop.f32.mrb[70].mxu1 }
 0x2c1   : > { %v4323_v26 = vpop.f32.mrb[71].mxu0  ;;  %v4211_v8 = vpop.f32.mrb[71].mxu1 }
 0x2c2   : > { %v2706_v61 = vadd.f32 %v4209_v11, %v6683_v36  ;;  %v4324_v41 = vadd.f32 %v4323_v26, %v4322_v6  ;;  %v4212_v54 = vadd.f32 %v4211_v8, %v4210_v4  ;;  %v4934_v8 = vld [vmem:[#allocation7 + $0x38] sm:$0xff]  }
 0x2c3   : > { %4719 = vmatprep.subr.bf16.mxu0 %v4934_v8 }
 0x2c4   : > { %v2709_v3 = vadd.f32 %v4212_v54, %v6683_v36  ;;  %v6868_v28 = vadd.f32 %v4321_v29, %v2706_v61  ;;  %4720 = vmatpush3.bf16.msra.mxu0 %v4934_v8 }
 0x2c6   : > { %v4325_v27 = vpop.f32.mrb[72].mxu0  ;;  %v4213_v32 = vpop.f32.mrb[72].mxu1  ;;  %v6870_v53 = vadd.f32 %v4324_v41, %v2709_v3 }
 0x2c7   : > { %v4326_v2 = vpop.f32.mrb[73].mxu0  ;;  %v4214_v40 = vpop.f32.mrb[73].mxu1 }
 0x2c8   : > { %v4327_v59 = vadd.f32 %v4326_v2, %v4325_v27  ;;  %v4215_v46 = vadd.f32 %v4214_v40, %v4213_v32  ;;  %v4328_v17 = vpop.f32.mrb[74].mxu0  ;;  %v4216_v44 = vpop.f32.mrb[74].mxu1 }
 0x2c9   : > { %v4329_v15 = vpop.f32.mrb[75].mxu0  ;;  %v4217_v19 = vpop.f32.mrb[75].mxu1 }
 0x2ca   : > { %v2714_v25 = vadd.f32 %v4215_v46, %v6683_v36  ;;  %v4330_v9 = vadd.f32 %v4329_v15, %v4328_v17  ;;  %v4218_v37 = vadd.f32 %v4217_v19, %v4216_v44 }
 0x2cc   : > { %v2717_v49 = vadd.f32 %v4218_v37, %v6683_v36  ;;  %v6874_v24 = vadd.f32 %v4327_v59, %v2714_v25 }
 0x2ce   : > { %v4331_v62 = vpop.f32.mrb[76].mxu0  ;;  %v4219_v13 = vpop.f32.mrb[76].mxu1  ;;  %v6876_v23 = vadd.f32 %v4330_v9, %v2717_v49 }
 0x2cf   : > { %v4332_v22 = vpop.f32.mrb[77].mxu0  ;;  %v4220_v1 = vpop.f32.mrb[77].mxu1 }
 0x2d0   : > { %v4333_v48 = vadd.f32 %v4332_v22, %v4331_v62  ;;  %v4221_v52 = vadd.f32 %v4220_v1, %v4219_v13  ;;  %v4334_v18 = vpop.f32.mrb[78].mxu0  ;;  %v4222_v14 = vpop.f32.mrb[78].mxu1 }
 0x2d1   : > { %v4335_v29 = vpop.f32.mrb[79].mxu0  ;;  %v4223_v11 = vpop.f32.mrb[79].mxu1 }
 0x2d2   : > { %v2722_v6 = vadd.f32 %v4221_v52, %v6683_v36  ;;  %v4336_v4 = vadd.f32 %v4335_v29, %v4334_v18  ;;  %v4224_v26 = vadd.f32 %v4223_v11, %v4222_v14 }
 0x2d4   : > { %v2725_v61 = vadd.f32 %v4224_v26, %v6683_v36  ;;  %v6880_v41 = vadd.f32 %v4333_v48, %v2722_v6 }
 0x2d6   : > { %v4465_v54 = vpop.f32.mrb[80].mxu0  ;;  %v4353_v33 = vpop.f32.mrb[80].mxu1  ;;  %v6882_v3 = vadd.f32 %v4336_v4, %v2725_v61 }
 0x2d7   : > { %v4466_v27 = vpop.f32.mrb[81].mxu0  ;;  %v4354_v32 = vpop.f32.mrb[81].mxu1 }
 0x2d8   : > { %v4467_v2 = vadd.f32 %v4466_v27, %v4465_v54  ;;  %v4355_v40 = vadd.f32 %v4354_v32, %v4353_v33  ;;  %v4468_v59 = vpop.f32.mrb[82].mxu0  ;;  %v4356_v46 = vpop.f32.mrb[82].mxu1 }
 0x2d9   : > { %v4469_v17 = vpop.f32.mrb[83].mxu0  ;;  %v4357_v44 = vpop.f32.mrb[83].mxu1 }
 0x2da   : > { %v2924_v15 = vadd.f32 %v4355_v40, %v6694_v38  ;;  %v4470_v19 = vadd.f32 %v4469_v17, %v4468_v59  ;;  %v4358_v36 = vadd.f32 %v4357_v44, %v4356_v46 }
 0x2dc   : > { %v2927_v25 = vadd.f32 %v4358_v36, %v6696_v45  ;;  %v6886_v9 = vadd.f32 %v4467_v2, %v2924_v15 }
 0x2de   : > { %v4471_v37 = vpop.f32.mrb[84].mxu0  ;;  %v4359_v49 = vpop.f32.mrb[84].mxu1  ;;  %v6888_v62 = vadd.f32 %v4470_v19, %v2927_v25 }
 0x2df   : > { %v4472_v13 = vpop.f32.mrb[85].mxu0  ;;  %v4360_v22 = vpop.f32.mrb[85].mxu1 }
 0x2e0   : > { %v4473_v1 = vadd.f32 %v4472_v13, %v4471_v37  ;;  %v4361_v48 = vadd.f32 %v4360_v22, %v4359_v49  ;;  %v4474_v52 = vpop.f32.mrb[86].mxu0  ;;  %v4362_v18 = vpop.f32.mrb[86].mxu1 }
 0x2e1   : > { %v4475_v14 = vpop.f32.mrb[87].mxu0  ;;  %v4363_v29 = vpop.f32.mrb[87].mxu1 }
 0x2e2   : > { %v2932_v38 = vadd.f32 %v4361_v48, %v6710_v21  ;;  %v4476_v11 = vadd.f32 %v4475_v14, %v4474_v52  ;;  %v4364_v6 = vadd.f32 %v4363_v29, %v4362_v18 }
 0x2e4   : > { %v2935_v45 = vadd.f32 %v4364_v6, %v6712_v39  ;;  %v6892_v4 = vadd.f32 %v4473_v1, %v2932_v38 }
 0x2e6   : > { %v4477_v26 = vpop.f32.mrb[88].mxu0  ;;  %v4365_v8 = vpop.f32.mrb[88].mxu1  ;;  %v6894_v61 = vadd.f32 %v4476_v11, %v2935_v45 }
 0x2e7   : > { %v4478_v54 = vpop.f32.mrb[89].mxu0  ;;  %v4366_v33 = vpop.f32.mrb[89].mxu1 }
 0x2e8   : > { %v4479_v27 = vadd.f32 %v4478_v54, %v4477_v26  ;;  %v4367_v32 = vadd.f32 %v4366_v33, %v4365_v8  ;;  %v4480_v2 = vpop.f32.mrb[90].mxu0  ;;  %v4368_v40 = vpop.f32.mrb[90].mxu1 }
 0x2e9   : > { %v4481_v59 = vpop.f32.mrb[91].mxu0  ;;  %v4369_v46 = vpop.f32.mrb[91].mxu1 }
 0x2ea   : > { %v2940_v21 = vadd.f32 %v4367_v32, %v6723_v0  ;;  %v4482_v17 = vadd.f32 %v4481_v59, %v4480_v2  ;;  %v4370_v44 = vadd.f32 %v4369_v46, %v4368_v40 }
 0x2ec   : > { %v2943_v39 = vadd.f32 %v4370_v44, %v6725_v10  ;;  %v6898_v15 = vadd.f32 %v4479_v27, %v2940_v21 }
 0x2ee   : > { %v4483_v19 = vpop.f32.mrb[92].mxu0  ;;  %v4371_v36 = vpop.f32.mrb[92].mxu1  ;;  %v6900_v25 = vadd.f32 %v4482_v17, %v2943_v39 }
 0x2ef   : > { %v4484_v37 = vpop.f32.mrb[93].mxu0  ;;  %v4372_v49 = vpop.f32.mrb[93].mxu1 }
 0x2f0   : > { %v4485_v13 = vadd.f32 %v4484_v37, %v4483_v19  ;;  %v4373_v22 = vadd.f32 %v4372_v49, %v4371_v36  ;;  %v4486_v1 = vpop.f32.mrb[94].mxu0  ;;  %v4374_v48 = vpop.f32.mrb[94].mxu1 }
 0x2f1   : > { %v4487_v52 = vpop.f32.mrb[95].mxu0  ;;  %v4375_v18 = vpop.f32.mrb[95].mxu1 }
 0x2f2   : > { %v2948_v0 = vadd.f32 %v4373_v22, %v6745_v56  ;;  %v4488_v14 = vadd.f32 %v4487_v52, %v4486_v1  ;;  %v4376_v29 = vadd.f32 %v4375_v18, %v4374_v48 }
 0x2f4   : > { %v2951_v10 = vadd.f32 %v4376_v29, %v6753_v55  ;;  %v6904_v38 = vadd.f32 %v4485_v13, %v2948_v0 }
 0x2f6   : > { %v4489_v11 = vpop.f32.mrb[96].mxu0  ;;  %v4377_v6 = vpop.f32.mrb[96].mxu1  ;;  %v6906_v45 = vadd.f32 %v4488_v14, %v2951_v10 }
 0x2f7   : > { %v4490_v26 = vpop.f32.mrb[97].mxu0  ;;  %v4378_v8 = vpop.f32.mrb[97].mxu1 }
 0x2f8   : > { %v4491_v54 = vadd.f32 %v4490_v26, %v4489_v11  ;;  %v4379_v33 = vadd.f32 %v4378_v8, %v4377_v6  ;;  %v4492_v27 = vpop.f32.mrb[98].mxu0  ;;  %v4380_v32 = vpop.f32.mrb[98].mxu1 }
 0x2f9   : > { %v4493_v2 = vpop.f32.mrb[99].mxu0  ;;  %v4381_v40 = vpop.f32.mrb[99].mxu1 }
 0x2fa   : > { %v2956_v56 = vadd.f32 %v4379_v33, %v6764_v20  ;;  %v4494_v59 = vadd.f32 %v4493_v2, %v4492_v27  ;;  %v4382_v46 = vadd.f32 %v4381_v40, %v4380_v32 }
 0x2fc   : > { %v2959_v55 = vadd.f32 %v4382_v46, %v6770_v42  ;;  %v6910_v21 = vadd.f32 %v4491_v54, %v2956_v56 }
 0x2fe   : > { %v4495_v17 = vpop.f32.mrb[100].mxu0  ;;  %v4383_v44 = vpop.f32.mrb[100].mxu1  ;;  %v6912_v39 = vadd.f32 %v4494_v59, %v2959_v55 }
 0x2ff   : > { %v4496_v19 = vpop.f32.mrb[101].mxu0  ;;  %v4384_v36 = vpop.f32.mrb[101].mxu1 }
 0x300   : > { %v4497_v37 = vadd.f32 %v4496_v19, %v4495_v17  ;;  %v4385_v49 = vadd.f32 %v4384_v36, %v4383_v44  ;;  %v4498_v13 = vpop.f32.mrb[102].mxu0  ;;  %v4386_v22 = vpop.f32.mrb[102].mxu1 }
 0x301   : > { %v4499_v1 = vpop.f32.mrb[103].mxu0  ;;  %v4387_v48 = vpop.f32.mrb[103].mxu1 }
 0x302   : > { %v2964_v20 = vadd.f32 %v4385_v49, %v6780_v35  ;;  %v4500_v52 = vadd.f32 %v4499_v1, %v4498_v13  ;;  %v4388_v18 = vadd.f32 %v4387_v48, %v4386_v22 }
 0x304   : > { %v2967_v42 = vadd.f32 %v4388_v18, %v6786_v51  ;;  %v6916_v0 = vadd.f32 %v4497_v37, %v2964_v20 }
 0x306   : > { %v4501_v14 = vpop.f32.mrb[104].mxu0  ;;  %v4389_v29 = vpop.f32.mrb[104].mxu1  ;;  %v6918_v10 = vadd.f32 %v4500_v52, %v2967_v42 }
 0x307   : > { %v4502_v11 = vpop.f32.mrb[105].mxu0  ;;  %v4390_v6 = vpop.f32.mrb[105].mxu1 }
 0x308   : > { %v4503_v26 = vadd.f32 %v4502_v11, %v4501_v14  ;;  %v4391_v8 = vadd.f32 %v4390_v6, %v4389_v29  ;;  %v4504_v54 = vpop.f32.mrb[106].mxu0  ;;  %v4392_v33 = vpop.f32.mrb[106].mxu1 }
 0x309   : > { %v4505_v27 = vpop.f32.mrb[107].mxu0  ;;  %v4393_v32 = vpop.f32.mrb[107].mxu1 }
 0x30a   : > { %v2972_v35 = vadd.f32 %v4391_v8, %v6796_v12  ;;  %v4506_v2 = vadd.f32 %v4505_v27, %v4504_v54  ;;  %v4394_v40 = vadd.f32 %v4393_v32, %v4392_v33 }
 0x30c   : > { %v2975_v51 = vadd.f32 %v4394_v40, %v6798_v63  ;;  %v6922_v56 = vadd.f32 %v4503_v26, %v2972_v35 }
 0x30e   : > { %v4507_v59 = vpop.f32.mrb[108].mxu0  ;;  %v4395_v46 = vpop.f32.mrb[108].mxu1  ;;  %v6924_v55 = vadd.f32 %v4506_v2, %v2975_v51 }
 0x30f   : > { %v4508_v17 = vpop.f32.mrb[109].mxu0  ;;  %v4396_v44 = vpop.f32.mrb[109].mxu1 }
 0x310   : > { %v4509_v19 = vadd.f32 %v4508_v17, %v4507_v59  ;;  %v4397_v36 = vadd.f32 %v4396_v44, %v4395_v46  ;;  %v4510_v37 = vpop.f32.mrb[110].mxu0  ;;  %v4398_v49 = vpop.f32.mrb[110].mxu1 }
 0x311   : > { %v4511_v13 = vpop.f32.mrb[111].mxu0  ;;  %v4399_v22 = vpop.f32.mrb[111].mxu1 }
 0x312   : > { %v2980_v12 = vadd.f32 %v4397_v36, %v6812_v58  ;;  %v4512_v1 = vadd.f32 %v4511_v13, %v4510_v37  ;;  %v4400_v48 = vadd.f32 %v4399_v22, %v4398_v49 }
 0x314   : > { %v2983_v63 = vadd.f32 %v4400_v48, %v6818_v31  ;;  %v6928_v20 = vadd.f32 %v4509_v19, %v2980_v12 }
 0x316   : > { %v4513_v52 = vpop.f32.mrb[112].mxu0  ;;  %v4401_v18 = vpop.f32.mrb[112].mxu1  ;;  %v6930_v42 = vadd.f32 %v4512_v1, %v2983_v63 }
 0x317   : > { %v4514_v14 = vpop.f32.mrb[113].mxu0  ;;  %v4402_v29 = vpop.f32.mrb[113].mxu1 }
 0x318   : > { %v4515_v11 = vadd.f32 %v4514_v14, %v4513_v52  ;;  %v4403_v6 = vadd.f32 %v4402_v29, %v4401_v18  ;;  %v4516_v26 = vpop.f32.mrb[114].mxu0  ;;  %v4404_v8 = vpop.f32.mrb[114].mxu1 }
 0x319   : > { %v4517_v54 = vpop.f32.mrb[115].mxu0  ;;  %v4405_v33 = vpop.f32.mrb[115].mxu1 }
 0x31a   : > { %v2988_v58 = vadd.f32 %v4403_v6, %v6828_v5  ;;  %v4518_v27 = vadd.f32 %v4517_v54, %v4516_v26  ;;  %v4406_v32 = vadd.f32 %v4405_v33, %v4404_v8 }
 0x31c   : > { %v2991_v31 = vadd.f32 %v4406_v32, %v6830_v34  ;;  %v6934_v35 = vadd.f32 %v4515_v11, %v2988_v58 }
 0x31e   : > { %v4519_v2 = vpop.f32.mrb[116].mxu0  ;;  %v4407_v40 = vpop.f32.mrb[116].mxu1  ;;  %v6936_v51 = vadd.f32 %v4518_v27, %v2991_v31 }
 0x31f   : > { %v4520_v59 = vpop.f32.mrb[117].mxu0  ;;  %v4408_v46 = vpop.f32.mrb[117].mxu1 }
 0x320   : > { %v4521_v17 = vadd.f32 %v4520_v59, %v4519_v2  ;;  %v4409_v44 = vadd.f32 %v4408_v46, %v4407_v40  ;;  %v4522_v19 = vpop.f32.mrb[118].mxu0  ;;  %v4410_v36 = vpop.f32.mrb[118].mxu1 }
 0x321   : > { %v4523_v37 = vpop.f32.mrb[119].mxu0  ;;  %v4411_v49 = vpop.f32.mrb[119].mxu1 }
 0x322   : > { %v2996_v5 = vadd.f32 %v4409_v44, %v6836_v30  ;;  %v4524_v13 = vadd.f32 %v4523_v37, %v4522_v19  ;;  %v4412_v22 = vadd.f32 %v4411_v49, %v4410_v36 }
 0x324   : > { %v2999_v34 = vadd.f32 %v4412_v22, %v6838_v57  ;;  %v6940_v12 = vadd.f32 %v4521_v17, %v2996_v5 }
 0x326   : > { %v4525_v1 = vpop.f32.mrb[120].mxu0  ;;  %v4413_v48 = vpop.f32.mrb[120].mxu1  ;;  %v6942_v63 = vadd.f32 %v4524_v13, %v2999_v34 }
 0x327   : > { %v4526_v52 = vpop.f32.mrb[121].mxu0  ;;  %v4414_v18 = vpop.f32.mrb[121].mxu1 }
 0x328   : > { %v4527_v14 = vadd.f32 %v4526_v52, %v4525_v1  ;;  %v4415_v29 = vadd.f32 %v4414_v18, %v4413_v48  ;;  %v4528_v11 = vpop.f32.mrb[122].mxu0  ;;  %v4416_v6 = vpop.f32.mrb[122].mxu1 }
 0x329   : > { %v4529_v26 = vpop.f32.mrb[123].mxu0  ;;  %v4417_v8 = vpop.f32.mrb[123].mxu1 }
 0x32a   : > { %v3004_v30 = vadd.f32 %v4415_v29, %v6845_v50  ;;  %v4530_v54 = vadd.f32 %v4529_v26, %v4528_v11  ;;  %v4418_v33 = vadd.f32 %v4417_v8, %v4416_v6 }
 0x32c   : > { %v3007_v57 = vadd.f32 %v4418_v33, %v6847_v7  ;;  %v6946_v58 = vadd.f32 %v4527_v14, %v3004_v30 }
 0x32e   : > { %v4531_v27 = vpop.f32.mrb[124].mxu0  ;;  %v4419_v32 = vpop.f32.mrb[124].mxu1  ;;  %v6948_v31 = vadd.f32 %v4530_v54, %v3007_v57 }
 0x32f   : > { %v4532_v2 = vpop.f32.mrb[125].mxu0  ;;  %v4420_v40 = vpop.f32.mrb[125].mxu1 }
 0x330   : > { %v4533_v59 = vadd.f32 %v4532_v2, %v4531_v27  ;;  %v4421_v46 = vadd.f32 %v4420_v40, %v4419_v32  ;;  %v4534_v17 = vpop.f32.mrb[126].mxu0  ;;  %v4422_v44 = vpop.f32.mrb[126].mxu1 }
 0x331   : > { %v4535_v19 = vpop.f32.mrb[127].mxu0  ;;  %v4423_v36 = vpop.f32.mrb[127].mxu1 }
 0x332   : > { %v3012_v50 = vadd.f32 %v4421_v46, %v6854_v47  ;;  %v4536_v37 = vadd.f32 %v4535_v19, %v4534_v17  ;;  %v4424_v49 = vadd.f32 %v4423_v36, %v4422_v44 }
 0x334   : > { %v3015_v7 = vadd.f32 %v4424_v49, %v6856_v43  ;;  %v6952_v5 = vadd.f32 %v4533_v59, %v3012_v50 }
 0x336   : > { %v4537_v13 = vpop.f32.mrb[128].mxu0  ;;  %v4425_v22 = vpop.f32.mrb[128].mxu1  ;;  %v6954_v34 = vadd.f32 %v4536_v37, %v3015_v7 }
 0x337   : > { %v4538_v1 = vpop.f32.mrb[129].mxu0  ;;  %v4426_v48 = vpop.f32.mrb[129].mxu1 }
 0x338   : > { %v4539_v52 = vadd.f32 %v4538_v1, %v4537_v13  ;;  %v4427_v18 = vadd.f32 %v4426_v48, %v4425_v22  ;;  %v4540_v14 = vpop.f32.mrb[130].mxu0  ;;  %v4428_v29 = vpop.f32.mrb[130].mxu1 }
 0x339   : > { %v4541_v11 = vpop.f32.mrb[131].mxu0  ;;  %v4429_v6 = vpop.f32.mrb[131].mxu1 }
 0x33a   : > { %v3020_v47 = vadd.f32 %v4427_v18, %v6862_v16  ;;  %v4542_v26 = vadd.f32 %v4541_v11, %v4540_v14  ;;  %v4430_v8 = vadd.f32 %v4429_v6, %v4428_v29 }
 0x33c   : > { %v3023_v43 = vadd.f32 %v4430_v8, %v6864_v60  ;;  %v6958_v30 = vadd.f32 %v4539_v52, %v3020_v47 }
 0x33e   : > { %v4543_v54 = vpop.f32.mrb[132].mxu0  ;;  %v4431_v33 = vpop.f32.mrb[132].mxu1  ;;  %v6960_v57 = vadd.f32 %v4542_v26, %v3023_v43 }
 0x33f   : > { %v4544_v27 = vpop.f32.mrb[133].mxu0  ;;  %v4432_v32 = vpop.f32.mrb[133].mxu1 }
 0x340   : > { %v4545_v2 = vadd.f32 %v4544_v27, %v4543_v54  ;;  %v4433_v40 = vadd.f32 %v4432_v32, %v4431_v33  ;;  %v4546_v59 = vpop.f32.mrb[134].mxu0  ;;  %v4434_v46 = vpop.f32.mrb[134].mxu1 }
 0x341   : > { %v4547_v17 = vpop.f32.mrb[135].mxu0  ;;  %v4435_v44 = vpop.f32.mrb[135].mxu1 }
 0x342   : > { %v3028_v16 = vadd.f32 %v4433_v40, %v6868_v28  ;;  %v4548_v19 = vadd.f32 %v4547_v17, %v4546_v59  ;;  %v4436_v36 = vadd.f32 %v4435_v44, %v4434_v46 }
 0x344   : > { %v3031_v60 = vadd.f32 %v4436_v36, %v6870_v53  ;;  %v6964_v50 = vadd.f32 %v4545_v2, %v3028_v16 }
 0x346   : > { %v4549_v37 = vpop.f32.mrb[136].mxu0  ;;  %v4437_v49 = vpop.f32.mrb[136].mxu1  ;;  %v6966_v7 = vadd.f32 %v4548_v19, %v3031_v60 }
 0x347   : > { %v4550_v13 = vpop.f32.mrb[137].mxu0  ;;  %v4438_v22 = vpop.f32.mrb[137].mxu1 }
 0x348   : > { %v4551_v1 = vadd.f32 %v4550_v13, %v4549_v37  ;;  %v4439_v48 = vadd.f32 %v4438_v22, %v4437_v49  ;;  %v4552_v52 = vpop.f32.mrb[138].mxu0  ;;  %v4440_v18 = vpop.f32.mrb[138].mxu1 }
 0x349   : > { %v4553_v14 = vpop.f32.mrb[139].mxu0  ;;  %v4441_v29 = vpop.f32.mrb[139].mxu1 }
 0x34a   : > { %v3036_v28 = vadd.f32 %v4439_v48, %v6874_v24  ;;  %v4554_v11 = vadd.f32 %v4553_v14, %v4552_v52  ;;  %v4442_v6 = vadd.f32 %v4441_v29, %v4440_v18 }
 0x34c   : > { %v3039_v53 = vadd.f32 %v4442_v6, %v6876_v23  ;;  %v6970_v47 = vadd.f32 %v4551_v1, %v3036_v28 }
 0x34e   : > { %v4555_v26 = vpop.f32.mrb[140].mxu0  ;;  %v4443_v8 = vpop.f32.mrb[140].mxu1  ;;  %v6972_v43 = vadd.f32 %v4554_v11, %v3039_v53 }
 0x34f   : > { %v4556_v54 = vpop.f32.mrb[141].mxu0  ;;  %v4444_v33 = vpop.f32.mrb[141].mxu1 }
 0x350   : > { %v4557_v27 = vadd.f32 %v4556_v54, %v4555_v26  ;;  %v4445_v32 = vadd.f32 %v4444_v33, %v4443_v8  ;;  %v4558_v2 = vpop.f32.mrb[142].mxu0  ;;  %v4446_v40 = vpop.f32.mrb[142].mxu1 }
 0x351   : > { %v4559_v59 = vpop.f32.mrb[143].mxu0  ;;  %v4447_v46 = vpop.f32.mrb[143].mxu1 }
 0x352   : > { %v3044_v24 = vadd.f32 %v4445_v32, %v6880_v41  ;;  %v4560_v17 = vadd.f32 %v4559_v59, %v4558_v2  ;;  %v4448_v44 = vadd.f32 %v4447_v46, %v4446_v40 }
 0x354   : > { %v3047_v23 = vadd.f32 %v4448_v44, %v6882_v3  ;;  %v6976_v16 = vadd.f32 %v4557_v27, %v3044_v24 }
 0x356   : > { %v4675_v19 = vpop.f32.mrb[144].mxu1  ;;  %v6978_v36 = vadd.f32 %v4560_v17, %v3047_v23 }
 0x357   : > { %v3254_v60 = vadd.f32 %v4675_v19, %v6892_v4  ;;  %v3245_v37 = vpop.f32.mrb[145].mxu1 }
 0x358   : > { %v3246_v49 = vadd.f32 %v3245_v37, %v6886_v9  ;;  %v4676_v13 = vpop.f32.mrb[146].mxu1 }
 0x359   : > { %v3257_v22 = vadd.f32 %v4676_v13, %v6894_v61  ;;  %v3248_v1 = vpop.f32.mrb[147].mxu1  ;;  %v3374_v48 = vmax.f32 %v3254_v60, 0.0 }
 0x35a   : > { %v3249_v41 = vadd.f32 %v3248_v1, %v6888_v62  ;;  %v3372_v18 = vmax.f32 %v3246_v49, 0.0 }
 0x35b   : > { %v3375_v52 = vmax.f32 %v3257_v22, 0.0 }
 0x35c   : > { %v3373_v3 = vmax.f32 %v3249_v41, 0.0 }
 0x35d   : > { %v3405_v14 = vpack.c.bf16 %v3375_v52, %v3374_v48 }
 0x35e   : > { %v3404_v29 = vpack.c.bf16 %v3373_v3, %v3372_v18  ;;  %v4679_v28 = vpop.f32.mrb[148].mxu1 }
 0x35f   : > { %v3270_v11 = vadd.f32 %v4679_v28, %v6904_v38  ;;  %v3261_v6 = vpop.f32.mrb[149].mxu1 }
 0x360   : > { %v3262_v4 = vadd.f32 %v3261_v6, %v6898_v15  ;;  %v4680_v53 = vpop.f32.mrb[150].mxu1  ;;  %4721 = vmatprep.mubr.bf16.mxu0 %v3404_v29 }
 0x361   : > { %v3273_v9 = vadd.f32 %v4680_v53, %v6906_v45  ;;  %v3264_v61 = vpop.f32.mrb[151].mxu1  ;;  %4722 = vmatmul.mubr.bf16.vlgmr.msra.gmra.mrb[144].mxu0 %v3405_v14  ;;  %v3378_v26 = vmax.f32 %v3270_v11, 0.0 }
 0x362   : > { %v3265_v62 = vadd.f32 %v3264_v61, %v6900_v25  ;;  %v3376_v54 = vmax.f32 %v3262_v4, 0.0 }
 0x363   : > { %v3379_v8 = vmax.f32 %v3273_v9, 0.0 }
 0x364   : > { %v3377_v33 = vmax.f32 %v3265_v62, 0.0 }
 0x365   : > { %v3407_v27 = vpack.c.bf16 %v3379_v8, %v3378_v26 }
 0x366   : > { %v3406_v32 = vpack.c.bf16 %v3377_v33, %v3376_v54  ;;  %v4683_v2 = vpop.f32.mrb[152].mxu1 }
 0x367   : > { %v3286_v38 = vadd.f32 %v4683_v2, %v6916_v0  ;;  %v3277_v40 = vpop.f32.mrb[153].mxu1 }
 0x368   : > { %v3278_v15 = vadd.f32 %v3277_v40, %v6910_v21  ;;  %v4684_v59 = vpop.f32.mrb[154].mxu1  ;;  %4725 = vmatprep.mubr.bf16.mxu0 %v3406_v32 }
 0x369   : > { %v3289_v45 = vadd.f32 %v4684_v59, %v6918_v10  ;;  %v3280_v46 = vpop.f32.mrb[155].mxu1  ;;  %4726 = vmatmul.mubr.bf16.gmra.mrb[148].mxu0 %v3407_v27  ;;  %v3382_v24 = vmax.f32 %v3286_v38, 0.0 }
 0x36a   : > { %v3281_v25 = vadd.f32 %v3280_v46, %v6912_v39  ;;  %v3380_v44 = vmax.f32 %v3278_v15, 0.0 }
 0x36b   : > { %v3383_v17 = vmax.f32 %v3289_v45, 0.0 }
 0x36c   : > { %v3381_v23 = vmax.f32 %v3281_v25, 0.0 }
 0x36d   : > { %v3409_v19 = vpack.c.bf16 %v3383_v17, %v3382_v24 }
 0x36e   : > { %v3408_v60 = vpack.c.bf16 %v3381_v23, %v3380_v44  ;;  %v4687_v37 = vpop.f32.mrb[156].mxu1 }
 0x36f   : > { %v3302_v0 = vadd.f32 %v4687_v37, %v6928_v20  ;;  %v3293_v49 = vpop.f32.mrb[157].mxu1 }
 0x370   : > { %v3294_v21 = vadd.f32 %v3293_v49, %v6922_v56  ;;  %v4688_v13 = vpop.f32.mrb[158].mxu1  ;;  %4729 = vmatprep.mubr.bf16.mxu0 %v3408_v60 }
 0x371   : > { %v3305_v10 = vadd.f32 %v4688_v13, %v6930_v42  ;;  %v3296_v22 = vpop.f32.mrb[159].mxu1  ;;  %4730 = vmatmul.mubr.bf16.gmra.mrb[152].mxu0 %v3409_v19  ;;  %v3386_v1 = vmax.f32 %v3302_v0, 0.0 }
 0x372   : > { %v3297_v39 = vadd.f32 %v3296_v22, %v6924_v55  ;;  %v3384_v48 = vmax.f32 %v3294_v21, 0.0 }
 0x373   : > { %v3387_v41 = vmax.f32 %v3305_v10, 0.0 }
 0x374   : > { %v3385_v52 = vmax.f32 %v3297_v39, 0.0 }
 0x375   : > { %v3411_v18 = vpack.c.bf16 %v3387_v41, %v3386_v1 }
 0x376   : > { %v3410_v3 = vpack.c.bf16 %v3385_v52, %v3384_v48  ;;  %v4691_v14 = vpop.f32.mrb[160].mxu1 }
 0x377   : > { %v3318_v20 = vadd.f32 %v4691_v14, %v6940_v12  ;;  %v3309_v29 = vpop.f32.mrb[161].mxu1 }
 0x378   : > { %v3310_v56 = vadd.f32 %v3309_v29, %v6934_v35  ;;  %v4692_v28 = vpop.f32.mrb[162].mxu1  ;;  %4733 = vmatprep.mubr.bf16.mxu0 %v3410_v3 }
 0x379   : > { %v3321_v42 = vadd.f32 %v4692_v28, %v6942_v63  ;;  %v3312_v11 = vpop.f32.mrb[163].mxu1  ;;  %4734 = vmatmul.mubr.bf16.gmra.mrb[156].mxu0 %v3411_v18  ;;  %v3390_v6 = vmax.f32 %v3318_v20, 0.0 }
 0x37a   : > { %v3313_v55 = vadd.f32 %v3312_v11, %v6936_v51  ;;  %v3388_v53 = vmax.f32 %v3310_v56, 0.0 }
 0x37b   : > { %v3391_v4 = vmax.f32 %v3321_v42, 0.0 }
 0x37c   : > { %v3389_v9 = vmax.f32 %v3313_v55, 0.0 }
 0x37d   : > { %v3413_v61 = vpack.c.bf16 %v3391_v4, %v3390_v6 }
 0x37e   : > { %v3412_v62 = vpack.c.bf16 %v3389_v9, %v3388_v53  ;;  %v4695_v26 = vpop.f32.mrb[164].mxu1 }
 0x37f   : > { %v3334_v12 = vadd.f32 %v4695_v26, %v6952_v5  ;;  %v3325_v8 = vpop.f32.mrb[165].mxu1 }
 0x380   : > { %v3326_v35 = vadd.f32 %v3325_v8, %v6946_v58  ;;  %v4696_v54 = vpop.f32.mrb[166].mxu1  ;;  %4737 = vmatprep.mubr.bf16.mxu0 %v3412_v62 }
 0x381   : > { %v3337_v63 = vadd.f32 %v4696_v54, %v6954_v34  ;;  %v3328_v33 = vpop.f32.mrb[167].mxu1  ;;  %4738 = vmatmul.mubr.bf16.gmra.mrb[160].mxu0 %v3413_v61  ;;  %v3394_v27 = vmax.f32 %v3334_v12, 0.0 }
 0x382   : > { %v3329_v51 = vadd.f32 %v3328_v33, %v6948_v31  ;;  %v3392_v2 = vmax.f32 %v3326_v35, 0.0 }
 0x383   : > { %v3395_v32 = vmax.f32 %v3337_v63, 0.0 }
 0x384   : > { %v3393_v38 = vmax.f32 %v3329_v51, 0.0 }
 0x385   : > { %v3415_v40 = vpack.c.bf16 %v3395_v32, %v3394_v27 }
 0x386   : > { %v3414_v15 = vpack.c.bf16 %v3393_v38, %v3392_v2  ;;  %v4699_v59 = vpop.f32.mrb[168].mxu1 }
 0x387   : > { %v3350_v5 = vadd.f32 %v4699_v59, %v6964_v50  ;;  %v3341_v45 = vpop.f32.mrb[169].mxu1 }
 0x388   : > { %v3342_v58 = vadd.f32 %v3341_v45, %v6958_v30  ;;  %v4700_v46 = vpop.f32.mrb[170].mxu1  ;;  %4741 = vmatprep.mubr.bf16.mxu0 %v3414_v15 }
 0x389   : > { %v3353_v34 = vadd.f32 %v4700_v46, %v6966_v7  ;;  %v3344_v25 = vpop.f32.mrb[171].mxu1  ;;  %4742 = vmatmul.mubr.bf16.gmra.mrb[164].mxu0 %v3415_v40  ;;  %v3398_v24 = vmax.f32 %v3350_v5, 0.0 }
 0x38a   : > { %v3345_v31 = vadd.f32 %v3344_v25, %v6960_v57  ;;  %v3396_v44 = vmax.f32 %v3342_v58, 0.0 }
 0x38b   : > { %v3399_v17 = vmax.f32 %v3353_v34, 0.0 }
 0x38c   : > { %v3397_v23 = vmax.f32 %v3345_v31, 0.0 }
 0x38d   : > { %v3417_v19 = vpack.c.bf16 %v3399_v17, %v3398_v24 }
 0x38e   : > { %v3416_v60 = vpack.c.bf16 %v3397_v23, %v3396_v44  ;;  %v4703_v37 = vpop.f32.mrb[172].mxu1 }
 0x38f   : > { %v3366_v50 = vadd.f32 %v4703_v37, %v6976_v16  ;;  %v3357_v0 = vpop.f32.mrb[173].mxu1 }
 0x390   : > { %v3358_v30 = vadd.f32 %v3357_v0, %v6970_v47  ;;  %v4704_v49 = vpop.f32.mrb[174].mxu1  ;;  %4745 = vmatprep.mubr.bf16.mxu0 %v3416_v60  ;;  %v7015_v47 = vld [vmem:[%s7410_s7] ss:$0 sm:$0xff] }
 0x391   : > { %v3369_v7 = vadd.f32 %v4704_v49, %v6978_v36  ;;  %v3360_v21 = vpop.f32.mrb[175].mxu1  ;;  %4746 = vmatmul.mubr.bf16.gmra.mrb[168].mxu0 %v3417_v19  ;;  %v3402_v13 = vmax.f32 %v3366_v50, 0.0 }
 0x392   : > { %v3361_v57 = vadd.f32 %v3360_v21, %v6972_v43  ;;  %v3400_v22 = vmax.f32 %v3358_v30, 0.0 }
 0x393   : > { %v3403_v10 = vmax.f32 %v3369_v7, 0.0 }
 0x394   : > { %v3401_v39 = vmax.f32 %v3361_v57, 0.0 }
 0x395   : > { %v3419_v1 = vpack.c.bf16 %v3403_v10, %v3402_v13 }
 0x396   : > { %v3418_v41 = vpack.c.bf16 %v3401_v39, %v3400_v22 }
 0x398   : > { %4749 = vmatprep.mubr.bf16.mxu0 %v3418_v41 }
 0x399   : > { %4750 = vmatmul.mubr.bf16.gmra.mrb[172].mxu0 %v3419_v1 }
 0x434   : > { %v4723_v16 = vpop.f32.mrb[144].mxu0 }
 0x435   : > { %v3525_v48 = vpop.f32.mrb[145].mxu0  ;;  %v7024_v3 = vadd.f32 %v4723_v16, %v7015_v47 }
 0x436   : > { %v4724_v36 = vpop.f32.mrb[146].mxu0  ;;  %v7018_v18 = vadd.f32 %v7015_v47, %v3525_v48 }
 0x437   : > { %v3528_v52 = vpop.f32.mrb[147].mxu0  ;;  %v7029_v20 = vadd.f32 %v4724_v36, %v7015_v47 }
 0x438   : > { %v7021_v43 = vadd.f32 %v7015_v47, %v3528_v52 }
 0x43a   : > { %v3652_v14 = vadd.f32 %v7021_v43, %v7018_v18 }
 0x43c   : > { %v3653_v29 = vadd.f32 %v3652_v14, %v7024_v3  ;;  %v4727_v56 = vpop.f32.mrb[148].mxu0 }
 0x43d   : > { %v3541_v28 = vpop.f32.mrb[149].mxu0  ;;  %v7041_v9 = vadd.f32 %v4727_v56, %v7015_v47 }
 0x43e   : > { %v7033_v42 = vadd.f32 %v7015_v47, %v3541_v28  ;;  %v3654_v11 = vadd.f32 %v3653_v29, %v7029_v20  ;;  %v4728_v55 = vpop.f32.mrb[150].mxu0 }
 0x43f   : > { %v3544_v6 = vpop.f32.mrb[151].mxu0  ;;  %v7045_v62 = vadd.f32 %v4728_v55, %v7015_v47 }
 0x440   : > { %v3655_v4 = vadd.f32 %v3654_v11, %v7033_v42  ;;  %v7038_v53 = vadd.f32 %v7015_v47, %v3544_v6 }
 0x442   : > { %v3656_v61 = vadd.f32 %v3655_v4, %v7038_v53 }
 0x444   : > { %v3657_v26 = vadd.f32 %v3656_v61, %v7041_v9  ;;  %v4731_v12 = vpop.f32.mrb[152].mxu0 }
 0x445   : > { %v3557_v8 = vpop.f32.mrb[153].mxu0  ;;  %v7057_v32 = vadd.f32 %v4731_v12, %v7015_v47 }
 0x446   : > { %v7049_v35 = vadd.f32 %v7015_v47, %v3557_v8  ;;  %v3658_v54 = vadd.f32 %v3657_v26, %v7045_v62  ;;  %v4732_v63 = vpop.f32.mrb[154].mxu0 }
 0x447   : > { %v3560_v33 = vpop.f32.mrb[155].mxu0  ;;  %v7061_v38 = vadd.f32 %v4732_v63, %v7015_v47 }
 0x448   : > { %v3659_v51 = vadd.f32 %v3658_v54, %v7049_v35  ;;  %v7054_v27 = vadd.f32 %v7015_v47, %v3560_v33 }
 0x44a   : > { %v3660_v2 = vadd.f32 %v3659_v51, %v7054_v27 }
 0x44c   : > { %v3661_v40 = vadd.f32 %v3660_v2, %v7057_v32  ;;  %v4735_v15 = vpop.f32.mrb[156].mxu0 }
 0x44d   : > { %v3573_v59 = vpop.f32.mrb[157].mxu0  ;;  %v7073_v31 = vadd.f32 %v4735_v15, %v7015_v47 }
 0x44e   : > { %v7065_v5 = vadd.f32 %v7015_v47, %v3573_v59  ;;  %v3662_v45 = vadd.f32 %v3661_v40, %v7061_v38  ;;  %v4736_v58 = vpop.f32.mrb[158].mxu0 }
 0x44f   : > { %v3576_v46 = vpop.f32.mrb[159].mxu0  ;;  %v7077_v17 = vadd.f32 %v4736_v58, %v7015_v47 }
 0x450   : > { %v3663_v34 = vadd.f32 %v3662_v45, %v7065_v5  ;;  %v7070_v25 = vadd.f32 %v7015_v47, %v3576_v46 }
 0x452   : > { %v3664_v24 = vadd.f32 %v3663_v34, %v7070_v25 }
 0x454   : > { %v3665_v44 = vadd.f32 %v3664_v24, %v7073_v31  ;;  %v4739_v23 = vpop.f32.mrb[160].mxu0 }
 0x455   : > { %v3589_v19 = vpop.f32.mrb[161].mxu0  ;;  %v7089_v7 = vadd.f32 %v4739_v23, %v7015_v47 }
 0x456   : > { %v7081_v60 = vadd.f32 %v7015_v47, %v3589_v19  ;;  %v3666_v37 = vadd.f32 %v3665_v44, %v7077_v17  ;;  %v4740_v50 = vpop.f32.mrb[162].mxu0 }
 0x457   : > { %v3592_v0 = vpop.f32.mrb[163].mxu0  ;;  %v7093_v57 = vadd.f32 %v4740_v50, %v7015_v47 }
 0x458   : > { %v3667_v30 = vadd.f32 %v3666_v37, %v7081_v60  ;;  %v7086_v49 = vadd.f32 %v7015_v47, %v3592_v0 }
 0x45a   : > { %v3668_v21 = vadd.f32 %v3667_v30, %v7086_v49 }
 0x45c   : > { %v3669_v13 = vadd.f32 %v3668_v21, %v7089_v7  ;;  %v4743_v10 = vpop.f32.mrb[164].mxu0 }
 0x45d   : > { %v3605_v22 = vpop.f32.mrb[165].mxu0  ;;  %v7105_v52 = vadd.f32 %v4743_v10, %v7015_v47  ;;  %v3691_v10 = vld [vmem:[%s7411_s8] sm:$0xff] }
 0x45e   : > { %v7097_v39 = vadd.f32 %v7015_v47, %v3605_v22  ;;  %v3670_v1 = vadd.f32 %v3669_v13, %v7093_v57  ;;  %v4744_v41 = vpop.f32.mrb[166].mxu0 }
 0x45f   : > { %v3608_v16 = vpop.f32.mrb[167].mxu0  ;;  %v7109_v29 = vadd.f32 %v4744_v41, %v7015_v47  ;;  %v3696_v41 = vld [vmem:[%s7412_s9] sm:$0xff] }
 0x460   : > { %v3671_v48 = vadd.f32 %v3670_v1, %v7097_v39  ;;  %v7102_v36 = vadd.f32 %v7015_v47, %v3608_v16 }
 0x462   : > { %v3672_v14 = vadd.f32 %v3671_v48, %v7102_v36 }
 0x464   : > { %v3673_v56 = vadd.f32 %v3672_v14, %v7105_v52  ;;  %v4747_v28 = vpop.f32.mrb[168].mxu0 }
 0x465   : > { %v3621_v11 = vpop.f32.mrb[169].mxu0  ;;  %v7121_v8 = vadd.f32 %v4747_v28, %v7015_v47 }
 0x466   : > { %v7113_v55 = vadd.f32 %v7015_v47, %v3621_v11  ;;  %v3674_v6 = vadd.f32 %v3673_v56, %v7109_v29  ;;  %v4748_v4 = vpop.f32.mrb[170].mxu0 }
 0x467   : > { %v3624_v61 = vpop.f32.mrb[171].mxu0  ;;  %v7125_v63 = vadd.f32 %v4748_v4, %v7015_v47 }
 0x468   : > { %v3675_v26 = vadd.f32 %v3674_v6, %v7113_v55  ;;  %v7118_v12 = vadd.f32 %v7015_v47, %v3624_v61 }
 0x46a   : > { %v3676_v54 = vadd.f32 %v3675_v26, %v7118_v12 }
 0x46c   : > { %v3677_v33 = vadd.f32 %v3676_v54, %v7121_v8  ;;  %v4751_v51 = vpop.f32.mrb[172].mxu0 }
 0x46d   : > { %v3637_v2 = vpop.f32.mrb[173].mxu0  ;;  %v3646_v34 = vadd.f32 %v4751_v51, %v7015_v47 }
 0x46e   : > { %v7129_v40 = vadd.f32 %v7015_v47, %v3637_v2  ;;  %v3678_v15 = vadd.f32 %v3677_v33, %v7125_v63  ;;  %v4752_v59 = vpop.f32.mrb[174].mxu0 }
 0x46f   : > { %v3640_v45 = vpop.f32.mrb[175].mxu0  ;;  %v3649_v44 = vadd.f32 %v4752_v59, %v7015_v47 }
 0x470   : > { %v3679_v58 = vadd.f32 %v3678_v15, %v7129_v40  ;;  %v3641_v46 = vadd.f32 %v7015_v47, %v3640_v45 }
 0x472   : > { %v3680_v24 = vadd.f32 %v3679_v58, %v3641_v46 }
 0x474   : > { %v3681_v23 = vadd.f32 %v3680_v24, %v3646_v34 }
 0x476   : > { %v3682_v19 = vadd.f32 %v3681_v23, %v3649_v44 }
 0x478   : > { %v3683_v37 = vrot.slane %v3682_v19, 4 }
 0x47a   : > { %v3684_v50 = vadd.f32 %v3683_v37, %v3682_v19 }
 0x47c   : > { %v3685_v0 = vrot.slane %v3684_v50, 2 }
 0x47e   : > { %v3686_v30 = vadd.f32 %v3685_v0, %v3684_v50  ;;  %v4944_v50 = vld [vmem:[%s5374_s13 + $0x28] sm:$0xff] }
 0x480   : > { %v3687_v21 = vrot.slane %v3686_v30, 1 }
 0x482   : > { %v3688_v13 = vadd.f32 %v3687_v21, %v3686_v30  ;;  %v4945_v30 = vld [vmem:[%s5374_s13 + $0x30] sm:$0xff] }
 0x484   : > { %v3690_v22 = vmul.f32 0.00390625, %v3688_v13  ;;  %v4946_v13 = vld [vmem:[%s5374_s13 + $0x38] sm:$0xff] }
 0x486   : > { %v3692_v1 = vmul.f32 %v3691_v10, %v3690_v22  ;;  %v4947_v22 = vld [vmem:[%s5374_s13 + $0x40] sm:$0xff] }
 0x488   : > { %3693 = vadd.xlane.f32.xlu0 %v3692_v1 }
 0x515   : > { %v3694_v47 = vpop.xlane.xlu0 %3693 }
 0x516   : > { %v3695_v16 = vmax.f32 %v3694_v47, 0.0 }
 0x518   : > { %v3697_v48 = vmul.f32 %v3696_v41, %v3695_v16  ;;  %v4948_v41 = vld [vmem:[%s5374_s13 + $0x48] sm:$0xff]  ;;  %v4949_v16 = vld [vmem:[%s5374_s13 + $0x50] sm:$0xff] }
 0x51a   : > { %v3698_v14 = vrot.slane %v3697_v48, 4 }
 0x51c   : > { %v3699_v56 = vadd.f32 %v3698_v14, %v3697_v48  ;;  %v4950_v14 = vld [vmem:[%s5374_s13 + $0x58] sm:$0xff] }
 0x51e   : > { %v3700_v28 = vrot.slane %v3699_v56, 2 }
 0x520   : > { %v3701_v11 = vadd.f32 %v3700_v28, %v3699_v56  ;;  %v4951_v28 = vld [vmem:[%s5374_s13 + $0x60] sm:$0xff] }
 0x522   : > { %v3702_v6 = vrot.slane %v3701_v11, 1 }
 0x524   : > { %v3703_v4 = vadd.f32 %v3702_v6, %v3701_v11  ;;  %v4952_v6 = vld [vmem:[%s5374_s13 + $0x68] sm:$0xff] }
 0x526   : > { %v4081_v61 = vmul.f32 -1.442695, %v3703_v4 }
 0x528   : > { %4935 = vpow2.f32 %v4081_v61  ;;  %v4953_v61 = vld [vmem:[%s5374_s13 + $0x70] sm:$0xff] }
 0x532   : > { %v4936_v26 = vpop.eup %4935 }
 0x533   : > { %v3707_v54 = vadd.f32 1.0, %v4936_v26 }
 0x535   : > { %4937 = vrcp.f32 %v3707_v54  ;;  %v4954_v54 = vld [vmem:[%s5374_s13 + $0x78] sm:$0xff] }
 0x53f   : > { %v4938_v33 = vpop.eup %4937 }
 0x540   : > { %v3710_v51 = vmul.f32 %v4938_v33, %v7018_v18  ;;  %v3711_v2 = vmul.f32 %v4938_v33, %v7021_v43  ;;  %v3712_v15 = vmul.f32 %v4938_v33, %v7024_v3  ;;  %v3713_v59 = vmul.f32 %v4938_v33, %v7029_v20 }
 0x541   : > { %v3714_v45 = vmul.f32 %v4938_v33, %v7033_v42  ;;  %v3715_v58 = vmul.f32 %v4938_v33, %v7038_v53  ;;  %v3716_v24 = vmul.f32 %v4938_v33, %v7041_v9  ;;  %v3717_v23 = vmul.f32 %v4938_v33, %v7045_v62 }
 0x542   : > { %v3718_v19 = vmul.f32 %v4938_v33, %v7049_v35  ;;  %v3719_v37 = vmul.f32 %v4938_v33, %v7054_v27  ;;  %v3720_v18 = vmul.f32 %v4938_v33, %v7057_v32  ;;  %v3721_v43 = vmul.f32 %v4938_v33, %v7061_v38 }
 0x543   : > { %v3722_v3 = vmul.f32 %v4938_v33, %v7065_v5  ;;  %v3723_v20 = vmul.f32 %v4938_v33, %v7070_v25  ;;  %v3724_v42 = vmul.f32 %v4938_v33, %v7073_v31  ;;  %v3725_v53 = vmul.f32 %v4938_v33, %v7077_v17 }
 0x544   : > { %v3726_v9 = vmul.f32 %v4938_v33, %v7081_v60  ;;  %v3727_v62 = vmul.f32 %v4938_v33, %v7086_v49  ;;  %v3728_v35 = vmul.f32 %v4938_v33, %v7089_v7  ;;  %v3729_v27 = vmul.f32 %v4938_v33, %v7093_v57 }
 0x545   : > { %v3730_v32 = vmul.f32 %v4938_v33, %v7097_v39  ;;  %v3731_v38 = vmul.f32 %v4938_v33, %v7102_v36  ;;  %v3732_v5 = vmul.f32 %v4938_v33, %v7105_v52  ;;  %v3733_v25 = vmul.f32 %v4938_v33, %v7109_v29  ;;  %v4939_v52 = vld [vmem:[%s5374_s13] sm:$0xff] }
 0x546   : > { %v3734_v31 = vmul.f32 %v4938_v33, %v7113_v55  ;;  %v3735_v17 = vmul.f32 %v4938_v33, %v7118_v12  ;;  %v3736_v60 = vmul.f32 %v4938_v33, %v7121_v8  ;;  %v3737_v49 = vmul.f32 %v4938_v33, %v7125_v63  ;;  %v4940_v55 = vld [vmem:[%s5374_s13 + $0x8] sm:$0xff]  ;;  %v4941_v8 = vld [vmem:[%s5374_s13 + $0x10] sm:$0xff] }
 0x547   : > { %v7171_v7 = vmul.f32 %v4938_v33, %v7129_v40  ;;  %v7173_v57 = vmul.f32 %v4938_v33, %v3641_v46  ;;  %v7175_v39 = vmul.f32 %v4938_v33, %v3646_v34  ;;  %v7177_v36 = vmul.f32 %v4938_v33, %v3649_v44  ;;  %v4942_v40 = vld [vmem:[%s5374_s13 + $0x18] sm:$0xff]  ;;  %v4943_v34 = vld [vmem:[%s5374_s13 + $0x20] sm:$0xff] }
 0x548   : > { %v7180_v29 = vadd.f32 %v4939_v52, %v3710_v51  ;;  %v7183_v12 = vadd.f32 %v4940_v55, %v3711_v2  ;;  %v7186_v63 = vadd.f32 %v4941_v8, %v3712_v15  ;;  %v7189_v46 = vadd.f32 %v4942_v40, %v3713_v59  ;;  %v4955_v51 = vld [vmem:[%s5374_s13 + $0x80] sm:$0xff]  ;;  %v4956_v15 = vld [vmem:[%s5374_s13 + $0x88] sm:$0xff]  ;;  %v4966_v55 = vld [vmem:[%s5374_s13 + $0xd8] sm:$0xff] }
 0x549   : > { %v7193_v44 = vadd.f32 %v4943_v34, %v3714_v45  ;;  %v7196_v0 = vadd.f32 %v4944_v50, %v3715_v58  ;;  %v7199_v21 = vadd.f32 %v4945_v30, %v3716_v24  ;;  %v7202_v10 = vadd.f32 %v4946_v13, %v3717_v23  ;;  %v4957_v45 = vld [vmem:[%s5374_s13 + $0x90] sm:$0xff]  ;;  %v4958_v24 = vld [vmem:[%s5374_s13 + $0x98] sm:$0xff]  ;;  %v4967_v8 = vld [vmem:[%s5374_s13 + $0xe0] sm:$0xff] }
 0x54a   : > { %v7205_v1 = vadd.f32 %v4947_v22, %v3718_v19  ;;  %v7208_v47 = vadd.f32 %v4948_v41, %v3719_v37  ;;  %v7211_v48 = vadd.f32 %v4949_v16, %v3720_v18  ;;  %v7214_v56 = vadd.f32 %v4950_v14, %v3721_v43  ;;  %v4959_v19 = vld [vmem:[%s5374_s13 + $0xa0] sm:$0xff]  ;;  %v4960_v18 = vld [vmem:[%s5374_s13 + $0xa8] sm:$0xff]  ;;  %v4969_v34 = vld [vmem:[%s5374_s13 + $0xf0] sm:$0xff] }
 0x54b   : > { %v7217_v11 = vadd.f32 %v4951_v28, %v3722_v3  ;;  %v7220_v4 = vadd.f32 %v4952_v6, %v3723_v20  ;;  %v7223_v26 = vadd.f32 %v4953_v61, %v3724_v42  ;;  %v7226_v33 = vadd.f32 %v4954_v54, %v3725_v53  ;;  %v4961_v3 = vld [vmem:[%s5374_s13 + $0xb0] sm:$0xff]  ;;  %v4962_v42 = vld [vmem:[%s5374_s13 + $0xb8] sm:$0xff]  ;;  %v4968_v40 = vld [vmem:[%s5374_s13 + $0xe8] sm:$0xff] }
 0x54c   : > { %v7233_v2 = vadd.f32 %v4955_v51, %v3726_v9  ;;  %v7236_v59 = vadd.f32 %v4956_v15, %v3727_v62  ;;  %v7239_v58 = vadd.f32 %v4957_v45, %v3728_v35  ;;  %v7242_v23 = vadd.f32 %v4958_v24, %v3729_v27  ;;  %v4963_v9 = vld [vmem:[%s5374_s13 + $0xc0] sm:$0xff]  ;;  %v4964_v35 = vld [vmem:[%s5374_s13 + $0xc8] sm:$0xff] }
 0x54d   : > { %v7245_v37 = vadd.f32 %v4959_v19, %v3730_v32  ;;  %v7248_v43 = vadd.f32 %v4960_v18, %v3731_v38  ;;  %v7251_v20 = vadd.f32 %v4961_v3, %v3732_v5  ;;  %v7254_v53 = vadd.f32 %v4962_v42, %v3733_v25  ;;  %v4965_v32 = vld [vmem:[%s5374_s13 + $0xd0] sm:$0xff] }
 0x54e   : > { %v7257_v62 = vadd.f32 %v4963_v9, %v3734_v31  ;;  %v7260_v27 = vadd.f32 %v4964_v35, %v3735_v17  ;;  %v7263_v52 = vadd.f32 %v4965_v32, %v3736_v60  ;;  %v7266_v38 = vadd.f32 %v4966_v55, %v3737_v49  ;;  %v4970_v17 = vld [vmem:[%s5374_s13 + $0xf8] sm:$0xff]  ;;  %s7297_s13 = scalar_lea.vmem [#allocation8], %s7230_s30 }
 0x54f   : > { %v7270_v5 = vadd.f32 %v4967_v8, %v7171_v7  ;;  %v7274_v25 = vadd.f32 %v4968_v40, %v7173_v57  ;;  %v7278_v31 = vadd.f32 %v4969_v34, %v7175_v39  ;;  %v7282_v60 = vadd.f32 %v4970_v17, %v7177_v36  ;;  %s3852_s25 = sshll.u32 %s7297_s13, 4  ;;  %s7342_s25 = int_to_ptr.vmem [resolvable:$true] %s3852_s25 }
 0x550   : > { %v3774_v49 = vmax.f32 %v7180_v29, 0.0  ;;  %v3775_v50 = vmax.f32 %v7183_v12, 0.0  ;;  %v3776_v7 = vmax.f32 %v7186_v63, 0.0  ;;  %v3777_v30 = vmax.f32 %v7189_v46, 0.0  ;;  %s5055_s20 = scalar_lea.vmem %s7342_s25, 4096  ;;  %p5062_p13 = scmp.lt.s32.totalorder %s7342_s25, %s5060_s19 }
 0x551   : > { %v3778_v57 = vmax.f32 %v7193_v44, 0.0  ;;  %v3779_v13 = vmax.f32 %v7196_v0, 0.0  ;;  %v3780_v22 = vmax.f32 %v7199_v21, 0.0  ;;  %v3781_v39 = vmax.f32 %v7202_v10, 0.0  ;;  %p5056_p4 = scmp.ne.s32.totalorder %s7342_s25, %s5055_s20  ;;  %p5063_p1 = scmp.lt.s32.totalorder %s5061_s24, %s5055_s20 }
 0x552   : > { %v3782_v41 = vmax.f32 %v7205_v1, 0.0  ;;  %v3783_v36 = vmax.f32 %v7208_v47, 0.0  ;;  %v3784_v29 = vmax.f32 %v7211_v48, 0.0  ;;  %v3785_v12 = vmax.f32 %v7214_v56, 0.0  ;;  %3806 = vst [vmem:[%s7297_s13] sm:$0xff] %v3774_v49  ;;  %3807 = vst [vmem:[%s7297_s13 + $0x8] sm:$0xff] %v3775_v50 }
 0x553   : > { %3808 = vst [vmem:[%s7297_s13 + $0x10] sm:$0xff] %v3776_v7  ;;  %3809 = vst [vmem:[%s7297_s13 + $0x18] sm:$0xff] %v3777_v30  ;;  %v3786_v63 = vmax.f32 %v7217_v11, 0.0  ;;  %v3787_v46 = vmax.f32 %v7220_v4, 0.0  ;;  %v3788_v44 = vmax.f32 %v7223_v26, 0.0  ;;  %v3789_v0 = vmax.f32 %v7226_v33, 0.0  ;;  %p5057_p8 = pnand %p5056_p4, %p7904_p7  ;;  %p5064_p6 = por %p5063_p1, %p5062_p13 }
 0x554   : > { %3810 = vst [vmem:[%s7297_s13 + $0x20] sm:$0xff] %v3778_v57  ;;  %3811 = vst [vmem:[%s7297_s13 + $0x28] sm:$0xff] %v3779_v13  ;;  %v3790_v21 = vmax.f32 %v7233_v2, 0.0  ;;  %v3791_v10 = vmax.f32 %v7236_v59, 0.0  ;;  %v3792_v1 = vmax.f32 %v7239_v58, 0.0  ;;  %v3793_v47 = vmax.f32 %v7242_v23, 0.0 }
 0x555   : > { %3812 = vst [vmem:[%s7297_s13 + $0x30] sm:$0xff] %v3780_v22  ;;  %3813 = vst [vmem:[%s7297_s13 + $0x38] sm:$0xff] %v3781_v39  ;;  %v3794_v16 = vmax.f32 %v7245_v37, 0.0  ;;  %v3795_v48 = vmax.f32 %v7248_v43, 0.0  ;;  %v3796_v14 = vmax.f32 %v7251_v20, 0.0  ;;  %v3797_v56 = vmax.f32 %v7254_v53, 0.0  ;;  %p5058_p11 = pneg %p5057_p8 }
 0x556   : > { %3814 = vst [vmem:[%s7297_s13 + $0x40] sm:$0xff] %v3782_v41  ;;  %3815 = vst [vmem:[%s7297_s13 + $0x48] sm:$0xff] %v3783_v36  ;;  %v3798_v28 = vmax.f32 %v7257_v62, 0.0  ;;  %v3799_v11 = vmax.f32 %v7260_v27, 0.0  ;;  %v3800_v6 = vmax.f32 %v7263_v52, 0.0  ;;  %v3801_v4 = vmax.f32 %v7266_v38, 0.0 }
 0x557   : > { %3816 = vst [vmem:[%s7297_s13 + $0x50] sm:$0xff] %v3784_v29  ;;  %3817 = vst [vmem:[%s7297_s13 + $0x58] sm:$0xff] %v3785_v12  ;;  %v3802_v61 = vmax.f32 %v7270_v5, 0.0  ;;  %v3803_v26 = vmax.f32 %v7274_v25, 0.0  ;;  %v3804_v54 = vmax.f32 %v7278_v31, 0.0  ;;  %v3805_v33 = vmax.f32 %v7282_v60, 0.0  ;;  %p5065_p9 = pnand %p5064_p6, %p5058_p11 }
 0x558   : > { %3818 = vst [vmem:[%s7297_s13 + $0x60] sm:$0xff] %v3786_v63  ;;  %3819 = vst [vmem:[%s7297_s13 + $0x68] sm:$0xff] %v3787_v46 }
 0x559   : > { %3820 = vst [vmem:[%s7297_s13 + $0x70] sm:$0xff] %v3788_v44  ;;  %3821 = vst [vmem:[%s7297_s13 + $0x78] sm:$0xff] %v3789_v0 }
 0x55a   : > { %3822 = vst [vmem:[%s7297_s13 + $0x80] sm:$0xff] %v3790_v21  ;;  %3823 = vst [vmem:[%s7297_s13 + $0x88] sm:$0xff] %v3791_v10 }
 0x55b   : > { %3824 = vst [vmem:[%s7297_s13 + $0x90] sm:$0xff] %v3792_v1  ;;  %3825 = vst [vmem:[%s7297_s13 + $0x98] sm:$0xff] %v3793_v47 }
 0x55c   : > { %3826 = vst [vmem:[%s7297_s13 + $0xa0] sm:$0xff] %v3794_v16  ;;  %3827 = vst [vmem:[%s7297_s13 + $0xa8] sm:$0xff] %v3795_v48 }
 0x55d   : > { %3828 = vst [vmem:[%s7297_s13 + $0xb0] sm:$0xff] %v3796_v14  ;;  %3829 = vst [vmem:[%s7297_s13 + $0xb8] sm:$0xff] %v3797_v56 }
 0x55e   : > { %3830 = vst [vmem:[%s7297_s13 + $0xc0] sm:$0xff] %v3798_v28  ;;  %3831 = vst [vmem:[%s7297_s13 + $0xc8] sm:$0xff] %v3799_v11 }
 0x55f   : > { %3832 = vst [vmem:[%s7297_s13 + $0xd0] sm:$0xff] %v3800_v6  ;;  %3833 = vst [vmem:[%s7297_s13 + $0xd8] sm:$0xff] %v3801_v4 }
 0x560   : > { %3834 = vst [vmem:[%s7297_s13 + $0xe0] sm:$0xff] %v3802_v61  ;;  %3835 = vst [vmem:[%s7297_s13 + $0xe8] sm:$0xff] %v3803_v26 }
 0x561   : > { %3836 = vst [vmem:[%s7297_s13 + $0xf0] sm:$0xff] %v3804_v54  ;;  %3837 = vst [vmem:[%s7297_s13 + $0xf8] sm:$0xff] %v3805_v33 }
 0x562   : > { %5068 = shalt.err (!%p5065_p9)
}
 0x563   : > { %s5069_s21 = scalar_lea.hbm %s7340_s12, 4096  ;;  %s5073_s11 = scalar_lea.hbm %s7413_s10, 8192 }
 0x564   : > { %p5070_p2 = scmp.ne.s32.totalorder %s7340_s12, %s5069_s21  ;;  %p5074_p5 = scmp.lt.u32.totalorder %s7340_s12, %s7413_s10 }
 0x565   : > { %p5075_p10 = scmp.lt.u32.totalorder %s5073_s11, %s5069_s21  ;;  %p5077_p4 = scmp.lt.u32.totalorder %s5069_s21, %s7340_s12 }
 0x566   : > { %p5071_p0 = pnand %p5070_p2, %p7904_p7 }
 0x567   : > { %p5076_p12 = por %p5075_p10, %p5074_p5 }
 0x568   : > { %p5072_p3 = pneg %p5071_p0 }
 0x569   : > { %p5078_p8 = por %p5077_p4, %p5076_p12 }
 0x56b   : > { %p5079_p11 = pnand %p5078_p8, %p5072_p3 }
 0x56d   : > { %5082 = shalt.err (!%p5079_p11)
}
 0x56e   : > { %s5135_s30 = smov 128   ;;  %s5136_s13 = smov 8  }
 0x56f   : > { %4781 = dma.vmem_to_hbm [thread:$0]  (%p7904_p7), %s7342_s25, 4096, %s7340_s12, %s7362_s18, %s5135_s30, %s5135_s30, %s5136_s13  }
 0x570 PF: > { %s7905_s15 = sld [smem:[#allocation14_spill]]  ;;  %s7906_s17 = sld [smem:[#allocation12_spill]] }
 0x571   : > { %s7907_s28 = sld [smem:[#allocation17_spill]] }
 0x576   : > { %p4803_p13 = scmp.ge.s32.totalorder %s7905_s15, 2  ;;  %s3867_s20 = sand.u32 1, %s7906_s17  }
 0x577   : > { %p7908_p1 = scmp.ne.s32.totalorder %s7907_s28, 0  ;;  %s3868_s16 = scalar_lea.sflag [#allocation4], %s3867_s20 }
 0x579   : > { %p4794_p6 = pnand %p4803_p13, %p7908_p1 }
 0x57b   : > { %5108 = dma.done.wait (!%p4794_p6), %s3868_s16, 4096  }
 0x57c   : > { %5110 = vsyncadd (!%p4794_p6), %s3868_s16, 4294963200  ;;  %s7909_s16 = sld [smem:[#allocation15_spill]]  ;;  %s7910_s19 = sld [smem:[#allocation13_spill]] }
 0x57d   : > { %s7911_s15 = sld [smem:[#allocation16_spill]]  ;;  %s7912_s13 = smov %s5117_s14 }
 0x582   : > { %p22_p9 = scmp.ge.s32.totalorder %s7909_s16, 4   ;;  %s7913_s14 = smov %s7910_s19 }
 0x584   :  { %24 = sbr.rel (!%p22_p9) target bundleno = 5 (0x5), region = 109 }
 0x58b   :  { %3873 = vsyncpa [#allocation3], 1 }
 0x58c   :  { %3875 = vsyncpa [#allocation3 + $0x1], 1 }
 0x58d   :  { %3876 = vsyncpa [#allocation6], 1 }
 0x58e   :  { %3877 = vsyncpa [#allocation4], 1 }
 0x58f   :  { %3879 = vsyncpa [#allocation4 + $0x1], 1 }

</bundles_post_ra>
